<compile_context>
chip_gen: v5e
topology: v5e:2x2
jax: 0.10.0
libtpu: 0.0.40
codegen_flags: <defaults>
</compile_context>

<pallas_src>
import functools

import numpy as np
import jax
import jax.numpy as jnp
from jax.experimental import pallas as pl
from jax.experimental.pallas import tpu as pltpu

# ---------------- model hyper-parameters (small, consistent with ViTCore.__init__) ------
IMG_SIZE = 16
PATCH = 4
EMB_DIM = 32
N_LAYERS = 2
N_HEADS = 2
DIM_HEAD = 8
MLP_DIM = 64
N_CHANNELS = 4

PATCH_DIM = N_CHANNELS * PATCH * PATCH          # 64
NUM_PATCHES = (IMG_SIZE // PATCH) ** 2          # 16
SEQ = NUM_PATCHES + 1                           # 17 (cls + patches)
INNER_DIM = N_HEADS * DIM_HEAD                  # 16
LN_EPS = 1e-5                                   # PyTorch nn.LayerNorm default
ATTN_SCALE = DIM_HEAD ** -0.5
OUT_LANES = 128                                 # lane-dense output slab width

# bf16 MXU operands (f32 accumulation).  Set to jnp.float32 for exact parity with the
# f32 PyTorch reference (costs ~3x the MXU passes).
MATMUL_DTYPE = jnp.bfloat16


# ---------------- packed parameter slab layout (static) ---------------------------------
def _make_layout():
    names_shapes = [
        ("pe_ln0_g", (1, PATCH_DIM)), ("pe_ln0_b", (1, PATCH_DIM)),
        ("pe_w", (PATCH_DIM, EMB_DIM)), ("pe_b", (1, EMB_DIM)),
        ("pe_ln1_g", (1, EMB_DIM)), ("pe_ln1_b", (1, EMB_DIM)),
        ("cls", (1, EMB_DIM)), ("pos", (SEQ, EMB_DIM)),
    ]
    for i in range(N_LAYERS):
        names_shapes += [
            (f"l{i}_aln_g", (1, EMB_DIM)), (f"l{i}_aln_b", (1, EMB_DIM)),
            (f"l{i}_wqkv", (EMB_DIM, 3 * INNER_DIM)),
            (f"l{i}_wout", (INNER_DIM, EMB_DIM)), (f"l{i}_bout", (1, EMB_DIM)),
            (f"l{i}_fln_g", (1, EMB_DIM)), (f"l{i}_fln_b", (1, EMB_DIM)),
            (f"l{i}_w1", (EMB_DIM, MLP_DIM)), (f"l{i}_b1", (1, MLP_DIM)),
            (f"l{i}_w2", (MLP_DIM, EMB_DIM)), (f"l{i}_b2", (1, EMB_DIM)),
        ]
    names_shapes += [("fin_g", (1, EMB_DIM)), ("fin_b", (1, EMB_DIM))]

    layout, row = {}, 0
    for name, (r, c) in names_shapes:
        layout[name] = (row, r, c)
        row += ((r + 7) // 8) * 8            # 8-sublane aligned start per parameter
    total = ((row + 7) // 8) * 8
    return layout, total


PARAM_LAYOUT, PARAM_ROWS = _make_layout()    # PARAM_ROWS == 552 -> 552*128*4B ~= 276 KiB


def pack_params(params):
    """Concatenate all parameters into one (PARAM_ROWS, 128) f32 slab (done once, host-side)."""
    slab = np.zeros((PARAM_ROWS, 128), np.float32)
    for name, (off, r, c) in PARAM_LAYOUT.items():
        slab[off:off + r, :c] = np.asarray(params[name], np.float32).reshape(r, c)
    return jnp.asarray(slab)


# ---------------- elementwise helpers used INSIDE the kernel ----------------------------
def _erf_approx(x):
    # Abramowitz & Stegun 7.1.26 (max abs err ~1.5e-7 ~= f32 resolution).
    # Kept (instead of lax.erf) to guarantee a clean Mosaic lowering; exp goes to the EUP.
    a1, a2, a3, a4, a5 = 0.254829592, -0.284496736, 1.421413741, -1.453152027, 1.061405429
    p = 0.3275911
    ax = jnp.abs(x)
    t = 1.0 / (1.0 + p * ax)
    poly = ((((a5 * t + a4) * t + a3) * t + a2) * t + a1) * t
    y = 1.0 - poly * jnp.exp(-ax * ax)
    return jnp.where(x >= 0.0, y, -y)


def _gelu_exact(x):
    # nn.GELU() default in PyTorch is the exact (erf-based) GELU.
    return 0.5 * x * (1.0 + _erf_approx(x * 0.7071067811865476))


def _layernorm(x, g, b):
    mean = jnp.mean(x, axis=-1, keepdims=True)
    var = jnp.mean(jnp.square(x - mean), axis=-1, keepdims=True)
    return (x - mean) * jax.lax.rsqrt(var + LN_EPS) * g + b


# ---------------- fused ViT forward kernel ----------------------------------------------
def _vit_fused_kernel(x_ref, p_ref, o_ref):
    # x_ref: (bps, SEQ, PATCH_DIM)  -- row 0 per batch is a dummy slot for the cls token
    # p_ref: (PARAM_ROWS, 128)      -- packed parameter slab, VMEM-resident, constant index
    # o_ref: (bps, SEQ, OUT_LANES)  -- lane-dense output; lanes [EMB_DIM:] are zero padding
    bps = x_ref.shape[0]

    def P(name):
        off, r, c = PARAM_LAYOUT[name]
        return p_ref[off:off + r, 0:c]       # static, sublane-aligned slab slice

    def mm(a, w):
        # MXU matmul: bf16 operands, f32 accumulation.
        return jnp.dot(a.astype(MATMUL_DTYPE), w.astype(MATMUL_DTYPE),
                       preferred_element_type=jnp.float32)

    ln0_g, ln0_b = P("pe_ln0_g"), P("pe_ln0_b")
    w_pe, b_pe = P("pe_w"), P("pe_b")
    ln1_g, ln1_b = P("pe_ln1_g"), P("pe_ln1_b")
    cls, pos = P("cls"), P("pos")
    fin_g, fin_b = P("fin_g"), P("fin_b")

    row_idx = jax.lax.broadcasted_iota(jnp.int32, (SEQ, EMB_DIM), 0)
    cls_bcast = jnp.broadcast_to(cls, (SEQ, EMB_DIM))
    lane_pad = jnp.zeros((SEQ, OUT_LANES - EMB_DIM), jnp.float32)

    for b in range(bps):                                      # static unroll over batch
        # ---- patch embedding: LayerNorm -> Linear -> LayerNorm (dummy row 0 discarded) --
        px = x_ref[b]                                         # (SEQ, PATCH_DIM)
        pe = _layernorm(px, ln0_g, ln0_b)
        pe = mm(pe, w_pe) + b_pe
        pe = _layernorm(pe, ln1_g, ln1_b)                     # (SEQ, EMB_DIM)

        # ---- cls token (row 0) + positional embedding; emb dropout is identity ---------
        x = jnp.where(row_idx == 0, cls_bcast, pe) + pos

        # ---- transformer layers --------------------------------------------------------
        for i in range(N_LAYERS):
            # attention block
            xn = _layernorm(x, P(f"l{i}_aln_g"), P(f"l{i}_aln_b"))
            qkv = mm(xn, P(f"l{i}_wqkv"))                     # (SEQ, 3*INNER_DIM)

            heads = []
            for h in range(N_HEADS):                          # static unroll
                lo = h * DIM_HEAD
                q = qkv[:, lo:lo + DIM_HEAD]
                k = qkv[:, INNER_DIM + lo:INNER_DIM + lo + DIM_HEAD]
                v = qkv[:, 2 * INNER_DIM + lo:2 * INNER_DIM + lo + DIM_HEAD]
                # q @ k^T (contract last dims; no materialized transpose)
                s = jax.lax.dot_general(
                    q.astype(MATMUL_DTYPE), k.astype(MATMUL_DTYPE),
                    (((1,), (1,)), ((), ())),
                    preferred_element_type=jnp.float32) * ATTN_SCALE
                m = jnp.max(s, axis=-1, keepdims=True)
                e = jnp.exp(s - m)
                p = e / jnp.sum(e, axis=-1, keepdims=True)    # exact softmax (parity)
                heads.append(mm(p, v))                        # (SEQ, DIM_HEAD)

            # single out-projection on the lane-concatenated heads (1 dot instead of 2)
            o_all = jnp.concatenate(heads, axis=-1)           # (SEQ, INNER_DIM)
            x = x + mm(o_all, P(f"l{i}_wout")) + P(f"l{i}_bout")

            # feed-forward block
            xn = _layernorm(x, P(f"l{i}_fln_g"), P(f"l{i}_fln_b"))
            h1 = _gelu_exact(mm(xn, P(f"l{i}_w1")) + P(f"l{i}_b1"))
            x = x + mm(h1, P(f"l{i}_w2")) + P(f"l{i}_b2")

        # ---- final LayerNorm + single lane-dense (128-wide) HBM store ------------------
        y = _layernorm(x, fin_g, fin_b)
        o_ref[b] = jnp.concatenate([y, lane_pad], axis=-1).astype(o_ref.dtype)


# ---------------- wrapper ----------------------------------------------------------------
def _cost_estimate(batch):
    per_elem_flops = (
        2 * SEQ * PATCH_DIM * EMB_DIM
        + N_LAYERS * (
            2 * SEQ * EMB_DIM * 3 * INNER_DIM
            + N_HEADS * (2 * 2 * SEQ * SEQ * DIM_HEAD)
            + 2 * SEQ * INNER_DIM * EMB_DIM
            + 2 * 2 * SEQ * EMB_DIM * MLP_DIM
        )
    )
    per_elem_trans = N_LAYERS * (N_HEADS * SEQ * SEQ + SEQ * MLP_DIM) + 8 * SEQ
    bytes_accessed = (batch * SEQ * PATCH_DIM * 4          # patch input read
                      + PARAM_ROWS * 128 * 4               # packed weight slab read
                      + batch * SEQ * OUT_LANES * 4)       # lane-padded output write
    return pl.CostEstimate(flops=batch * per_elem_flops,
                           transcendentals=batch * per_elem_trans,
                           bytes_accessed=bytes_accessed)


def _batch_per_step(batch):
    # v7x has 2 TensorCores -> split the batch across cores (grid=(2,), "parallel").
    # v5e/v6e are single-TC  -> fold the whole batch into one grid step (no serial
    # step overhead, single input DMA).
    try:
        kind = jax.devices()[0].device_kind.lower()
    except Exception:  # pragma: no cover
        kind = ""
    n_tc = 2 if "v7" in kind else 1
    if n_tc > 1 and batch % n_tc == 0:
        return batch // n_tc
    return batch


@functools.partial(jax.jit, static_argnames=("batch_per_step",))
def _vit_forward_jit(img, packed, batch_per_step):
    B, C, H, W = img.shape
    gh, gw = H // PATCH, W // PATCH
    # Rearrange('b c (h p1) (w p2) -> b (h w) (p1 p2 c)')  — layout glue, done once in XLA.
    x = img.reshape(B, C, gh, PATCH, gw, PATCH)
    x = x.transpose(0, 2, 4, 3, 5, 1).reshape(B, gh * gw, PATCH * PATCH * C)
    # Dummy leading row per batch: that sequence slot is overwritten by the cls token
    # inside the kernel (iota/where select), so its patch-embed math is discarded.
    x = jnp.pad(x, ((0, 0), (1, 0), (0, 0))).astype(jnp.float32)     # (B, SEQ, PATCH_DIM)

    grid = (B // batch_per_step,)
    out = pl.pallas_call(
        _vit_fused_kernel,
        out_shape=jax.ShapeDtypeStruct((B, SEQ, OUT_LANES), jnp.float32),
        grid=grid,
        in_specs=[
            pl.BlockSpec((batch_per_step, SEQ, PATCH_DIM), lambda g: (g, 0, 0)),
            # single packed weight slab, constant index_map -> VMEM-resident, never re-DMAed
            pl.BlockSpec((PARAM_ROWS, 128), lambda g: (0, 0)),
        ],
        out_specs=pl.BlockSpec((batch_per_step, SEQ, OUT_LANES), lambda g: (g, 0, 0)),
        compiler_params=pltpu.CompilerParams(dimension_semantics=("parallel",)),
        cost_estimate=_cost_estimate(B),
    )(x, packed)
    # strip the lane padding (cheap XLA slice on ~4 KiB of data)
    return out[:, :, :EMB_DIM]


def vit_core_forward(img, packed_params):
    return _vit_forward_jit(img, packed_params, _batch_per_step(img.shape[0]))


# ---------------- deterministic parameter init -------------------------------------------
def init_params(key):
    keys = iter(jax.random.split(key, 32))

    def dense(din, dout):
        return jax.random.normal(next(keys), (din, dout), jnp.float32) / jnp.sqrt(float(din))

    p = {
        "pe_ln0_g": jnp.ones((1, PATCH_DIM), jnp.float32),
        "pe_ln0_b": jnp.zeros((1, PATCH_DIM), jnp.float32),
        "pe_w": dense(PATCH_DIM, EMB_DIM),
        "pe_b": jnp.zeros((1, EMB_DIM), jnp.float32),
        "pe_ln1_g": jnp.ones((1, EMB_DIM), jnp.float32),
        "pe_ln1_b": jnp.zeros((1, EMB_DIM), jnp.float32),
        "cls": jax.random.normal(next(keys), (1, EMB_DIM), jnp.float32),
        "pos": jax.random.normal(next(keys), (SEQ, EMB_DIM), jnp.float32),
        "fin_g": jnp.ones((1, EMB_DIM), jnp.float32),
        "fin_b": jnp.zeros((1, EMB_DIM), jnp.float32),
    }
    for i in range(N_LAYERS):
        p[f"l{i}_aln_g"] = jnp.ones((1, EMB_DIM), jnp.float32)
        p[f"l{i}_aln_b"] = jnp.zeros((1, EMB_DIM), jnp.float32)
        p[f"l{i}_wqkv"] = dense(EMB_DIM, 3 * INNER_DIM)           # bias=False in to_qkv
        p[f"l{i}_wout"] = dense(INNER_DIM, EMB_DIM)
        p[f"l{i}_bout"] = jnp.zeros((1, EMB_DIM), jnp.float32)
        p[f"l{i}_fln_g"] = jnp.ones((1, EMB_DIM), jnp.float32)
        p[f"l{i}_fln_b"] = jnp.zeros((1, EMB_DIM), jnp.float32)
        p[f"l{i}_w1"] = dense(EMB_DIM, MLP_DIM)
        p[f"l{i}_b1"] = jnp.zeros((1, MLP_DIM), jnp.float32)
        p[f"l{i}_w2"] = dense(MLP_DIM, EMB_DIM)
        p[f"l{i}_b2"] = jnp.zeros((1, EMB_DIM), jnp.float32)
    return p


# ---------------- main --------------------------------------------------------------------
if __name__ == "__main__":
    key = jax.random.PRNGKey(0)
    k_img, k_par = jax.random.split(key)
    img = jax.random.normal(k_img, (2, N_CHANNELS, IMG_SIZE, IMG_SIZE), jnp.float32)  # NCHW
    params = init_params(k_par)
    packed = pack_params(params)          # one (552, 128) f32 weight slab

    out = vit_core_forward(img, packed)
    out = jax.block_until_ready(out)
    assert out.shape == (2, SEQ, EMB_DIM), out.shape
    assert bool(jnp.all(jnp.isfinite(out)))
    print("KERNEL_OK")
</pallas_src>

<mosaic_0001>
module attributes {stable_mosaic.version = 11 : i64} {
  func.func @_vit_fused_kernel(%arg0: i32, %arg1: memref<2x17x64xf32, #tpu.memory_space<vmem>>, %arg2: memref<552x128xf32, #tpu.memory_space<vmem>>, %arg3: memref<2x17x128xf32, #tpu.memory_space<vmem>>) attributes {dimension_semantics = [#tpu.dimension_semantics<parallel>], iteration_bounds = array<i64: 1>, scalar_prefetch = 0 : i64, scratch_operands = 0 : i64, tpu.core_type = #tpu.core_type<tc>, window_params = [{transform_indices = @transform_0, window_bounds = array<i64: 2, 17, 64>}, {pipeline_mode = #tpu.pipeline_mode<synchronous>, transform_indices = @transform_1, window_bounds = array<i64: 552, 128>}, {transform_indices = @transform_2, window_bounds = array<i64: 2, 17, 128>}]} {
    %c0 = arith.constant 0 : index
    %c0_0 = arith.constant 0 : index
    %0 = vector.load %arg2[%c0, %c0_0] : memref<552x128xf32, #tpu.memory_space<vmem>>, vector<1x64xf32>
    %c8 = arith.constant 8 : index
    %c0_1 = arith.constant 0 : index
    %1 = vector.load %arg2[%c8, %c0_1] : memref<552x128xf32, #tpu.memory_space<vmem>>, vector<1x64xf32>
    %c16 = arith.constant 16 : index
    %c0_2 = arith.constant 0 : index
    %2 = vector.load %arg2[%c16, %c0_2] : memref<552x128xf32, #tpu.memory_space<vmem>>, vector<64x32xf32>
    %c80 = arith.constant 80 : index
    %c0_3 = arith.constant 0 : index
    %3 = vector.load %arg2[%c80, %c0_3] : memref<552x128xf32, #tpu.memory_space<vmem>>, vector<1x32xf32>
    %c88 = arith.constant 88 : index
    %c0_4 = arith.constant 0 : index
    %4 = vector.load %arg2[%c88, %c0_4] : memref<552x128xf32, #tpu.memory_space<vmem>>, vector<1x32xf32>
    %c96 = arith.constant 96 : index
    %c0_5 = arith.constant 0 : index
    %5 = vector.load %arg2[%c96, %c0_5] : memref<552x128xf32, #tpu.memory_space<vmem>>, vector<1x32xf32>
    %c104 = arith.constant 104 : index
    %c0_6 = arith.constant 0 : index
    %6 = vector.load %arg2[%c104, %c0_6] : memref<552x128xf32, #tpu.memory_space<vmem>>, vector<1x32xf32>
    %c112 = arith.constant 112 : index
    %c0_7 = arith.constant 0 : index
    %7 = vector.load %arg2[%c112, %c0_7] : memref<552x128xf32, #tpu.memory_space<vmem>>, vector<17x32xf32>
    %c536 = arith.constant 536 : index
    %c0_8 = arith.constant 0 : index
    %8 = vector.load %arg2[%c536, %c0_8] : memref<552x128xf32, #tpu.memory_space<vmem>>, vector<1x32xf32>
    %c544 = arith.constant 544 : index
    %c0_9 = arith.constant 0 : index
    %9 = vector.load %arg2[%c544, %c0_9] : memref<552x128xf32, #tpu.memory_space<vmem>>, vector<1x32xf32>
    %10 = tpu.iota {dimensions = array<i32: 0>} : vector<17x32xi32>
    %11 = vector.shape_cast %6 : vector<1x32xf32> to vector<1x32xf32>
    %12 = vector.broadcast %11 : vector<1x32xf32> to vector<17x32xf32>
    %cst = arith.constant 0.000000e+00 : f32
    %13 = vector.broadcast %cst : f32 to vector<17x96xf32>
    %c0_10 = arith.constant 0 : index
    %c0_11 = arith.constant 0 : index
    %c0_12 = arith.constant 0 : index
    %14 = vector.load %arg1[%c0_10, %c0_11, %c0_12] : memref<2x17x64xf32, #tpu.memory_space<vmem>>, vector<1x17x64xf32>
    %15 = vector.shape_cast %14 : vector<1x17x64xf32> to vector<17x64xf32>
    %cst_13 = arith.constant dense<0.000000e+00> : vector<17xf32>
    %16 = vector.multi_reduction <add>, %15, %cst_13 [1] : vector<17x64xf32> to vector<17xf32>
    %17 = vector.shape_cast %16 : vector<17xf32> to vector<17x1xf32>
    %cst_14 = arith.constant 6.400000e+01 : f32
    %18 = vector.broadcast %cst_14 : f32 to vector<17x1xf32>
    %19 = arith.divf %17, %18 : vector<17x1xf32>
    %20 = vector.broadcast %19 : vector<17x1xf32> to vector<17x64xf32>
    %21 = arith.subf %15, %20 : vector<17x64xf32>
    %22 = arith.mulf %21, %21 : vector<17x64xf32>
    %cst_15 = arith.constant dense<0.000000e+00> : vector<17xf32>
    %23 = vector.multi_reduction <add>, %22, %cst_15 [1] : vector<17x64xf32> to vector<17xf32>
    %24 = vector.shape_cast %23 : vector<17xf32> to vector<17x1xf32>
    %cst_16 = arith.constant 6.400000e+01 : f32
    %25 = vector.broadcast %cst_16 : f32 to vector<17x1xf32>
    %26 = arith.divf %24, %25 : vector<17x1xf32>
    %27 = vector.broadcast %19 : vector<17x1xf32> to vector<17x64xf32>
    %28 = arith.subf %15, %27 : vector<17x64xf32>
    %cst_17 = arith.constant 9.99999974E-6 : f32
    %29 = vector.broadcast %cst_17 : f32 to vector<17x1xf32>
    %30 = arith.addf %26, %29 : vector<17x1xf32>
    %31 = math.rsqrt %30 : vector<17x1xf32>
    %32 = vector.broadcast %31 : vector<17x1xf32> to vector<17x64xf32>
    %33 = arith.mulf %28, %32 : vector<17x64xf32>
    %34 = vector.broadcast %0 : vector<1x64xf32> to vector<17x64xf32>
    %35 = arith.mulf %33, %34 : vector<17x64xf32>
    %36 = vector.broadcast %1 : vector<1x64xf32> to vector<17x64xf32>
    %37 = arith.addf %35, %36 : vector<17x64xf32>
    %38 = arith.truncf %37 : vector<17x64xf32> to vector<17x64xbf16>
    %39 = arith.truncf %2 : vector<64x32xf32> to vector<64x32xbf16>
    %cst_18 = arith.constant dense<0.000000e+00> : vector<17x32xf32>
    %40 = tpu.matmul %38, %39, %cst_18 {dimension_numbers = #tpu.dot_dimension_numbers<[1], [0], [0], [1], [0, 0, 1, 1], [], []>} : vector<17x64xbf16>, vector<64x32xbf16>, vector<17x32xf32> -> vector<17x32xf32>
    %41 = vector.broadcast %3 : vector<1x32xf32> to vector<17x32xf32>
    %42 = arith.addf %40, %41 : vector<17x32xf32>
    %cst_19 = arith.constant dense<0.000000e+00> : vector<17xf32>
    %43 = vector.multi_reduction <add>, %42, %cst_19 [1] : vector<17x32xf32> to vector<17xf32>
    %44 = vector.shape_cast %43 : vector<17xf32> to vector<17x1xf32>
    %cst_20 = arith.constant 3.200000e+01 : f32
    %45 = vector.broadcast %cst_20 : f32 to vector<17x1xf32>
    %46 = arith.divf %44, %45 : vector<17x1xf32>
    %47 = vector.broadcast %46 : vector<17x1xf32> to vector<17x32xf32>
    %48 = arith.subf %42, %47 : vector<17x32xf32>
    %49 = arith.mulf %48, %48 : vector<17x32xf32>
    %cst_21 = arith.constant dense<0.000000e+00> : vector<17xf32>
    %50 = vector.multi_reduction <add>, %49, %cst_21 [1] : vector<17x32xf32> to vector<17xf32>
    %51 = vector.shape_cast %50 : vector<17xf32> to vector<17x1xf32>
    %cst_22 = arith.constant 3.200000e+01 : f32
    %52 = vector.broadcast %cst_22 : f32 to vector<17x1xf32>
    %53 = arith.divf %51, %52 : vector<17x1xf32>
    %54 = vector.broadcast %46 : vector<17x1xf32> to vector<17x32xf32>
    %55 = arith.subf %42, %54 : vector<17x32xf32>
    %cst_23 = arith.constant 9.99999974E-6 : f32
    %56 = vector.broadcast %cst_23 : f32 to vector<17x1xf32>
    %57 = arith.addf %53, %56 : vector<17x1xf32>
    %58 = math.rsqrt %57 : vector<17x1xf32>
    %59 = vector.broadcast %58 : vector<17x1xf32> to vector<17x32xf32>
    %60 = arith.mulf %55, %59 : vector<17x32xf32>
    %61 = vector.broadcast %4 : vector<1x32xf32> to vector<17x32xf32>
    %62 = arith.mulf %60, %61 : vector<17x32xf32>
    %63 = vector.broadcast %5 : vector<1x32xf32> to vector<17x32xf32>
    %64 = arith.addf %62, %63 : vector<17x32xf32>
    %c0_i32 = arith.constant 0 : i32
    %65 = vector.broadcast %c0_i32 : i32 to vector<17x32xi32>
    %66 = arith.cmpi eq, %10, %65 : vector<17x32xi32>
    %67 = arith.select %66, %12, %64 : vector<17x32xi1>, vector<17x32xf32>
    %68 = arith.addf %67, %7 : vector<17x32xf32>
    %c136 = arith.constant 136 : index
    %c0_24 = arith.constant 0 : index
    %69 = vector.load %arg2[%c136, %c0_24] : memref<552x128xf32, #tpu.memory_space<vmem>>, vector<1x32xf32>
    %c144 = arith.constant 144 : index
    %c0_25 = arith.constant 0 : index
    %70 = vector.load %arg2[%c144, %c0_25] : memref<552x128xf32, #tpu.memory_space<vmem>>, vector<1x32xf32>
    %cst_26 = arith.constant dense<0.000000e+00> : vector<17xf32>
    %71 = vector.multi_reduction <add>, %68, %cst_26 [1] : vector<17x32xf32> to vector<17xf32>
    %72 = vector.shape_cast %71 : vector<17xf32> to vector<17x1xf32>
    %cst_27 = arith.constant 3.200000e+01 : f32
    %73 = vector.broadcast %cst_27 : f32 to vector<17x1xf32>
    %74 = arith.divf %72, %73 : vector<17x1xf32>
    %75 = vector.broadcast %74 : vector<17x1xf32> to vector<17x32xf32>
    %76 = arith.subf %68, %75 : vector<17x32xf32>
    %77 = arith.mulf %76, %76 : vector<17x32xf32>
    %cst_28 = arith.constant dense<0.000000e+00> : vector<17xf32>
    %78 = vector.multi_reduction <add>, %77, %cst_28 [1] : vector<17x32xf32> to vector<17xf32>
    %79 = vector.shape_cast %78 : vector<17xf32> to vector<17x1xf32>
    %cst_29 = arith.constant 3.200000e+01 : f32
    %80 = vector.broadcast %cst_29 : f32 to vector<17x1xf32>
    %81 = arith.divf %79, %80 : vector<17x1xf32>
    %82 = vector.broadcast %74 : vector<17x1xf32> to vector<17x32xf32>
    %83 = arith.subf %68, %82 : vector<17x32xf32>
    %cst_30 = arith.constant 9.99999974E-6 : f32
    %84 = vector.broadcast %cst_30 : f32 to vector<17x1xf32>
    %85 = arith.addf %81, %84 : vector<17x1xf32>
    %86 = math.rsqrt %85 : vector<17x1xf32>
    %87 = vector.broadcast %86 : vector<17x1xf32> to vector<17x32xf32>
    %88 = arith.mulf %83, %87 : vector<17x32xf32>
    %89 = vector.broadcast %69 : vector<1x32xf32> to vector<17x32xf32>
    %90 = arith.mulf %88, %89 : vector<17x32xf32>
    %91 = vector.broadcast %70 : vector<1x32xf32> to vector<17x32xf32>
    %92 = arith.addf %90, %91 : vector<17x32xf32>
    %c152 = arith.constant 152 : index
    %c0_31 = arith.constant 0 : index
    %93 = vector.load %arg2[%c152, %c0_31] : memref<552x128xf32, #tpu.memory_space<vmem>>, vector<32x48xf32>
    %94 = arith.truncf %92 : vector<17x32xf32> to vector<17x32xbf16>
    %95 = arith.truncf %93 : vector<32x48xf32> to vector<32x48xbf16>
    %cst_32 = arith.constant dense<0.000000e+00> : vector<17x48xf32>
    %96 = tpu.matmul %94, %95, %cst_32 {dimension_numbers = #tpu.dot_dimension_numbers<[1], [0], [0], [1], [0, 0, 1, 1], [], []>} : vector<17x32xbf16>, vector<32x48xbf16>, vector<17x48xf32> -> vector<17x48xf32>
    %97 = vector.extract_strided_slice %96 {offsets = [0, 0], sizes = [17, 8], strides = [1, 1]} : vector<17x48xf32> to vector<17x8xf32>
    %98 = vector.extract_strided_slice %96 {offsets = [0, 16], sizes = [17, 8], strides = [1, 1]} : vector<17x48xf32> to vector<17x8xf32>
    %99 = vector.extract_strided_slice %96 {offsets = [0, 32], sizes = [17, 8], strides = [1, 1]} : vector<17x48xf32> to vector<17x8xf32>
    %100 = arith.truncf %97 : vector<17x8xf32> to vector<17x8xbf16>
    %101 = arith.truncf %98 : vector<17x8xf32> to vector<17x8xbf16>
    %cst_33 = arith.constant dense<0.000000e+00> : vector<17x17xf32>
    %102 = tpu.matmul %100, %101, %cst_33 {dimension_numbers = #tpu.dot_dimension_numbers<[1], [1], [0], [0], [0, 0, 1, 0], [], []>} : vector<17x8xbf16>, vector<17x8xbf16>, vector<17x17xf32> -> vector<17x17xf32>
    %cst_34 = arith.constant 0.353553385 : f32
    %103 = vector.broadcast %cst_34 : f32 to vector<17x17xf32>
    %104 = arith.mulf %102, %103 : vector<17x17xf32>
    %cst_35 = arith.constant dense<0xFF800000> : vector<17xf32>
    %105 = vector.multi_reduction <maximumf>, %104, %cst_35 [1] : vector<17x17xf32> to vector<17xf32>
    %106 = vector.shape_cast %105 : vector<17xf32> to vector<17x1xf32>
    %107 = vector.broadcast %106 : vector<17x1xf32> to vector<17x17xf32>
    %108 = arith.subf %104, %107 : vector<17x17xf32>
    %109 = math.exp %108 : vector<17x17xf32>
    %cst_36 = arith.constant dense<0.000000e+00> : vector<17xf32>
    %110 = vector.multi_reduction <add>, %109, %cst_36 [1] : vector<17x17xf32> to vector<17xf32>
    %111 = vector.shape_cast %110 : vector<17xf32> to vector<17x1xf32>
    %112 = vector.broadcast %111 : vector<17x1xf32> to vector<17x17xf32>
    %113 = arith.divf %109, %112 : vector<17x17xf32>
    %114 = arith.truncf %113 : vector<17x17xf32> to vector<17x17xbf16>
    %115 = arith.truncf %99 : vector<17x8xf32> to vector<17x8xbf16>
    %cst_37 = arith.constant dense<0.000000e+00> : vector<17x8xf32>
    %116 = tpu.matmul %114, %115, %cst_37 {dimension_numbers = #tpu.dot_dimension_numbers<[1], [0], [0], [1], [0, 0, 1, 1], [], []>} : vector<17x17xbf16>, vector<17x8xbf16>, vector<17x8xf32> -> vector<17x8xf32>
    %117 = vector.extract_strided_slice %96 {offsets = [0, 8], sizes = [17, 8], strides = [1, 1]} : vector<17x48xf32> to vector<17x8xf32>
    %118 = vector.extract_strided_slice %96 {offsets = [0, 24], sizes = [17, 8], strides = [1, 1]} : vector<17x48xf32> to vector<17x8xf32>
    %119 = vector.extract_strided_slice %96 {offsets = [0, 40], sizes = [17, 8], strides = [1, 1]} : vector<17x48xf32> to vector<17x8xf32>
    %120 = arith.truncf %117 : vector<17x8xf32> to vector<17x8xbf16>
    %121 = arith.truncf %118 : vector<17x8xf32> to vector<17x8xbf16>
    %cst_38 = arith.constant dense<0.000000e+00> : vector<17x17xf32>
    %122 = tpu.matmul %120, %121, %cst_38 {dimension_numbers = #tpu.dot_dimension_numbers<[1], [1], [0], [0], [0, 0, 1, 0], [], []>} : vector<17x8xbf16>, vector<17x8xbf16>, vector<17x17xf32> -> vector<17x17xf32>
    %cst_39 = arith.constant 0.353553385 : f32
    %123 = vector.broadcast %cst_39 : f32 to vector<17x17xf32>
    %124 = arith.mulf %122, %123 : vector<17x17xf32>
    %cst_40 = arith.constant dense<0xFF800000> : vector<17xf32>
    %125 = vector.multi_reduction <maximumf>, %124, %cst_40 [1] : vector<17x17xf32> to vector<17xf32>
    %126 = vector.shape_cast %125 : vector<17xf32> to vector<17x1xf32>
    %127 = vector.broadcast %126 : vector<17x1xf32> to vector<17x17xf32>
    %128 = arith.subf %124, %127 : vector<17x17xf32>
    %129 = math.exp %128 : vector<17x17xf32>
    %cst_41 = arith.constant dense<0.000000e+00> : vector<17xf32>
    %130 = vector.multi_reduction <add>, %129, %cst_41 [1] : vector<17x17xf32> to vector<17xf32>
    %131 = vector.shape_cast %130 : vector<17xf32> to vector<17x1xf32>
    %132 = vector.broadcast %131 : vector<17x1xf32> to vector<17x17xf32>
    %133 = arith.divf %129, %132 : vector<17x17xf32>
    %134 = arith.truncf %133 : vector<17x17xf32> to vector<17x17xbf16>
    %135 = arith.truncf %119 : vector<17x8xf32> to vector<17x8xbf16>
    %cst_42 = arith.constant dense<0.000000e+00> : vector<17x8xf32>
    %136 = tpu.matmul %134, %135, %cst_42 {dimension_numbers = #tpu.dot_dimension_numbers<[1], [0], [0], [1], [0, 0, 1, 1], [], []>} : vector<17x17xbf16>, vector<17x8xbf16>, vector<17x8xf32> -> vector<17x8xf32>
    %137 = tpu.concatenate %116, %136 in 1 : vector<17x8xf32>, vector<17x8xf32> -> vector<17x16xf32>
    %c184 = arith.constant 184 : index
    %c0_43 = arith.constant 0 : index
    %138 = vector.load %arg2[%c184, %c0_43] : memref<552x128xf32, #tpu.memory_space<vmem>>, vector<16x32xf32>
    %139 = arith.truncf %137 : vector<17x16xf32> to vector<17x16xbf16>
    %140 = arith.truncf %138 : vector<16x32xf32> to vector<16x32xbf16>
    %cst_44 = arith.constant dense<0.000000e+00> : vector<17x32xf32>
    %141 = tpu.matmul %139, %140, %cst_44 {dimension_numbers = #tpu.dot_dimension_numbers<[1], [0], [0], [1], [0, 0, 1, 1], [], []>} : vector<17x16xbf16>, vector<16x32xbf16>, vector<17x32xf32> -> vector<17x32xf32>
    %142 = arith.addf %68, %141 : vector<17x32xf32>
    %c200 = arith.constant 200 : index
    %c0_45 = arith.constant 0 : index
    %143 = vector.load %arg2[%c200, %c0_45] : memref<552x128xf32, #tpu.memory_space<vmem>>, vector<1x32xf32>
    %144 = vector.broadcast %143 : vector<1x32xf32> to vector<17x32xf32>
    %145 = arith.addf %142, %144 : vector<17x32xf32>
    %c208 = arith.constant 208 : index
    %c0_46 = arith.constant 0 : index
    %146 = vector.load %arg2[%c208, %c0_46] : memref<552x128xf32, #tpu.memory_space<vmem>>, vector<1x32xf32>
    %c216 = arith.constant 216 : index
    %c0_47 = arith.constant 0 : index
    %147 = vector.load %arg2[%c216, %c0_47] : memref<552x128xf32, #tpu.memory_space<vmem>>, vector<1x32xf32>
    %cst_48 = arith.constant dense<0.000000e+00> : vector<17xf32>
    %148 = vector.multi_reduction <add>, %145, %cst_48 [1] : vector<17x32xf32> to vector<17xf32>
    %149 = vector.shape_cast %148 : vector<17xf32> to vector<17x1xf32>
    %cst_49 = arith.constant 3.200000e+01 : f32
    %150 = vector.broadcast %cst_49 : f32 to vector<17x1xf32>
    %151 = arith.divf %149, %150 : vector<17x1xf32>
    %152 = vector.broadcast %151 : vector<17x1xf32> to vector<17x32xf32>
    %153 = arith.subf %145, %152 : vector<17x32xf32>
    %154 = arith.mulf %153, %153 : vector<17x32xf32>
    %cst_50 = arith.constant dense<0.000000e+00> : vector<17xf32>
    %155 = vector.multi_reduction <add>, %154, %cst_50 [1] : vector<17x32xf32> to vector<17xf32>
    %156 = vector.shape_cast %155 : vector<17xf32> to vector<17x1xf32>
    %cst_51 = arith.constant 3.200000e+01 : f32
    %157 = vector.broadcast %cst_51 : f32 to vector<17x1xf32>
    %158 = arith.divf %156, %157 : vector<17x1xf32>
    %159 = vector.broadcast %151 : vector<17x1xf32> to vector<17x32xf32>
    %160 = arith.subf %145, %159 : vector<17x32xf32>
    %cst_52 = arith.constant 9.99999974E-6 : f32
    %161 = vector.broadcast %cst_52 : f32 to vector<17x1xf32>
    %162 = arith.addf %158, %161 : vector<17x1xf32>
    %163 = math.rsqrt %162 : vector<17x1xf32>
    %164 = vector.broadcast %163 : vector<17x1xf32> to vector<17x32xf32>
    %165 = arith.mulf %160, %164 : vector<17x32xf32>
    %166 = vector.broadcast %146 : vector<1x32xf32> to vector<17x32xf32>
    %167 = arith.mulf %165, %166 : vector<17x32xf32>
    %168 = vector.broadcast %147 : vector<1x32xf32> to vector<17x32xf32>
    %169 = arith.addf %167, %168 : vector<17x32xf32>
    %c224 = arith.constant 224 : index
    %c0_53 = arith.constant 0 : index
    %170 = vector.load %arg2[%c224, %c0_53] : memref<552x128xf32, #tpu.memory_space<vmem>>, vector<32x64xf32>
    %171 = arith.truncf %169 : vector<17x32xf32> to vector<17x32xbf16>
    %172 = arith.truncf %170 : vector<32x64xf32> to vector<32x64xbf16>
    %cst_54 = arith.constant dense<0.000000e+00> : vector<17x64xf32>
    %173 = tpu.matmul %171, %172, %cst_54 {dimension_numbers = #tpu.dot_dimension_numbers<[1], [0], [0], [1], [0, 0, 1, 1], [], []>} : vector<17x32xbf16>, vector<32x64xbf16>, vector<17x64xf32> -> vector<17x64xf32>
    %c256 = arith.constant 256 : index
    %c0_55 = arith.constant 0 : index
    %174 = vector.load %arg2[%c256, %c0_55] : memref<552x128xf32, #tpu.memory_space<vmem>>, vector<1x64xf32>
    %175 = vector.broadcast %174 : vector<1x64xf32> to vector<17x64xf32>
    %176 = arith.addf %173, %175 : vector<17x64xf32>
    %cst_56 = arith.constant 5.000000e-01 : f32
    %177 = vector.broadcast %cst_56 : f32 to vector<17x64xf32>
    %178 = arith.mulf %177, %176 : vector<17x64xf32>
    %cst_57 = arith.constant 0.707106769 : f32
    %179 = vector.broadcast %cst_57 : f32 to vector<17x64xf32>
    %180 = arith.mulf %176, %179 : vector<17x64xf32>
    %181 = math.absf %180 : vector<17x64xf32>
    %cst_58 = arith.constant 0.327591091 : f32
    %182 = vector.broadcast %cst_58 : f32 to vector<17x64xf32>
    %183 = arith.mulf %182, %181 : vector<17x64xf32>
    %cst_59 = arith.constant 1.000000e+00 : f32
    %184 = vector.broadcast %cst_59 : f32 to vector<17x64xf32>
    %185 = arith.addf %184, %183 : vector<17x64xf32>
    %cst_60 = arith.constant 1.000000e+00 : f32
    %186 = vector.broadcast %cst_60 : f32 to vector<17x64xf32>
    %187 = arith.divf %186, %185 : vector<17x64xf32>
    %cst_61 = arith.constant 1.06140542 : f32
    %188 = vector.broadcast %cst_61 : f32 to vector<17x64xf32>
    %189 = arith.mulf %188, %187 : vector<17x64xf32>
    %cst_62 = arith.constant -1.45315206 : f32
    %190 = vector.broadcast %cst_62 : f32 to vector<17x64xf32>
    %191 = arith.addf %189, %190 : vector<17x64xf32>
    %192 = arith.mulf %191, %187 : vector<17x64xf32>
    %cst_63 = arith.constant 1.42141378 : f32
    %193 = vector.broadcast %cst_63 : f32 to vector<17x64xf32>
    %194 = arith.addf %192, %193 : vector<17x64xf32>
    %195 = arith.mulf %194, %187 : vector<17x64xf32>
    %cst_64 = arith.constant -0.284496725 : f32
    %196 = vector.broadcast %cst_64 : f32 to vector<17x64xf32>
    %197 = arith.addf %195, %196 : vector<17x64xf32>
    %198 = arith.mulf %197, %187 : vector<17x64xf32>
    %cst_65 = arith.constant 0.254829586 : f32
    %199 = vector.broadcast %cst_65 : f32 to vector<17x64xf32>
    %200 = arith.addf %198, %199 : vector<17x64xf32>
    %201 = arith.mulf %200, %187 : vector<17x64xf32>
    %cst_66 = arith.constant 0.000000e+00 : f32
    %202 = vector.broadcast %cst_66 : f32 to vector<17x64xf32>
    %203 = arith.subf %202, %181 : vector<17x64xf32>
    %204 = arith.mulf %203, %181 : vector<17x64xf32>
    %205 = math.exp %204 : vector<17x64xf32>
    %206 = arith.mulf %201, %205 : vector<17x64xf32>
    %cst_67 = arith.constant 1.000000e+00 : f32
    %207 = vector.broadcast %cst_67 : f32 to vector<17x64xf32>
    %208 = arith.subf %207, %206 : vector<17x64xf32>
    %cst_68 = arith.constant 0.000000e+00 : f32
    %209 = vector.broadcast %cst_68 : f32 to vector<17x64xf32>
    %210 = arith.cmpf oge, %180, %209 : vector<17x64xf32>
    %cst_69 = arith.constant 0.000000e+00 : f32
    %211 = vector.broadcast %cst_69 : f32 to vector<17x64xf32>
    %212 = arith.subf %211, %208 : vector<17x64xf32>
    %213 = arith.select %210, %208, %212 : vector<17x64xi1>, vector<17x64xf32>
    %cst_70 = arith.constant 1.000000e+00 : f32
    %214 = vector.broadcast %cst_70 : f32 to vector<17x64xf32>
    %215 = arith.addf %214, %213 : vector<17x64xf32>
    %216 = arith.mulf %178, %215 : vector<17x64xf32>
    %c264 = arith.constant 264 : index
    %c0_71 = arith.constant 0 : index
    %217 = vector.load %arg2[%c264, %c0_71] : memref<552x128xf32, #tpu.memory_space<vmem>>, vector<64x32xf32>
    %218 = arith.truncf %216 : vector<17x64xf32> to vector<17x64xbf16>
    %219 = arith.truncf %217 : vector<64x32xf32> to vector<64x32xbf16>
    %cst_72 = arith.constant dense<0.000000e+00> : vector<17x32xf32>
    %220 = tpu.matmul %218, %219, %cst_72 {dimension_numbers = #tpu.dot_dimension_numbers<[1], [0], [0], [1], [0, 0, 1, 1], [], []>} : vector<17x64xbf16>, vector<64x32xbf16>, vector<17x32xf32> -> vector<17x32xf32>
    %221 = arith.addf %145, %220 : vector<17x32xf32>
    %c328 = arith.constant 328 : index
    %c0_73 = arith.constant 0 : index
    %222 = vector.load %arg2[%c328, %c0_73] : memref<552x128xf32, #tpu.memory_space<vmem>>, vector<1x32xf32>
    %223 = vector.broadcast %222 : vector<1x32xf32> to vector<17x32xf32>
    %224 = arith.addf %221, %223 : vector<17x32xf32>
    %c336 = arith.constant 336 : index
    %c0_74 = arith.constant 0 : index
    %225 = vector.load %arg2[%c336, %c0_74] : memref<552x128xf32, #tpu.memory_space<vmem>>, vector<1x32xf32>
    %c344 = arith.constant 344 : index
    %c0_75 = arith.constant 0 : index
    %226 = vector.load %arg2[%c344, %c0_75] : memref<552x128xf32, #tpu.memory_space<vmem>>, vector<1x32xf32>
    %cst_76 = arith.constant dense<0.000000e+00> : vector<17xf32>
    %227 = vector.multi_reduction <add>, %224, %cst_76 [1] : vector<17x32xf32> to vector<17xf32>
    %228 = vector.shape_cast %227 : vector<17xf32> to vector<17x1xf32>
    %cst_77 = arith.constant 3.200000e+01 : f32
    %229 = vector.broadcast %cst_77 : f32 to vector<17x1xf32>
    %230 = arith.divf %228, %229 : vector<17x1xf32>
    %231 = vector.broadcast %230 : vector<17x1xf32> to vector<17x32xf32>
    %232 = arith.subf %224, %231 : vector<17x32xf32>
    %233 = arith.mulf %232, %232 : vector<17x32xf32>
    %cst_78 = arith.constant dense<0.000000e+00> : vector<17xf32>
    %234 = vector.multi_reduction <add>, %233, %cst_78 [1] : vector<17x32xf32> to vector<17xf32>
    %235 = vector.shape_cast %234 : vector<17xf32> to vector<17x1xf32>
    %cst_79 = arith.constant 3.200000e+01 : f32
    %236 = vector.broadcast %cst_79 : f32 to vector<17x1xf32>
    %237 = arith.divf %235, %236 : vector<17x1xf32>
    %238 = vector.broadcast %230 : vector<17x1xf32> to vector<17x32xf32>
    %239 = arith.subf %224, %238 : vector<17x32xf32>
    %cst_80 = arith.constant 9.99999974E-6 : f32
    %240 = vector.broadcast %cst_80 : f32 to vector<17x1xf32>
    %241 = arith.addf %237, %240 : vector<17x1xf32>
    %242 = math.rsqrt %241 : vector<17x1xf32>
    %243 = vector.broadcast %242 : vector<17x1xf32> to vector<17x32xf32>
    %244 = arith.mulf %239, %243 : vector<17x32xf32>
    %245 = vector.broadcast %225 : vector<1x32xf32> to vector<17x32xf32>
    %246 = arith.mulf %244, %245 : vector<17x32xf32>
    %247 = vector.broadcast %226 : vector<1x32xf32> to vector<17x32xf32>
    %248 = arith.addf %246, %247 : vector<17x32xf32>
    %c352 = arith.constant 352 : index
    %c0_81 = arith.constant 0 : index
    %249 = vector.load %arg2[%c352, %c0_81] : memref<552x128xf32, #tpu.memory_space<vmem>>, vector<32x48xf32>
    %250 = arith.truncf %248 : vector<17x32xf32> to vector<17x32xbf16>
    %251 = arith.truncf %249 : vector<32x48xf32> to vector<32x48xbf16>
    %cst_82 = arith.constant dense<0.000000e+00> : vector<17x48xf32>
    %252 = tpu.matmul %250, %251, %cst_82 {dimension_numbers = #tpu.dot_dimension_numbers<[1], [0], [0], [1], [0, 0, 1, 1], [], []>} : vector<17x32xbf16>, vector<32x48xbf16>, vector<17x48xf32> -> vector<17x48xf32>
    %253 = vector.extract_strided_slice %252 {offsets = [0, 0], sizes = [17, 8], strides = [1, 1]} : vector<17x48xf32> to vector<17x8xf32>
    %254 = vector.extract_strided_slice %252 {offsets = [0, 16], sizes = [17, 8], strides = [1, 1]} : vector<17x48xf32> to vector<17x8xf32>
    %255 = vector.extract_strided_slice %252 {offsets = [0, 32], sizes = [17, 8], strides = [1, 1]} : vector<17x48xf32> to vector<17x8xf32>
    %256 = arith.truncf %253 : vector<17x8xf32> to vector<17x8xbf16>
    %257 = arith.truncf %254 : vector<17x8xf32> to vector<17x8xbf16>
    %cst_83 = arith.constant dense<0.000000e+00> : vector<17x17xf32>
    %258 = tpu.matmul %256, %257, %cst_83 {dimension_numbers = #tpu.dot_dimension_numbers<[1], [1], [0], [0], [0, 0, 1, 0], [], []>} : vector<17x8xbf16>, vector<17x8xbf16>, vector<17x17xf32> -> vector<17x17xf32>
    %cst_84 = arith.constant 0.353553385 : f32
    %259 = vector.broadcast %cst_84 : f32 to vector<17x17xf32>
    %260 = arith.mulf %258, %259 : vector<17x17xf32>
    %cst_85 = arith.constant dense<0xFF800000> : vector<17xf32>
    %261 = vector.multi_reduction <maximumf>, %260, %cst_85 [1] : vector<17x17xf32> to vector<17xf32>
    %262 = vector.shape_cast %261 : vector<17xf32> to vector<17x1xf32>
    %263 = vector.broadcast %262 : vector<17x1xf32> to vector<17x17xf32>
    %264 = arith.subf %260, %263 : vector<17x17xf32>
    %265 = math.exp %264 : vector<17x17xf32>
    %cst_86 = arith.constant dense<0.000000e+00> : vector<17xf32>
    %266 = vector.multi_reduction <add>, %265, %cst_86 [1] : vector<17x17xf32> to vector<17xf32>
    %267 = vector.shape_cast %266 : vector<17xf32> to vector<17x1xf32>
    %268 = vector.broadcast %267 : vector<17x1xf32> to vector<17x17xf32>
    %269 = arith.divf %265, %268 : vector<17x17xf32>
    %270 = arith.truncf %269 : vector<17x17xf32> to vector<17x17xbf16>
    %271 = arith.truncf %255 : vector<17x8xf32> to vector<17x8xbf16>
    %cst_87 = arith.constant dense<0.000000e+00> : vector<17x8xf32>
    %272 = tpu.matmul %270, %271, %cst_87 {dimension_numbers = #tpu.dot_dimension_numbers<[1], [0], [0], [1], [0, 0, 1, 1], [], []>} : vector<17x17xbf16>, vector<17x8xbf16>, vector<17x8xf32> -> vector<17x8xf32>
    %273 = vector.extract_strided_slice %252 {offsets = [0, 8], sizes = [17, 8], strides = [1, 1]} : vector<17x48xf32> to vector<17x8xf32>
    %274 = vector.extract_strided_slice %252 {offsets = [0, 24], sizes = [17, 8], strides = [1, 1]} : vector<17x48xf32> to vector<17x8xf32>
    %275 = vector.extract_strided_slice %252 {offsets = [0, 40], sizes = [17, 8], strides = [1, 1]} : vector<17x48xf32> to vector<17x8xf32>
    %276 = arith.truncf %273 : vector<17x8xf32> to vector<17x8xbf16>
    %277 = arith.truncf %274 : vector<17x8xf32> to vector<17x8xbf16>
    %cst_88 = arith.constant dense<0.000000e+00> : vector<17x17xf32>
    %278 = tpu.matmul %276, %277, %cst_88 {dimension_numbers = #tpu.dot_dimension_numbers<[1], [1], [0], [0], [0, 0, 1, 0], [], []>} : vector<17x8xbf16>, vector<17x8xbf16>, vector<17x17xf32> -> vector<17x17xf32>
    %cst_89 = arith.constant 0.353553385 : f32
    %279 = vector.broadcast %cst_89 : f32 to vector<17x17xf32>
    %280 = arith.mulf %278, %279 : vector<17x17xf32>
    %cst_90 = arith.constant dense<0xFF800000> : vector<17xf32>
    %281 = vector.multi_reduction <maximumf>, %280, %cst_90 [1] : vector<17x17xf32> to vector<17xf32>
    %282 = vector.shape_cast %281 : vector<17xf32> to vector<17x1xf32>
    %283 = vector.broadcast %282 : vector<17x1xf32> to vector<17x17xf32>
    %284 = arith.subf %280, %283 : vector<17x17xf32>
    %285 = math.exp %284 : vector<17x17xf32>
    %cst_91 = arith.constant dense<0.000000e+00> : vector<17xf32>
    %286 = vector.multi_reduction <add>, %285, %cst_91 [1] : vector<17x17xf32> to vector<17xf32>
    %287 = vector.shape_cast %286 : vector<17xf32> to vector<17x1xf32>
    %288 = vector.broadcast %287 : vector<17x1xf32> to vector<17x17xf32>
    %289 = arith.divf %285, %288 : vector<17x17xf32>
    %290 = arith.truncf %289 : vector<17x17xf32> to vector<17x17xbf16>
    %291 = arith.truncf %275 : vector<17x8xf32> to vector<17x8xbf16>
    %cst_92 = arith.constant dense<0.000000e+00> : vector<17x8xf32>
    %292 = tpu.matmul %290, %291, %cst_92 {dimension_numbers = #tpu.dot_dimension_numbers<[1], [0], [0], [1], [0, 0, 1, 1], [], []>} : vector<17x17xbf16>, vector<17x8xbf16>, vector<17x8xf32> -> vector<17x8xf32>
    %293 = tpu.concatenate %272, %292 in 1 : vector<17x8xf32>, vector<17x8xf32> -> vector<17x16xf32>
    %c384 = arith.constant 384 : index
    %c0_93 = arith.constant 0 : index
    %294 = vector.load %arg2[%c384, %c0_93] : memref<552x128xf32, #tpu.memory_space<vmem>>, vector<16x32xf32>
    %295 = arith.truncf %293 : vector<17x16xf32> to vector<17x16xbf16>
    %296 = arith.truncf %294 : vector<16x32xf32> to vector<16x32xbf16>
    %cst_94 = arith.constant dense<0.000000e+00> : vector<17x32xf32>
    %297 = tpu.matmul %295, %296, %cst_94 {dimension_numbers = #tpu.dot_dimension_numbers<[1], [0], [0], [1], [0, 0, 1, 1], [], []>} : vector<17x16xbf16>, vector<16x32xbf16>, vector<17x32xf32> -> vector<17x32xf32>
    %298 = arith.addf %224, %297 : vector<17x32xf32>
    %c400 = arith.constant 400 : index
    %c0_95 = arith.constant 0 : index
    %299 = vector.load %arg2[%c400, %c0_95] : memref<552x128xf32, #tpu.memory_space<vmem>>, vector<1x32xf32>
    %300 = vector.broadcast %299 : vector<1x32xf32> to vector<17x32xf32>
    %301 = arith.addf %298, %300 : vector<17x32xf32>
    %c408 = arith.constant 408 : index
    %c0_96 = arith.constant 0 : index
    %302 = vector.load %arg2[%c408, %c0_96] : memref<552x128xf32, #tpu.memory_space<vmem>>, vector<1x32xf32>
    %c416 = arith.constant 416 : index
    %c0_97 = arith.constant 0 : index
    %303 = vector.load %arg2[%c416, %c0_97] : memref<552x128xf32, #tpu.memory_space<vmem>>, vector<1x32xf32>
    %cst_98 = arith.constant dense<0.000000e+00> : vector<17xf32>
    %304 = vector.multi_reduction <add>, %301, %cst_98 [1] : vector<17x32xf32> to vector<17xf32>
    %305 = vector.shape_cast %304 : vector<17xf32> to vector<17x1xf32>
    %cst_99 = arith.constant 3.200000e+01 : f32
    %306 = vector.broadcast %cst_99 : f32 to vector<17x1xf32>
    %307 = arith.divf %305, %306 : vector<17x1xf32>
    %308 = vector.broadcast %307 : vector<17x1xf32> to vector<17x32xf32>
    %309 = arith.subf %301, %308 : vector<17x32xf32>
    %310 = arith.mulf %309, %309 : vector<17x32xf32>
    %cst_100 = arith.constant dense<0.000000e+00> : vector<17xf32>
    %311 = vector.multi_reduction <add>, %310, %cst_100 [1] : vector<17x32xf32> to vector<17xf32>
    %312 = vector.shape_cast %311 : vector<17xf32> to vector<17x1xf32>
    %cst_101 = arith.constant 3.200000e+01 : f32
    %313 = vector.broadcast %cst_101 : f32 to vector<17x1xf32>
    %314 = arith.divf %312, %313 : vector<17x1xf32>
    %315 = vector.broadcast %307 : vector<17x1xf32> to vector<17x32xf32>
    %316 = arith.subf %301, %315 : vector<17x32xf32>
    %cst_102 = arith.constant 9.99999974E-6 : f32
    %317 = vector.broadcast %cst_102 : f32 to vector<17x1xf32>
    %318 = arith.addf %314, %317 : vector<17x1xf32>
    %319 = math.rsqrt %318 : vector<17x1xf32>
    %320 = vector.broadcast %319 : vector<17x1xf32> to vector<17x32xf32>
    %321 = arith.mulf %316, %320 : vector<17x32xf32>
    %322 = vector.broadcast %302 : vector<1x32xf32> to vector<17x32xf32>
    %323 = arith.mulf %321, %322 : vector<17x32xf32>
    %324 = vector.broadcast %303 : vector<1x32xf32> to vector<17x32xf32>
    %325 = arith.addf %323, %324 : vector<17x32xf32>
    %c424 = arith.constant 424 : index
    %c0_103 = arith.constant 0 : index
    %326 = vector.load %arg2[%c424, %c0_103] : memref<552x128xf32, #tpu.memory_space<vmem>>, vector<32x64xf32>
    %327 = arith.truncf %325 : vector<17x32xf32> to vector<17x32xbf16>
    %328 = arith.truncf %326 : vector<32x64xf32> to vector<32x64xbf16>
    %cst_104 = arith.constant dense<0.000000e+00> : vector<17x64xf32>
    %329 = tpu.matmul %327, %328, %cst_104 {dimension_numbers = #tpu.dot_dimension_numbers<[1], [0], [0], [1], [0, 0, 1, 1], [], []>} : vector<17x32xbf16>, vector<32x64xbf16>, vector<17x64xf32> -> vector<17x64xf32>
    %c456 = arith.constant 456 : index
    %c0_105 = arith.constant 0 : index
    %330 = vector.load %arg2[%c456, %c0_105] : memref<552x128xf32, #tpu.memory_space<vmem>>, vector<1x64xf32>
    %331 = vector.broadcast %330 : vector<1x64xf32> to vector<17x64xf32>
    %332 = arith.addf %329, %331 : vector<17x64xf32>
    %cst_106 = arith.constant 5.000000e-01 : f32
    %333 = vector.broadcast %cst_106 : f32 to vector<17x64xf32>
    %334 = arith.mulf %333, %332 : vector<17x64xf32>
    %cst_107 = arith.constant 0.707106769 : f32
    %335 = vector.broadcast %cst_107 : f32 to vector<17x64xf32>
    %336 = arith.mulf %332, %335 : vector<17x64xf32>
    %337 = math.absf %336 : vector<17x64xf32>
    %cst_108 = arith.constant 0.327591091 : f32
    %338 = vector.broadcast %cst_108 : f32 to vector<17x64xf32>
    %339 = arith.mulf %338, %337 : vector<17x64xf32>
    %cst_109 = arith.constant 1.000000e+00 : f32
    %340 = vector.broadcast %cst_109 : f32 to vector<17x64xf32>
    %341 = arith.addf %340, %339 : vector<17x64xf32>
    %cst_110 = arith.constant 1.000000e+00 : f32
    %342 = vector.broadcast %cst_110 : f32 to vector<17x64xf32>
    %343 = arith.divf %342, %341 : vector<17x64xf32>
    %cst_111 = arith.constant 1.06140542 : f32
    %344 = vector.broadcast %cst_111 : f32 to vector<17x64xf32>
    %345 = arith.mulf %344, %343 : vector<17x64xf32>
    %cst_112 = arith.constant -1.45315206 : f32
    %346 = vector.broadcast %cst_112 : f32 to vector<17x64xf32>
    %347 = arith.addf %345, %346 : vector<17x64xf32>
    %348 = arith.mulf %347, %343 : vector<17x64xf32>
    %cst_113 = arith.constant 1.42141378 : f32
    %349 = vector.broadcast %cst_113 : f32 to vector<17x64xf32>
    %350 = arith.addf %348, %349 : vector<17x64xf32>
    %351 = arith.mulf %350, %343 : vector<17x64xf32>
    %cst_114 = arith.constant -0.284496725 : f32
    %352 = vector.broadcast %cst_114 : f32 to vector<17x64xf32>
    %353 = arith.addf %351, %352 : vector<17x64xf32>
    %354 = arith.mulf %353, %343 : vector<17x64xf32>
    %cst_115 = arith.constant 0.254829586 : f32
    %355 = vector.broadcast %cst_115 : f32 to vector<17x64xf32>
    %356 = arith.addf %354, %355 : vector<17x64xf32>
    %357 = arith.mulf %356, %343 : vector<17x64xf32>
    %cst_116 = arith.constant 0.000000e+00 : f32
    %358 = vector.broadcast %cst_116 : f32 to vector<17x64xf32>
    %359 = arith.subf %358, %337 : vector<17x64xf32>
    %360 = arith.mulf %359, %337 : vector<17x64xf32>
    %361 = math.exp %360 : vector<17x64xf32>
    %362 = arith.mulf %357, %361 : vector<17x64xf32>
    %cst_117 = arith.constant 1.000000e+00 : f32
    %363 = vector.broadcast %cst_117 : f32 to vector<17x64xf32>
    %364 = arith.subf %363, %362 : vector<17x64xf32>
    %cst_118 = arith.constant 0.000000e+00 : f32
    %365 = vector.broadcast %cst_118 : f32 to vector<17x64xf32>
    %366 = arith.cmpf oge, %336, %365 : vector<17x64xf32>
    %cst_119 = arith.constant 0.000000e+00 : f32
    %367 = vector.broadcast %cst_119 : f32 to vector<17x64xf32>
    %368 = arith.subf %367, %364 : vector<17x64xf32>
    %369 = arith.select %366, %364, %368 : vector<17x64xi1>, vector<17x64xf32>
    %cst_120 = arith.constant 1.000000e+00 : f32
    %370 = vector.broadcast %cst_120 : f32 to vector<17x64xf32>
    %371 = arith.addf %370, %369 : vector<17x64xf32>
    %372 = arith.mulf %334, %371 : vector<17x64xf32>
    %c464 = arith.constant 464 : index
    %c0_121 = arith.constant 0 : index
    %373 = vector.load %arg2[%c464, %c0_121] : memref<552x128xf32, #tpu.memory_space<vmem>>, vector<64x32xf32>
    %374 = arith.truncf %372 : vector<17x64xf32> to vector<17x64xbf16>
    %375 = arith.truncf %373 : vector<64x32xf32> to vector<64x32xbf16>
    %cst_122 = arith.constant dense<0.000000e+00> : vector<17x32xf32>
    %376 = tpu.matmul %374, %375, %cst_122 {dimension_numbers = #tpu.dot_dimension_numbers<[1], [0], [0], [1], [0, 0, 1, 1], [], []>} : vector<17x64xbf16>, vector<64x32xbf16>, vector<17x32xf32> -> vector<17x32xf32>
    %377 = arith.addf %301, %376 : vector<17x32xf32>
    %c528 = arith.constant 528 : index
    %c0_123 = arith.constant 0 : index
    %378 = vector.load %arg2[%c528, %c0_123] : memref<552x128xf32, #tpu.memory_space<vmem>>, vector<1x32xf32>
    %379 = vector.broadcast %378 : vector<1x32xf32> to vector<17x32xf32>
    %380 = arith.addf %377, %379 : vector<17x32xf32>
    %cst_124 = arith.constant dense<0.000000e+00> : vector<17xf32>
    %381 = vector.multi_reduction <add>, %380, %cst_124 [1] : vector<17x32xf32> to vector<17xf32>
    %382 = vector.shape_cast %381 : vector<17xf32> to vector<17x1xf32>
    %cst_125 = arith.constant 3.200000e+01 : f32
    %383 = vector.broadcast %cst_125 : f32 to vector<17x1xf32>
    %384 = arith.divf %382, %383 : vector<17x1xf32>
    %385 = vector.broadcast %384 : vector<17x1xf32> to vector<17x32xf32>
    %386 = arith.subf %380, %385 : vector<17x32xf32>
    %387 = arith.mulf %386, %386 : vector<17x32xf32>
    %cst_126 = arith.constant dense<0.000000e+00> : vector<17xf32>
    %388 = vector.multi_reduction <add>, %387, %cst_126 [1] : vector<17x32xf32> to vector<17xf32>
    %389 = vector.shape_cast %388 : vector<17xf32> to vector<17x1xf32>
    %cst_127 = arith.constant 3.200000e+01 : f32
    %390 = vector.broadcast %cst_127 : f32 to vector<17x1xf32>
    %391 = arith.divf %389, %390 : vector<17x1xf32>
    %392 = vector.broadcast %384 : vector<17x1xf32> to vector<17x32xf32>
    %393 = arith.subf %380, %392 : vector<17x32xf32>
    %cst_128 = arith.constant 9.99999974E-6 : f32
    %394 = vector.broadcast %cst_128 : f32 to vector<17x1xf32>
    %395 = arith.addf %391, %394 : vector<17x1xf32>
    %396 = math.rsqrt %395 : vector<17x1xf32>
    %397 = vector.broadcast %396 : vector<17x1xf32> to vector<17x32xf32>
    %398 = arith.mulf %393, %397 : vector<17x32xf32>
    %399 = vector.broadcast %8 : vector<1x32xf32> to vector<17x32xf32>
    %400 = arith.mulf %398, %399 : vector<17x32xf32>
    %401 = vector.broadcast %9 : vector<1x32xf32> to vector<17x32xf32>
    %402 = arith.addf %400, %401 : vector<17x32xf32>
    %403 = tpu.concatenate %402, %13 in 1 : vector<17x32xf32>, vector<17x96xf32> -> vector<17x128xf32>
    %c0_129 = arith.constant 0 : index
    %c0_130 = arith.constant 0 : index
    %c0_131 = arith.constant 0 : index
    %404 = vector.load %arg3[%c0_129, %c0_130, %c0_131] : memref<2x17x128xf32, #tpu.memory_space<vmem>>, vector<1x17x128xf32>
    %405 = vector.shape_cast %404 : vector<1x17x128xf32> to vector<17x128xf32>
    %406 = vector.shape_cast %403 : vector<17x128xf32> to vector<1x17x128xf32>
    tpu.vector_store %arg3[%c0_129, %c0_130, %c0_131], %406 {strides = array<i32>} : memref<2x17x128xf32, #tpu.memory_space<vmem>>, vector<1x17x128xf32>,
    %c1 = arith.constant 1 : index
    %c0_132 = arith.constant 0 : index
    %c0_133 = arith.constant 0 : index
    %407 = vector.load %arg1[%c1, %c0_132, %c0_133] : memref<2x17x64xf32, #tpu.memory_space<vmem>>, vector<1x17x64xf32>
    %408 = vector.shape_cast %407 : vector<1x17x64xf32> to vector<17x64xf32>
    %cst_134 = arith.constant dense<0.000000e+00> : vector<17xf32>
    %409 = vector.multi_reduction <add>, %408, %cst_134 [1] : vector<17x64xf32> to vector<17xf32>
    %410 = vector.shape_cast %409 : vector<17xf32> to vector<17x1xf32>
    %cst_135 = arith.constant 6.400000e+01 : f32
    %411 = vector.broadcast %cst_135 : f32 to vector<17x1xf32>
    %412 = arith.divf %410, %411 : vector<17x1xf32>
    %413 = vector.broadcast %412 : vector<17x1xf32> to vector<17x64xf32>
    %414 = arith.subf %408, %413 : vector<17x64xf32>
    %415 = arith.mulf %414, %414 : vector<17x64xf32>
    %cst_136 = arith.constant dense<0.000000e+00> : vector<17xf32>
    %416 = vector.multi_reduction <add>, %415, %cst_136 [1] : vector<17x64xf32> to vector<17xf32>
    %417 = vector.shape_cast %416 : vector<17xf32> to vector<17x1xf32>
    %cst_137 = arith.constant 6.400000e+01 : f32
    %418 = vector.broadcast %cst_137 : f32 to vector<17x1xf32>
    %419 = arith.divf %417, %418 : vector<17x1xf32>
    %420 = vector.broadcast %412 : vector<17x1xf32> to vector<17x64xf32>
    %421 = arith.subf %408, %420 : vector<17x64xf32>
    %cst_138 = arith.constant 9.99999974E-6 : f32
    %422 = vector.broadcast %cst_138 : f32 to vector<17x1xf32>
    %423 = arith.addf %419, %422 : vector<17x1xf32>
    %424 = math.rsqrt %423 : vector<17x1xf32>
    %425 = vector.broadcast %424 : vector<17x1xf32> to vector<17x64xf32>
    %426 = arith.mulf %421, %425 : vector<17x64xf32>
    %427 = vector.broadcast %0 : vector<1x64xf32> to vector<17x64xf32>
    %428 = arith.mulf %426, %427 : vector<17x64xf32>
    %429 = vector.broadcast %1 : vector<1x64xf32> to vector<17x64xf32>
    %430 = arith.addf %428, %429 : vector<17x64xf32>
    %431 = arith.truncf %430 : vector<17x64xf32> to vector<17x64xbf16>
    %432 = arith.truncf %2 : vector<64x32xf32> to vector<64x32xbf16>
    %cst_139 = arith.constant dense<0.000000e+00> : vector<17x32xf32>
    %433 = tpu.matmul %431, %432, %cst_139 {dimension_numbers = #tpu.dot_dimension_numbers<[1], [0], [0], [1], [0, 0, 1, 1], [], []>} : vector<17x64xbf16>, vector<64x32xbf16>, vector<17x32xf32> -> vector<17x32xf32>
    %434 = vector.broadcast %3 : vector<1x32xf32> to vector<17x32xf32>
    %435 = arith.addf %433, %434 : vector<17x32xf32>
    %cst_140 = arith.constant dense<0.000000e+00> : vector<17xf32>
    %436 = vector.multi_reduction <add>, %435, %cst_140 [1] : vector<17x32xf32> to vector<17xf32>
    %437 = vector.shape_cast %436 : vector<17xf32> to vector<17x1xf32>
    %cst_141 = arith.constant 3.200000e+01 : f32
    %438 = vector.broadcast %cst_141 : f32 to vector<17x1xf32>
    %439 = arith.divf %437, %438 : vector<17x1xf32>
    %440 = vector.broadcast %439 : vector<17x1xf32> to vector<17x32xf32>
    %441 = arith.subf %435, %440 : vector<17x32xf32>
    %442 = arith.mulf %441, %441 : vector<17x32xf32>
    %cst_142 = arith.constant dense<0.000000e+00> : vector<17xf32>
    %443 = vector.multi_reduction <add>, %442, %cst_142 [1] : vector<17x32xf32> to vector<17xf32>
    %444 = vector.shape_cast %443 : vector<17xf32> to vector<17x1xf32>
    %cst_143 = arith.constant 3.200000e+01 : f32
    %445 = vector.broadcast %cst_143 : f32 to vector<17x1xf32>
    %446 = arith.divf %444, %445 : vector<17x1xf32>
    %447 = vector.broadcast %439 : vector<17x1xf32> to vector<17x32xf32>
    %448 = arith.subf %435, %447 : vector<17x32xf32>
    %cst_144 = arith.constant 9.99999974E-6 : f32
    %449 = vector.broadcast %cst_144 : f32 to vector<17x1xf32>
    %450 = arith.addf %446, %449 : vector<17x1xf32>
    %451 = math.rsqrt %450 : vector<17x1xf32>
    %452 = vector.broadcast %451 : vector<17x1xf32> to vector<17x32xf32>
    %453 = arith.mulf %448, %452 : vector<17x32xf32>
    %454 = vector.broadcast %4 : vector<1x32xf32> to vector<17x32xf32>
    %455 = arith.mulf %453, %454 : vector<17x32xf32>
    %456 = vector.broadcast %5 : vector<1x32xf32> to vector<17x32xf32>
    %457 = arith.addf %455, %456 : vector<17x32xf32>
    %c0_i32_145 = arith.constant 0 : i32
    %458 = vector.broadcast %c0_i32_145 : i32 to vector<17x32xi32>
    %459 = arith.cmpi eq, %10, %458 : vector<17x32xi32>
    %460 = arith.select %459, %12, %457 : vector<17x32xi1>, vector<17x32xf32>
    %461 = arith.addf %460, %7 : vector<17x32xf32>
    %c136_146 = arith.constant 136 : index
    %c0_147 = arith.constant 0 : index
    %462 = vector.load %arg2[%c136_146, %c0_147] : memref<552x128xf32, #tpu.memory_space<vmem>>, vector<1x32xf32>
    %c144_148 = arith.constant 144 : index
    %c0_149 = arith.constant 0 : index
    %463 = vector.load %arg2[%c144_148, %c0_149] : memref<552x128xf32, #tpu.memory_space<vmem>>, vector<1x32xf32>
    %cst_150 = arith.constant dense<0.000000e+00> : vector<17xf32>
    %464 = vector.multi_reduction <add>, %461, %cst_150 [1] : vector<17x32xf32> to vector<17xf32>
    %465 = vector.shape_cast %464 : vector<17xf32> to vector<17x1xf32>
    %cst_151 = arith.constant 3.200000e+01 : f32
    %466 = vector.broadcast %cst_151 : f32 to vector<17x1xf32>
    %467 = arith.divf %465, %466 : vector<17x1xf32>
    %468 = vector.broadcast %467 : vector<17x1xf32> to vector<17x32xf32>
    %469 = arith.subf %461, %468 : vector<17x32xf32>
    %470 = arith.mulf %469, %469 : vector<17x32xf32>
    %cst_152 = arith.constant dense<0.000000e+00> : vector<17xf32>
    %471 = vector.multi_reduction <add>, %470, %cst_152 [1] : vector<17x32xf32> to vector<17xf32>
    %472 = vector.shape_cast %471 : vector<17xf32> to vector<17x1xf32>
    %cst_153 = arith.constant 3.200000e+01 : f32
    %473 = vector.broadcast %cst_153 : f32 to vector<17x1xf32>
    %474 = arith.divf %472, %473 : vector<17x1xf32>
    %475 = vector.broadcast %467 : vector<17x1xf32> to vector<17x32xf32>
    %476 = arith.subf %461, %475 : vector<17x32xf32>
    %cst_154 = arith.constant 9.99999974E-6 : f32
    %477 = vector.broadcast %cst_154 : f32 to vector<17x1xf32>
    %478 = arith.addf %474, %477 : vector<17x1xf32>
    %479 = math.rsqrt %478 : vector<17x1xf32>
    %480 = vector.broadcast %479 : vector<17x1xf32> to vector<17x32xf32>
    %481 = arith.mulf %476, %480 : vector<17x32xf32>
    %482 = vector.broadcast %462 : vector<1x32xf32> to vector<17x32xf32>
    %483 = arith.mulf %481, %482 : vector<17x32xf32>
    %484 = vector.broadcast %463 : vector<1x32xf32> to vector<17x32xf32>
    %485 = arith.addf %483, %484 : vector<17x32xf32>
    %c152_155 = arith.constant 152 : index
    %c0_156 = arith.constant 0 : index
    %486 = vector.load %arg2[%c152_155, %c0_156] : memref<552x128xf32, #tpu.memory_space<vmem>>, vector<32x48xf32>
    %487 = arith.truncf %485 : vector<17x32xf32> to vector<17x32xbf16>
    %488 = arith.truncf %486 : vector<32x48xf32> to vector<32x48xbf16>
    %cst_157 = arith.constant dense<0.000000e+00> : vector<17x48xf32>
    %489 = tpu.matmul %487, %488, %cst_157 {dimension_numbers = #tpu.dot_dimension_numbers<[1], [0], [0], [1], [0, 0, 1, 1], [], []>} : vector<17x32xbf16>, vector<32x48xbf16>, vector<17x48xf32> -> vector<17x48xf32>
    %490 = vector.extract_strided_slice %489 {offsets = [0, 0], sizes = [17, 8], strides = [1, 1]} : vector<17x48xf32> to vector<17x8xf32>
    %491 = vector.extract_strided_slice %489 {offsets = [0, 16], sizes = [17, 8], strides = [1, 1]} : vector<17x48xf32> to vector<17x8xf32>
    %492 = vector.extract_strided_slice %489 {offsets = [0, 32], sizes = [17, 8], strides = [1, 1]} : vector<17x48xf32> to vector<17x8xf32>
    %493 = arith.truncf %490 : vector<17x8xf32> to vector<17x8xbf16>
    %494 = arith.truncf %491 : vector<17x8xf32> to vector<17x8xbf16>
    %cst_158 = arith.constant dense<0.000000e+00> : vector<17x17xf32>
    %495 = tpu.matmul %493, %494, %cst_158 {dimension_numbers = #tpu.dot_dimension_numbers<[1], [1], [0], [0], [0, 0, 1, 0], [], []>} : vector<17x8xbf16>, vector<17x8xbf16>, vector<17x17xf32> -> vector<17x17xf32>
    %cst_159 = arith.constant 0.353553385 : f32
    %496 = vector.broadcast %cst_159 : f32 to vector<17x17xf32>
    %497 = arith.mulf %495, %496 : vector<17x17xf32>
    %cst_160 = arith.constant dense<0xFF800000> : vector<17xf32>
    %498 = vector.multi_reduction <maximumf>, %497, %cst_160 [1] : vector<17x17xf32> to vector<17xf32>
    %499 = vector.shape_cast %498 : vector<17xf32> to vector<17x1xf32>
    %500 = vector.broadcast %499 : vector<17x1xf32> to vector<17x17xf32>
    %501 = arith.subf %497, %500 : vector<17x17xf32>
    %502 = math.exp %501 : vector<17x17xf32>
    %cst_161 = arith.constant dense<0.000000e+00> : vector<17xf32>
    %503 = vector.multi_reduction <add>, %502, %cst_161 [1] : vector<17x17xf32> to vector<17xf32>
    %504 = vector.shape_cast %503 : vector<17xf32> to vector<17x1xf32>
    %505 = vector.broadcast %504 : vector<17x1xf32> to vector<17x17xf32>
    %506 = arith.divf %502, %505 : vector<17x17xf32>
    %507 = arith.truncf %506 : vector<17x17xf32> to vector<17x17xbf16>
    %508 = arith.truncf %492 : vector<17x8xf32> to vector<17x8xbf16>
    %cst_162 = arith.constant dense<0.000000e+00> : vector<17x8xf32>
    %509 = tpu.matmul %507, %508, %cst_162 {dimension_numbers = #tpu.dot_dimension_numbers<[1], [0], [0], [1], [0, 0, 1, 1], [], []>} : vector<17x17xbf16>, vector<17x8xbf16>, vector<17x8xf32> -> vector<17x8xf32>
    %510 = vector.extract_strided_slice %489 {offsets = [0, 8], sizes = [17, 8], strides = [1, 1]} : vector<17x48xf32> to vector<17x8xf32>
    %511 = vector.extract_strided_slice %489 {offsets = [0, 24], sizes = [17, 8], strides = [1, 1]} : vector<17x48xf32> to vector<17x8xf32>
    %512 = vector.extract_strided_slice %489 {offsets = [0, 40], sizes = [17, 8], strides = [1, 1]} : vector<17x48xf32> to vector<17x8xf32>
    %513 = arith.truncf %510 : vector<17x8xf32> to vector<17x8xbf16>
    %514 = arith.truncf %511 : vector<17x8xf32> to vector<17x8xbf16>
    %cst_163 = arith.constant dense<0.000000e+00> : vector<17x17xf32>
    %515 = tpu.matmul %513, %514, %cst_163 {dimension_numbers = #tpu.dot_dimension_numbers<[1], [1], [0], [0], [0, 0, 1, 0], [], []>} : vector<17x8xbf16>, vector<17x8xbf16>, vector<17x17xf32> -> vector<17x17xf32>
    %cst_164 = arith.constant 0.353553385 : f32
    %516 = vector.broadcast %cst_164 : f32 to vector<17x17xf32>
    %517 = arith.mulf %515, %516 : vector<17x17xf32>
    %cst_165 = arith.constant dense<0xFF800000> : vector<17xf32>
    %518 = vector.multi_reduction <maximumf>, %517, %cst_165 [1] : vector<17x17xf32> to vector<17xf32>
    %519 = vector.shape_cast %518 : vector<17xf32> to vector<17x1xf32>
    %520 = vector.broadcast %519 : vector<17x1xf32> to vector<17x17xf32>
    %521 = arith.subf %517, %520 : vector<17x17xf32>
    %522 = math.exp %521 : vector<17x17xf32>
    %cst_166 = arith.constant dense<0.000000e+00> : vector<17xf32>
    %523 = vector.multi_reduction <add>, %522, %cst_166 [1] : vector<17x17xf32> to vector<17xf32>
    %524 = vector.shape_cast %523 : vector<17xf32> to vector<17x1xf32>
    %525 = vector.broadcast %524 : vector<17x1xf32> to vector<17x17xf32>
    %526 = arith.divf %522, %525 : vector<17x17xf32>
    %527 = arith.truncf %526 : vector<17x17xf32> to vector<17x17xbf16>
    %528 = arith.truncf %512 : vector<17x8xf32> to vector<17x8xbf16>
    %cst_167 = arith.constant dense<0.000000e+00> : vector<17x8xf32>
    %529 = tpu.matmul %527, %528, %cst_167 {dimension_numbers = #tpu.dot_dimension_numbers<[1], [0], [0], [1], [0, 0, 1, 1], [], []>} : vector<17x17xbf16>, vector<17x8xbf16>, vector<17x8xf32> -> vector<17x8xf32>
    %530 = tpu.concatenate %509, %529 in 1 : vector<17x8xf32>, vector<17x8xf32> -> vector<17x16xf32>
    %c184_168 = arith.constant 184 : index
    %c0_169 = arith.constant 0 : index
    %531 = vector.load %arg2[%c184_168, %c0_169] : memref<552x128xf32, #tpu.memory_space<vmem>>, vector<16x32xf32>
    %532 = arith.truncf %530 : vector<17x16xf32> to vector<17x16xbf16>
    %533 = arith.truncf %531 : vector<16x32xf32> to vector<16x32xbf16>
    %cst_170 = arith.constant dense<0.000000e+00> : vector<17x32xf32>
    %534 = tpu.matmul %532, %533, %cst_170 {dimension_numbers = #tpu.dot_dimension_numbers<[1], [0], [0], [1], [0, 0, 1, 1], [], []>} : vector<17x16xbf16>, vector<16x32xbf16>, vector<17x32xf32> -> vector<17x32xf32>
    %535 = arith.addf %461, %534 : vector<17x32xf32>
    %c200_171 = arith.constant 200 : index
    %c0_172 = arith.constant 0 : index
    %536 = vector.load %arg2[%c200_171, %c0_172] : memref<552x128xf32, #tpu.memory_space<vmem>>, vector<1x32xf32>
    %537 = vector.broadcast %536 : vector<1x32xf32> to vector<17x32xf32>
    %538 = arith.addf %535, %537 : vector<17x32xf32>
    %c208_173 = arith.constant 208 : index
    %c0_174 = arith.constant 0 : index
    %539 = vector.load %arg2[%c208_173, %c0_174] : memref<552x128xf32, #tpu.memory_space<vmem>>, vector<1x32xf32>
    %c216_175 = arith.constant 216 : index
    %c0_176 = arith.constant 0 : index
    %540 = vector.load %arg2[%c216_175, %c0_176] : memref<552x128xf32, #tpu.memory_space<vmem>>, vector<1x32xf32>
    %cst_177 = arith.constant dense<0.000000e+00> : vector<17xf32>
    %541 = vector.multi_reduction <add>, %538, %cst_177 [1] : vector<17x32xf32> to vector<17xf32>
    %542 = vector.shape_cast %541 : vector<17xf32> to vector<17x1xf32>
    %cst_178 = arith.constant 3.200000e+01 : f32
    %543 = vector.broadcast %cst_178 : f32 to vector<17x1xf32>
    %544 = arith.divf %542, %543 : vector<17x1xf32>
    %545 = vector.broadcast %544 : vector<17x1xf32> to vector<17x32xf32>
    %546 = arith.subf %538, %545 : vector<17x32xf32>
    %547 = arith.mulf %546, %546 : vector<17x32xf32>
    %cst_179 = arith.constant dense<0.000000e+00> : vector<17xf32>
    %548 = vector.multi_reduction <add>, %547, %cst_179 [1] : vector<17x32xf32> to vector<17xf32>
    %549 = vector.shape_cast %548 : vector<17xf32> to vector<17x1xf32>
    %cst_180 = arith.constant 3.200000e+01 : f32
    %550 = vector.broadcast %cst_180 : f32 to vector<17x1xf32>
    %551 = arith.divf %549, %550 : vector<17x1xf32>
    %552 = vector.broadcast %544 : vector<17x1xf32> to vector<17x32xf32>
    %553 = arith.subf %538, %552 : vector<17x32xf32>
    %cst_181 = arith.constant 9.99999974E-6 : f32
    %554 = vector.broadcast %cst_181 : f32 to vector<17x1xf32>
    %555 = arith.addf %551, %554 : vector<17x1xf32>
    %556 = math.rsqrt %555 : vector<17x1xf32>
    %557 = vector.broadcast %556 : vector<17x1xf32> to vector<17x32xf32>
    %558 = arith.mulf %553, %557 : vector<17x32xf32>
    %559 = vector.broadcast %539 : vector<1x32xf32> to vector<17x32xf32>
    %560 = arith.mulf %558, %559 : vector<17x32xf32>
    %561 = vector.broadcast %540 : vector<1x32xf32> to vector<17x32xf32>
    %562 = arith.addf %560, %561 : vector<17x32xf32>
    %c224_182 = arith.constant 224 : index
    %c0_183 = arith.constant 0 : index
    %563 = vector.load %arg2[%c224_182, %c0_183] : memref<552x128xf32, #tpu.memory_space<vmem>>, vector<32x64xf32>
    %564 = arith.truncf %562 : vector<17x32xf32> to vector<17x32xbf16>
    %565 = arith.truncf %563 : vector<32x64xf32> to vector<32x64xbf16>
    %cst_184 = arith.constant dense<0.000000e+00> : vector<17x64xf32>
    %566 = tpu.matmul %564, %565, %cst_184 {dimension_numbers = #tpu.dot_dimension_numbers<[1], [0], [0], [1], [0, 0, 1, 1], [], []>} : vector<17x32xbf16>, vector<32x64xbf16>, vector<17x64xf32> -> vector<17x64xf32>
    %c256_185 = arith.constant 256 : index
    %c0_186 = arith.constant 0 : index
    %567 = vector.load %arg2[%c256_185, %c0_186] : memref<552x128xf32, #tpu.memory_space<vmem>>, vector<1x64xf32>
    %568 = vector.broadcast %567 : vector<1x64xf32> to vector<17x64xf32>
    %569 = arith.addf %566, %568 : vector<17x64xf32>
    %cst_187 = arith.constant 5.000000e-01 : f32
    %570 = vector.broadcast %cst_187 : f32 to vector<17x64xf32>
    %571 = arith.mulf %570, %569 : vector<17x64xf32>
    %cst_188 = arith.constant 0.707106769 : f32
    %572 = vector.broadcast %cst_188 : f32 to vector<17x64xf32>
    %573 = arith.mulf %569, %572 : vector<17x64xf32>
    %574 = math.absf %573 : vector<17x64xf32>
    %cst_189 = arith.constant 0.327591091 : f32
    %575 = vector.broadcast %cst_189 : f32 to vector<17x64xf32>
    %576 = arith.mulf %575, %574 : vector<17x64xf32>
    %cst_190 = arith.constant 1.000000e+00 : f32
    %577 = vector.broadcast %cst_190 : f32 to vector<17x64xf32>
    %578 = arith.addf %577, %576 : vector<17x64xf32>
    %cst_191 = arith.constant 1.000000e+00 : f32
    %579 = vector.broadcast %cst_191 : f32 to vector<17x64xf32>
    %580 = arith.divf %579, %578 : vector<17x64xf32>
    %cst_192 = arith.constant 1.06140542 : f32
    %581 = vector.broadcast %cst_192 : f32 to vector<17x64xf32>
    %582 = arith.mulf %581, %580 : vector<17x64xf32>
    %cst_193 = arith.constant -1.45315206 : f32
    %583 = vector.broadcast %cst_193 : f32 to vector<17x64xf32>
    %584 = arith.addf %582, %583 : vector<17x64xf32>
    %585 = arith.mulf %584, %580 : vector<17x64xf32>
    %cst_194 = arith.constant 1.42141378 : f32
    %586 = vector.broadcast %cst_194 : f32 to vector<17x64xf32>
    %587 = arith.addf %585, %586 : vector<17x64xf32>
    %588 = arith.mulf %587, %580 : vector<17x64xf32>
    %cst_195 = arith.constant -0.284496725 : f32
    %589 = vector.broadcast %cst_195 : f32 to vector<17x64xf32>
    %590 = arith.addf %588, %589 : vector<17x64xf32>
    %591 = arith.mulf %590, %580 : vector<17x64xf32>
    %cst_196 = arith.constant 0.254829586 : f32
    %592 = vector.broadcast %cst_196 : f32 to vector<17x64xf32>
    %593 = arith.addf %591, %592 : vector<17x64xf32>
    %594 = arith.mulf %593, %580 : vector<17x64xf32>
    %cst_197 = arith.constant 0.000000e+00 : f32
    %595 = vector.broadcast %cst_197 : f32 to vector<17x64xf32>
    %596 = arith.subf %595, %574 : vector<17x64xf32>
    %597 = arith.mulf %596, %574 : vector<17x64xf32>
    %598 = math.exp %597 : vector<17x64xf32>
    %599 = arith.mulf %594, %598 : vector<17x64xf32>
    %cst_198 = arith.constant 1.000000e+00 : f32
    %600 = vector.broadcast %cst_198 : f32 to vector<17x64xf32>
    %601 = arith.subf %600, %599 : vector<17x64xf32>
    %cst_199 = arith.constant 0.000000e+00 : f32
    %602 = vector.broadcast %cst_199 : f32 to vector<17x64xf32>
    %603 = arith.cmpf oge, %573, %602 : vector<17x64xf32>
    %cst_200 = arith.constant 0.000000e+00 : f32
    %604 = vector.broadcast %cst_200 : f32 to vector<17x64xf32>
    %605 = arith.subf %604, %601 : vector<17x64xf32>
    %606 = arith.select %603, %601, %605 : vector<17x64xi1>, vector<17x64xf32>
    %cst_201 = arith.constant 1.000000e+00 : f32
    %607 = vector.broadcast %cst_201 : f32 to vector<17x64xf32>
    %608 = arith.addf %607, %606 : vector<17x64xf32>
    %609 = arith.mulf %571, %608 : vector<17x64xf32>
    %c264_202 = arith.constant 264 : index
    %c0_203 = arith.constant 0 : index
    %610 = vector.load %arg2[%c264_202, %c0_203] : memref<552x128xf32, #tpu.memory_space<vmem>>, vector<64x32xf32>
    %611 = arith.truncf %609 : vector<17x64xf32> to vector<17x64xbf16>
    %612 = arith.truncf %610 : vector<64x32xf32> to vector<64x32xbf16>
    %cst_204 = arith.constant dense<0.000000e+00> : vector<17x32xf32>
    %613 = tpu.matmul %611, %612, %cst_204 {dimension_numbers = #tpu.dot_dimension_numbers<[1], [0], [0], [1], [0, 0, 1, 1], [], []>} : vector<17x64xbf16>, vector<64x32xbf16>, vector<17x32xf32> -> vector<17x32xf32>
    %614 = arith.addf %538, %613 : vector<17x32xf32>
    %c328_205 = arith.constant 328 : index
    %c0_206 = arith.constant 0 : index
    %615 = vector.load %arg2[%c328_205, %c0_206] : memref<552x128xf32, #tpu.memory_space<vmem>>, vector<1x32xf32>
    %616 = vector.broadcast %615 : vector<1x32xf32> to vector<17x32xf32>
    %617 = arith.addf %614, %616 : vector<17x32xf32>
    %c336_207 = arith.constant 336 : index
    %c0_208 = arith.constant 0 : index
    %618 = vector.load %arg2[%c336_207, %c0_208] : memref<552x128xf32, #tpu.memory_space<vmem>>, vector<1x32xf32>
    %c344_209 = arith.constant 344 : index
    %c0_210 = arith.constant 0 : index
    %619 = vector.load %arg2[%c344_209, %c0_210] : memref<552x128xf32, #tpu.memory_space<vmem>>, vector<1x32xf32>
    %cst_211 = arith.constant dense<0.000000e+00> : vector<17xf32>
    %620 = vector.multi_reduction <add>, %617, %cst_211 [1] : vector<17x32xf32> to vector<17xf32>
    %621 = vector.shape_cast %620 : vector<17xf32> to vector<17x1xf32>
    %cst_212 = arith.constant 3.200000e+01 : f32
    %622 = vector.broadcast %cst_212 : f32 to vector<17x1xf32>
    %623 = arith.divf %621, %622 : vector<17x1xf32>
    %624 = vector.broadcast %623 : vector<17x1xf32> to vector<17x32xf32>
    %625 = arith.subf %617, %624 : vector<17x32xf32>
    %626 = arith.mulf %625, %625 : vector<17x32xf32>
    %cst_213 = arith.constant dense<0.000000e+00> : vector<17xf32>
    %627 = vector.multi_reduction <add>, %626, %cst_213 [1] : vector<17x32xf32> to vector<17xf32>
    %628 = vector.shape_cast %627 : vector<17xf32> to vector<17x1xf32>
    %cst_214 = arith.constant 3.200000e+01 : f32
    %629 = vector.broadcast %cst_214 : f32 to vector<17x1xf32>
    %630 = arith.divf %628, %629 : vector<17x1xf32>
    %631 = vector.broadcast %623 : vector<17x1xf32> to vector<17x32xf32>
    %632 = arith.subf %617, %631 : vector<17x32xf32>
    %cst_215 = arith.constant 9.99999974E-6 : f32
    %633 = vector.broadcast %cst_215 : f32 to vector<17x1xf32>
    %634 = arith.addf %630, %633 : vector<17x1xf32>
    %635 = math.rsqrt %634 : vector<17x1xf32>
    %636 = vector.broadcast %635 : vector<17x1xf32> to vector<17x32xf32>
    %637 = arith.mulf %632, %636 : vector<17x32xf32>
    %638 = vector.broadcast %618 : vector<1x32xf32> to vector<17x32xf32>
    %639 = arith.mulf %637, %638 : vector<17x32xf32>
    %640 = vector.broadcast %619 : vector<1x32xf32> to vector<17x32xf32>
    %641 = arith.addf %639, %640 : vector<17x32xf32>
    %c352_216 = arith.constant 352 : index
    %c0_217 = arith.constant 0 : index
    %642 = vector.load %arg2[%c352_216, %c0_217] : memref<552x128xf32, #tpu.memory_space<vmem>>, vector<32x48xf32>
    %643 = arith.truncf %641 : vector<17x32xf32> to vector<17x32xbf16>
    %644 = arith.truncf %642 : vector<32x48xf32> to vector<32x48xbf16>
    %cst_218 = arith.constant dense<0.000000e+00> : vector<17x48xf32>
    %645 = tpu.matmul %643, %644, %cst_218 {dimension_numbers = #tpu.dot_dimension_numbers<[1], [0], [0], [1], [0, 0, 1, 1], [], []>} : vector<17x32xbf16>, vector<32x48xbf16>, vector<17x48xf32> -> vector<17x48xf32>
    %646 = vector.extract_strided_slice %645 {offsets = [0, 0], sizes = [17, 8], strides = [1, 1]} : vector<17x48xf32> to vector<17x8xf32>
    %647 = vector.extract_strided_slice %645 {offsets = [0, 16], sizes = [17, 8], strides = [1, 1]} : vector<17x48xf32> to vector<17x8xf32>
    %648 = vector.extract_strided_slice %645 {offsets = [0, 32], sizes = [17, 8], strides = [1, 1]} : vector<17x48xf32> to vector<17x8xf32>
    %649 = arith.truncf %646 : vector<17x8xf32> to vector<17x8xbf16>
    %650 = arith.truncf %647 : vector<17x8xf32> to vector<17x8xbf16>
    %cst_219 = arith.constant dense<0.000000e+00> : vector<17x17xf32>
    %651 = tpu.matmul %649, %650, %cst_219 {dimension_numbers = #tpu.dot_dimension_numbers<[1], [1], [0], [0], [0, 0, 1, 0], [], []>} : vector<17x8xbf16>, vector<17x8xbf16>, vector<17x17xf32> -> vector<17x17xf32>
    %cst_220 = arith.constant 0.353553385 : f32
    %652 = vector.broadcast %cst_220 : f32 to vector<17x17xf32>
    %653 = arith.mulf %651, %652 : vector<17x17xf32>
    %cst_221 = arith.constant dense<0xFF800000> : vector<17xf32>
    %654 = vector.multi_reduction <maximumf>, %653, %cst_221 [1] : vector<17x17xf32> to vector<17xf32>
    %655 = vector.shape_cast %654 : vector<17xf32> to vector<17x1xf32>
    %656 = vector.broadcast %655 : vector<17x1xf32> to vector<17x17xf32>
    %657 = arith.subf %653, %656 : vector<17x17xf32>
    %658 = math.exp %657 : vector<17x17xf32>
    %cst_222 = arith.constant dense<0.000000e+00> : vector<17xf32>
    %659 = vector.multi_reduction <add>, %658, %cst_222 [1] : vector<17x17xf32> to vector<17xf32>
    %660 = vector.shape_cast %659 : vector<17xf32> to vector<17x1xf32>
    %661 = vector.broadcast %660 : vector<17x1xf32> to vector<17x17xf32>
    %662 = arith.divf %658, %661 : vector<17x17xf32>
    %663 = arith.truncf %662 : vector<17x17xf32> to vector<17x17xbf16>
    %664 = arith.truncf %648 : vector<17x8xf32> to vector<17x8xbf16>
    %cst_223 = arith.constant dense<0.000000e+00> : vector<17x8xf32>
    %665 = tpu.matmul %663, %664, %cst_223 {dimension_numbers = #tpu.dot_dimension_numbers<[1], [0], [0], [1], [0, 0, 1, 1], [], []>} : vector<17x17xbf16>, vector<17x8xbf16>, vector<17x8xf32> -> vector<17x8xf32>
    %666 = vector.extract_strided_slice %645 {offsets = [0, 8], sizes = [17, 8], strides = [1, 1]} : vector<17x48xf32> to vector<17x8xf32>
    %667 = vector.extract_strided_slice %645 {offsets = [0, 24], sizes = [17, 8], strides = [1, 1]} : vector<17x48xf32> to vector<17x8xf32>
    %668 = vector.extract_strided_slice %645 {offsets = [0, 40], sizes = [17, 8], strides = [1, 1]} : vector<17x48xf32> to vector<17x8xf32>
    %669 = arith.truncf %666 : vector<17x8xf32> to vector<17x8xbf16>
    %670 = arith.truncf %667 : vector<17x8xf32> to vector<17x8xbf16>
    %cst_224 = arith.constant dense<0.000000e+00> : vector<17x17xf32>
    %671 = tpu.matmul %669, %670, %cst_224 {dimension_numbers = #tpu.dot_dimension_numbers<[1], [1], [0], [0], [0, 0, 1, 0], [], []>} : vector<17x8xbf16>, vector<17x8xbf16>, vector<17x17xf32> -> vector<17x17xf32>
    %cst_225 = arith.constant 0.353553385 : f32
    %672 = vector.broadcast %cst_225 : f32 to vector<17x17xf32>
    %673 = arith.mulf %671, %672 : vector<17x17xf32>
    %cst_226 = arith.constant dense<0xFF800000> : vector<17xf32>
    %674 = vector.multi_reduction <maximumf>, %673, %cst_226 [1] : vector<17x17xf32> to vector<17xf32>
    %675 = vector.shape_cast %674 : vector<17xf32> to vector<17x1xf32>
    %676 = vector.broadcast %675 : vector<17x1xf32> to vector<17x17xf32>
    %677 = arith.subf %673, %676 : vector<17x17xf32>
    %678 = math.exp %677 : vector<17x17xf32>
    %cst_227 = arith.constant dense<0.000000e+00> : vector<17xf32>
    %679 = vector.multi_reduction <add>, %678, %cst_227 [1] : vector<17x17xf32> to vector<17xf32>
    %680 = vector.shape_cast %679 : vector<17xf32> to vector<17x1xf32>
    %681 = vector.broadcast %680 : vector<17x1xf32> to vector<17x17xf32>
    %682 = arith.divf %678, %681 : vector<17x17xf32>
    %683 = arith.truncf %682 : vector<17x17xf32> to vector<17x17xbf16>
    %684 = arith.truncf %668 : vector<17x8xf32> to vector<17x8xbf16>
    %cst_228 = arith.constant dense<0.000000e+00> : vector<17x8xf32>
    %685 = tpu.matmul %683, %684, %cst_228 {dimension_numbers = #tpu.dot_dimension_numbers<[1], [0], [0], [1], [0, 0, 1, 1], [], []>} : vector<17x17xbf16>, vector<17x8xbf16>, vector<17x8xf32> -> vector<17x8xf32>
    %686 = tpu.concatenate %665, %685 in 1 : vector<17x8xf32>, vector<17x8xf32> -> vector<17x16xf32>
    %c384_229 = arith.constant 384 : index
    %c0_230 = arith.constant 0 : index
    %687 = vector.load %arg2[%c384_229, %c0_230] : memref<552x128xf32, #tpu.memory_space<vmem>>, vector<16x32xf32>
    %688 = arith.truncf %686 : vector<17x16xf32> to vector<17x16xbf16>
    %689 = arith.truncf %687 : vector<16x32xf32> to vector<16x32xbf16>
    %cst_231 = arith.constant dense<0.000000e+00> : vector<17x32xf32>
    %690 = tpu.matmul %688, %689, %cst_231 {dimension_numbers = #tpu.dot_dimension_numbers<[1], [0], [0], [1], [0, 0, 1, 1], [], []>} : vector<17x16xbf16>, vector<16x32xbf16>, vector<17x32xf32> -> vector<17x32xf32>
    %691 = arith.addf %617, %690 : vector<17x32xf32>
    %c400_232 = arith.constant 400 : index
    %c0_233 = arith.constant 0 : index
    %692 = vector.load %arg2[%c400_232, %c0_233] : memref<552x128xf32, #tpu.memory_space<vmem>>, vector<1x32xf32>
    %693 = vector.broadcast %692 : vector<1x32xf32> to vector<17x32xf32>
    %694 = arith.addf %691, %693 : vector<17x32xf32>
    %c408_234 = arith.constant 408 : index
    %c0_235 = arith.constant 0 : index
    %695 = vector.load %arg2[%c408_234, %c0_235] : memref<552x128xf32, #tpu.memory_space<vmem>>, vector<1x32xf32>
    %c416_236 = arith.constant 416 : index
    %c0_237 = arith.constant 0 : index
    %696 = vector.load %arg2[%c416_236, %c0_237] : memref<552x128xf32, #tpu.memory_space<vmem>>, vector<1x32xf32>
    %cst_238 = arith.constant dense<0.000000e+00> : vector<17xf32>
    %697 = vector.multi_reduction <add>, %694, %cst_238 [1] : vector<17x32xf32> to vector<17xf32>
    %698 = vector.shape_cast %697 : vector<17xf32> to vector<17x1xf32>
    %cst_239 = arith.constant 3.200000e+01 : f32
    %699 = vector.broadcast %cst_239 : f32 to vector<17x1xf32>
    %700 = arith.divf %698, %699 : vector<17x1xf32>
    %701 = vector.broadcast %700 : vector<17x1xf32> to vector<17x32xf32>
    %702 = arith.subf %694, %701 : vector<17x32xf32>
    %703 = arith.mulf %702, %702 : vector<17x32xf32>
    %cst_240 = arith.constant dense<0.000000e+00> : vector<17xf32>
    %704 = vector.multi_reduction <add>, %703, %cst_240 [1] : vector<17x32xf32> to vector<17xf32>
    %705 = vector.shape_cast %704 : vector<17xf32> to vector<17x1xf32>
    %cst_241 = arith.constant 3.200000e+01 : f32
    %706 = vector.broadcast %cst_241 : f32 to vector<17x1xf32>
    %707 = arith.divf %705, %706 : vector<17x1xf32>
    %708 = vector.broadcast %700 : vector<17x1xf32> to vector<17x32xf32>
    %709 = arith.subf %694, %708 : vector<17x32xf32>
    %cst_242 = arith.constant 9.99999974E-6 : f32
    %710 = vector.broadcast %cst_242 : f32 to vector<17x1xf32>
    %711 = arith.addf %707, %710 : vector<17x1xf32>
    %712 = math.rsqrt %711 : vector<17x1xf32>
    %713 = vector.broadcast %712 : vector<17x1xf32> to vector<17x32xf32>
    %714 = arith.mulf %709, %713 : vector<17x32xf32>
    %715 = vector.broadcast %695 : vector<1x32xf32> to vector<17x32xf32>
    %716 = arith.mulf %714, %715 : vector<17x32xf32>
    %717 = vector.broadcast %696 : vector<1x32xf32> to vector<17x32xf32>
    %718 = arith.addf %716, %717 : vector<17x32xf32>
    %c424_243 = arith.constant 424 : index
    %c0_244 = arith.constant 0 : index
    %719 = vector.load %arg2[%c424_243, %c0_244] : memref<552x128xf32, #tpu.memory_space<vmem>>, vector<32x64xf32>
    %720 = arith.truncf %718 : vector<17x32xf32> to vector<17x32xbf16>
    %721 = arith.truncf %719 : vector<32x64xf32> to vector<32x64xbf16>
    %cst_245 = arith.constant dense<0.000000e+00> : vector<17x64xf32>
    %722 = tpu.matmul %720, %721, %cst_245 {dimension_numbers = #tpu.dot_dimension_numbers<[1], [0], [0], [1], [0, 0, 1, 1], [], []>} : vector<17x32xbf16>, vector<32x64xbf16>, vector<17x64xf32> -> vector<17x64xf32>
    %c456_246 = arith.constant 456 : index
    %c0_247 = arith.constant 0 : index
    %723 = vector.load %arg2[%c456_246, %c0_247] : memref<552x128xf32, #tpu.memory_space<vmem>>, vector<1x64xf32>
    %724 = vector.broadcast %723 : vector<1x64xf32> to vector<17x64xf32>
    %725 = arith.addf %722, %724 : vector<17x64xf32>
    %cst_248 = arith.constant 5.000000e-01 : f32
    %726 = vector.broadcast %cst_248 : f32 to vector<17x64xf32>
    %727 = arith.mulf %726, %725 : vector<17x64xf32>
    %cst_249 = arith.constant 0.707106769 : f32
    %728 = vector.broadcast %cst_249 : f32 to vector<17x64xf32>
    %729 = arith.mulf %725, %728 : vector<17x64xf32>
    %730 = math.absf %729 : vector<17x64xf32>
    %cst_250 = arith.constant 0.327591091 : f32
    %731 = vector.broadcast %cst_250 : f32 to vector<17x64xf32>
    %732 = arith.mulf %731, %730 : vector<17x64xf32>
    %cst_251 = arith.constant 1.000000e+00 : f32
    %733 = vector.broadcast %cst_251 : f32 to vector<17x64xf32>
    %734 = arith.addf %733, %732 : vector<17x64xf32>
    %cst_252 = arith.constant 1.000000e+00 : f32
    %735 = vector.broadcast %cst_252 : f32 to vector<17x64xf32>
    %736 = arith.divf %735, %734 : vector<17x64xf32>
    %cst_253 = arith.constant 1.06140542 : f32
    %737 = vector.broadcast %cst_253 : f32 to vector<17x64xf32>
    %738 = arith.mulf %737, %736 : vector<17x64xf32>
    %cst_254 = arith.constant -1.45315206 : f32
    %739 = vector.broadcast %cst_254 : f32 to vector<17x64xf32>
    %740 = arith.addf %738, %739 : vector<17x64xf32>
    %741 = arith.mulf %740, %736 : vector<17x64xf32>
    %cst_255 = arith.constant 1.42141378 : f32
    %742 = vector.broadcast %cst_255 : f32 to vector<17x64xf32>
    %743 = arith.addf %741, %742 : vector<17x64xf32>
    %744 = arith.mulf %743, %736 : vector<17x64xf32>
    %cst_256 = arith.constant -0.284496725 : f32
    %745 = vector.broadcast %cst_256 : f32 to vector<17x64xf32>
    %746 = arith.addf %744, %745 : vector<17x64xf32>
    %747 = arith.mulf %746, %736 : vector<17x64xf32>
    %cst_257 = arith.constant 0.254829586 : f32
    %748 = vector.broadcast %cst_257 : f32 to vector<17x64xf32>
    %749 = arith.addf %747, %748 : vector<17x64xf32>
    %750 = arith.mulf %749, %736 : vector<17x64xf32>
    %cst_258 = arith.constant 0.000000e+00 : f32
    %751 = vector.broadcast %cst_258 : f32 to vector<17x64xf32>
    %752 = arith.subf %751, %730 : vector<17x64xf32>
    %753 = arith.mulf %752, %730 : vector<17x64xf32>
    %754 = math.exp %753 : vector<17x64xf32>
    %755 = arith.mulf %750, %754 : vector<17x64xf32>
    %cst_259 = arith.constant 1.000000e+00 : f32
    %756 = vector.broadcast %cst_259 : f32 to vector<17x64xf32>
    %757 = arith.subf %756, %755 : vector<17x64xf32>
    %cst_260 = arith.constant 0.000000e+00 : f32
    %758 = vector.broadcast %cst_260 : f32 to vector<17x64xf32>
    %759 = arith.cmpf oge, %729, %758 : vector<17x64xf32>
    %cst_261 = arith.constant 0.000000e+00 : f32
    %760 = vector.broadcast %cst_261 : f32 to vector<17x64xf32>
    %761 = arith.subf %760, %757 : vector<17x64xf32>
    %762 = arith.select %759, %757, %761 : vector<17x64xi1>, vector<17x64xf32>
    %cst_262 = arith.constant 1.000000e+00 : f32
    %763 = vector.broadcast %cst_262 : f32 to vector<17x64xf32>
    %764 = arith.addf %763, %762 : vector<17x64xf32>
    %765 = arith.mulf %727, %764 : vector<17x64xf32>
    %c464_263 = arith.constant 464 : index
    %c0_264 = arith.constant 0 : index
    %766 = vector.load %arg2[%c464_263, %c0_264] : memref<552x128xf32, #tpu.memory_space<vmem>>, vector<64x32xf32>
    %767 = arith.truncf %765 : vector<17x64xf32> to vector<17x64xbf16>
    %768 = arith.truncf %766 : vector<64x32xf32> to vector<64x32xbf16>
    %cst_265 = arith.constant dense<0.000000e+00> : vector<17x32xf32>
    %769 = tpu.matmul %767, %768, %cst_265 {dimension_numbers = #tpu.dot_dimension_numbers<[1], [0], [0], [1], [0, 0, 1, 1], [], []>} : vector<17x64xbf16>, vector<64x32xbf16>, vector<17x32xf32> -> vector<17x32xf32>
    %770 = arith.addf %694, %769 : vector<17x32xf32>
    %c528_266 = arith.constant 528 : index
    %c0_267 = arith.constant 0 : index
    %771 = vector.load %arg2[%c528_266, %c0_267] : memref<552x128xf32, #tpu.memory_space<vmem>>, vector<1x32xf32>
    %772 = vector.broadcast %771 : vector<1x32xf32> to vector<17x32xf32>
    %773 = arith.addf %770, %772 : vector<17x32xf32>
    %cst_268 = arith.constant dense<0.000000e+00> : vector<17xf32>
    %774 = vector.multi_reduction <add>, %773, %cst_268 [1] : vector<17x32xf32> to vector<17xf32>
    %775 = vector.shape_cast %774 : vector<17xf32> to vector<17x1xf32>
    %cst_269 = arith.constant 3.200000e+01 : f32
    %776 = vector.broadcast %cst_269 : f32 to vector<17x1xf32>
    %777 = arith.divf %775, %776 : vector<17x1xf32>
    %778 = vector.broadcast %777 : vector<17x1xf32> to vector<17x32xf32>
    %779 = arith.subf %773, %778 : vector<17x32xf32>
    %780 = arith.mulf %779, %779 : vector<17x32xf32>
    %cst_270 = arith.constant dense<0.000000e+00> : vector<17xf32>
    %781 = vector.multi_reduction <add>, %780, %cst_270 [1] : vector<17x32xf32> to vector<17xf32>
    %782 = vector.shape_cast %781 : vector<17xf32> to vector<17x1xf32>
    %cst_271 = arith.constant 3.200000e+01 : f32
    %783 = vector.broadcast %cst_271 : f32 to vector<17x1xf32>
    %784 = arith.divf %782, %783 : vector<17x1xf32>
    %785 = vector.broadcast %777 : vector<17x1xf32> to vector<17x32xf32>
    %786 = arith.subf %773, %785 : vector<17x32xf32>
    %cst_272 = arith.constant 9.99999974E-6 : f32
    %787 = vector.broadcast %cst_272 : f32 to vector<17x1xf32>
    %788 = arith.addf %784, %787 : vector<17x1xf32>
    %789 = math.rsqrt %788 : vector<17x1xf32>
    %790 = vector.broadcast %789 : vector<17x1xf32> to vector<17x32xf32>
    %791 = arith.mulf %786, %790 : vector<17x32xf32>
    %792 = vector.broadcast %8 : vector<1x32xf32> to vector<17x32xf32>
    %793 = arith.mulf %791, %792 : vector<17x32xf32>
    %794 = vector.broadcast %9 : vector<1x32xf32> to vector<17x32xf32>
    %795 = arith.addf %793, %794 : vector<17x32xf32>
    %796 = tpu.concatenate %795, %13 in 1 : vector<17x32xf32>, vector<17x96xf32> -> vector<17x128xf32>
    %c1_273 = arith.constant 1 : index
    %c0_274 = arith.constant 0 : index
    %c0_275 = arith.constant 0 : index
    %797 = vector.load %arg3[%c1_273, %c0_274, %c0_275] : memref<2x17x128xf32, #tpu.memory_space<vmem>>, vector<1x17x128xf32>
    %798 = vector.shape_cast %797 : vector<1x17x128xf32> to vector<17x128xf32>
    %799 = vector.shape_cast %796 : vector<17x128xf32> to vector<1x17x128xf32>
    tpu.vector_store %arg3[%c1_273, %c0_274, %c0_275], %799 {strides = array<i32>} : memref<2x17x128xf32, #tpu.memory_space<vmem>>, vector<1x17x128xf32>,
    return
  }
  func.func @transform_0(%arg0: i32) -> (i32, i32, i32) {
    %c0_i32 = arith.constant 0 : i32
    %c0_i32_0 = arith.constant 0 : i32
    %c0_i32_1 = arith.constant 0 : i32
    return %arg0, %c0_i32, %c0_i32_0 : i32, i32, i32
  }
  func.func @transform_1(%arg0: i32) -> (i32, i32) {
    %c0_i32 = arith.constant 0 : i32
    %c0_i32_0 = arith.constant 0 : i32
    %c0_i32_1 = arith.constant 0 : i32
    return %c0_i32, %c0_i32_0 : i32, i32
  }
  func.func @transform_2(%arg0: i32) -> (i32, i32, i32) {
    %c0_i32 = arith.constant 0 : i32
    %c0_i32_0 = arith.constant 0 : i32
    %c0_i32_1 = arith.constant 0 : i32
    return %arg0, %c0_i32, %c0_i32_0 : i32, i32, i32
  }
}

</mosaic_0001>

<bundles_post_ra>
// kernel: _vit_forward_jit.1
= control target key start
LH: loop header
LB: loop body
LE: loop exit
PB: predicated region body
PF: predicated region fallthrough
CT: control target
= control target key end

     0   :  { %vm39_vm0 = vcmask 523264   ;;  %vm46_vm1 = vcmask 516096   ;;  %v3899_v6 = vmov 64.0   ;;  %vm153_vm12 = vcmask 261120   ;;  %s3901_s5 = smov 112   ;;  %s3902_s6 = smov 104   ;;  %s5372_s0 = inlined_call_operand.vmem [shape: f32[2,17,64], index: 0, kind: input, shape index: {}]   ;;  %s5373_s1 = inlined_call_operand.vmem [shape: f32[552,128], index: 1, kind: input, shape index: {}]   ;;  %s5374_s2 = inlined_call_operand.vmem [shape: f32[2,17,128], index: 2, kind: output, shape index: {}]  }
   0x1   :  { %v36_v0 = vld [vmem:[%s5372_s0] sm:$0xff]  ;;  %v38_v1 = vld [vmem:[%s5372_s0 + $0x10] sm:$0x1]  ;;  %v37_v4 = vld [vmem:[%s5372_s0 + $0x8] sm:$0xff]  ;;  %3658 = vrcp.f32 %v3899_v6  ;;  %vm160_vm13 = vcmask 253952   ;;  %s3903_s7 = smov 120  }
   0x2   :  { %v40_v2 = vsel %vm39_vm0, %v36_v0, 0.0  ;;  %v47_v3 = vsel %vm46_vm1, %v38_v1, 0.0  ;;  %v43_v5 = vsel %vm39_vm0, %v37_v4, 0.0  ;;  %v20_v28 = vld [vmem:[%s5373_s1 + $0x40] sm:$0xff]  ;;  %v21_v29 = vld [vmem:[%s5373_s1 + $0x48] sm:$0xff]  ;;  %v18_v31 = vld [vmem:[%s5373_s1 + $0x30] sm:$0xff] }
   0x3   :  { %41 = vadd.xlane.f32.xlu0 %v40_v2  ;;  %48 = vadd.xlane.f32.xlu1 %v47_v3  ;;  %v3953_v30 = vpack.c.bf16 %v21_v29, %v20_v28  ;;  %v19_v32 = vld [vmem:[%s5373_s1 + $0x38] sm:$0xff]  ;;  %v16_v34 = vld [vmem:[%s5373_s1 + $0x20] sm:$0xff]  ;;  %v17_v35 = vld [vmem:[%s5373_s1 + $0x28] sm:$0xff]  ;;  %s3904_s8 = smov 96   ;;  %s3905_s9 = smov 88  }
   0x4   :  { %v3962_v33 = vpack.c.bf16 %v19_v32, %v18_v31  ;;  %v3971_v36 = vpack.c.bf16 %v17_v35, %v16_v34  ;;  %v14_v39 = vld [vmem:[%s5373_s1 + $0x10] sm:$0xff]  ;;  %v15_v40 = vld [vmem:[%s5373_s1 + $0x18] sm:$0xff]  ;;  %v3622_v63 = vld [vmem:[%s5373_s1] ss:$0 sm:$0xff]  ;;  %v3900_v32 = vmov 32.0   ;;  %s3907_s10 = smov 8  }
   0x5   :  { %139 = vmatpush.bf16.msra.mxu0 %v3953_v30  ;;  %v3981_v41 = vpack.c.bf16 %v15_v40, %v14_v39  ;;  %v3623_v6 = vld [vmem:[%s5373_s1 + $0x8] ss:$0 sm:$0xff] }
   0x7   :  { %v3659_v7 = vpop.eup %3658 }
   0x8   :  { %v51_v8 = vmul.f32 64.0, %v3659_v7  ;;  %vm55_vm2 = vweird.f32 %v3659_v7 }
   0x9   :  { %140 = vmatpush.bf16.msra.mxu0 %v3962_v33 }
   0xa   :  { %v52_v9 = vsub.f32 1.0, %v51_v8 }
   0xb   :  { %44 = vadd.xlane.f32.xlu0 %v43_v5 }
   0xc   :  { %v53_v10 = vmul.f32 %v3659_v7, %v52_v9 }
   0xd   :  { %141 = vmatpush.bf16.msra.mxu0 %v3971_v36 }
   0xe   :  { %v54_v11 = vadd.f32 %v3659_v7, %v53_v10 }
  0x10   :  { %v3935_v12 = vsel %vm55_vm2, %v3659_v7, %v54_v11 }
  0x11   :  { %142 = vmatpush.bf16.msra.mxu0 %v3981_v41 }
  0x76   :  { %v42_v13 = vpop.xlane.xlu0 %41  ;;  %v49_v14 = vpop.xlane.xlu1 %48 }
  0x77   :  { %v57_v15 = vmul.f32 %v3935_v12, %v42_v13  ;;  %v59_v17 = vmul.f32 %v3935_v12, %v49_v14 }
  0x79   :  { %v60_v16 = vsub.f32 %v36_v0, %v57_v15  ;;  %v3940_v20 = vsub.f32 %v38_v1, %v59_v17 }
  0x7b   :  { %v63_v18 = vmul.f32 %v60_v16, %v60_v16  ;;  %v65_v24 = vmul.f32 %v3940_v20, %v3940_v20 }
  0x7d   :  { %v66_v19 = vsel %vm39_vm0, %v63_v18, 0.0  ;;  %v72_v27 = vsel %vm46_vm1, %v65_v24, 0.0 }
  0x7e   :  { %67 = vadd.xlane.f32.xlu1 %v66_v19  ;;  %v45_v21 = vpop.xlane.xlu0 %44 }
  0x7f   :  { %v58_v22 = vmul.f32 %v3935_v12, %v45_v21  ;;  %v3624_v21 = vld [vmem:[%s5373_s1 + $0x50] ss:$0 sm:$0xff] }
  0x81   :  { %v61_v23 = vsub.f32 %v37_v4, %v58_v22 }
  0x83   :  { %v64_v25 = vmul.f32 %v61_v23, %v61_v23 }
  0x85   :  { %v69_v26 = vsel %vm39_vm0, %v64_v25, 0.0 }
  0x86   :  { %70 = vadd.xlane.f32.xlu2 %v69_v26 }
  0x8e   :  { %73 = vadd.xlane.f32.xlu2 %v72_v27 }
  0xf1   :  { %v68_v37 = vpop.xlane.xlu1 %67 }
  0xf2   :  { %v75_v38 = vmul.f32 %v68_v37, %v3935_v12 }
  0xf4   :  { %v78_v42 = vadd.f32 1e-05, %v75_v38 }
  0xf6   :  { %3660 = vrsqrt.f32 %v78_v42  ;;  %vm87_vm4 = vweird.f32 %v78_v42 }
  0xf9   :  { %v71_v43 = vpop.xlane.xlu2 %70 }
  0xfa   :  { %v76_v44 = vmul.f32 %v71_v43, %v3935_v12 }
  0xfc   :  { %v3661_v45 = vpop.eup %3660  ;;  %v79_v46 = vadd.f32 1e-05, %v76_v44 }
  0xfd   :  { %v82_v47 = vmul.f32 %v3661_v45, %v78_v42  ;;  %vm88_vm3 = vweird.f32 %v3661_v45 }
  0xfe   :  { %3662 = vrsqrt.f32 %v79_v46  ;;  %vm89_vm5 = vmor %vm87_vm4, %vm88_vm3  ;;  %vm97_vm7 = vweird.f32 %v79_v46 }
  0xff   :  { %v83_v48 = vmul.f32 %v3661_v45, %v82_v47 }
 0x101   :  { %v84_v49 = vmul.f32 0.5, %v83_v48  ;;  %v74_v50 = vpop.xlane.xlu2 %73 }
 0x102   :  { %v77_v51 = vmul.f32 %v74_v50, %v3935_v12 }
 0x103   :  { %v85_v52 = vsub.f32 1.5, %v84_v49 }
 0x104   :  { %v3663_v53 = vpop.eup %3662  ;;  %v80_v54 = vadd.f32 1e-05, %v77_v51 }
 0x105   :  { %v86_v55 = vmul.f32 %v3661_v45, %v85_v52  ;;  %v92_v56 = vmul.f32 %v3663_v53, %v79_v46  ;;  %vm98_vm6 = vweird.f32 %v3663_v53 }
 0x106   :  { %3664 = vrsqrt.f32 %v80_v54  ;;  %vm99_vm8 = vmor %vm97_vm7, %vm98_vm6  ;;  %vm107_vm9 = vweird.f32 %v80_v54 }
 0x107   :  { %v93_v57 = vmul.f32 %v3663_v53, %v92_v56  ;;  %v90_v58 = vsel %vm89_vm5, %v3661_v45, %v86_v55  ;;  %3666 = vrcp.f32 %v3900_v32 }
 0x108   :  { %v111_v62 = vmul.f32 %v90_v58, %v60_v16 }
 0x109   :  { %v94_v59 = vmul.f32 0.5, %v93_v57 }
 0x10a   :  { %v115_v5 = vmul.f32 %v3622_v63, %v111_v62 }
 0x10b   :  { %v95_v60 = vsub.f32 1.5, %v94_v59 }
 0x10c   :  { %v3665_v61 = vpop.eup %3664  ;;  %v119_v10 = vadd.f32 %v3623_v6, %v115_v5 }
 0x10d   :  { %v96_v0 = vmul.f32 %v3663_v53, %v95_v60  ;;  %v102_v1 = vmul.f32 %v3665_v61, %v80_v54  ;;  %vm108_vm10 = vweird.f32 %v3665_v61  ;;  %v3667_v34 = vpop.eup %3666 }
 0x10e   :  { %vm109_vm11 = vmor %vm107_vm9, %vm108_vm10  ;;  %v165_v35 = vmul.f32 32.0, %v3667_v34  ;;  %vm169_vm14 = vweird.f32 %v3667_v34 }
 0x10f   :  { %v100_v2 = vsel %vm99_vm8, %v3663_v53, %v96_v0  ;;  %v103_v3 = vmul.f32 %v3665_v61, %v102_v1 }
 0x110   :  { %v112_v4 = vmul.f32 %v100_v2, %v61_v23  ;;  %v166_v37 = vsub.f32 1.0, %v165_v35 }
 0x111   :  { %v104_v7 = vmul.f32 0.5, %v103_v3 }
 0x112   :  { %v116_v8 = vmul.f32 %v3622_v63, %v112_v4  ;;  %v167_v38 = vmul.f32 %v3667_v34, %v166_v37 }
 0x113   :  { %v105_v9 = vsub.f32 1.5, %v104_v7 }
 0x114   :  { %v120_v11 = vadd.f32 %v3623_v6, %v116_v8  ;;  %v168_v39 = vadd.f32 %v3667_v34, %v167_v38 }
 0x115   :  { %v106_v13 = vmul.f32 %v3665_v61, %v105_v9 }
 0x116   :  { %v122_v14 = vpack.c.bf16 %v120_v11, %v119_v10  ;;  %v4001_v40 = vsel %vm169_vm14, %v3667_v34, %v168_v39  ;;  %v3626_v11 = vld [vmem:[%s5373_s1 + $0x58] ss:$0 sm:$0xff] }
 0x117   :  { %v110_v15 = vsel %vm109_vm11, %v3665_v61, %v106_v13  ;;  %v27_v39 = vld [vmem:[%s5373_s1 + $0x78] sm:$0xff] }
 0x118   :  { %3515 = vmatmul.msk.bf16.vlgmr.msra.gmra.mxu0 %vm39_vm0, %v122_v14  ;;  %v113_v16 = vmul.f32 %v110_v15, %v3940_v20 }
 0x11a   :  { %v117_v17 = vmul.f32 %v3622_v63, %v113_v16 }
 0x11c   :  { %v121_v18 = vadd.f32 %v3623_v6, %v117_v17  ;;  %v31_v6 = vlaneseq  ;;  %v3627_v17 = vld [vmem:[%s5373_s1 + $0x60] ss:$0 sm:$0xff] }
 0x11e   :  { %v123_v19 = vpack.c.bf16 %v121_v18, %v121_v18  ;;  %v4019_v15 = vshrl.u32 %v31_v6, 7 }
 0x120   :  { %vm236_vm5 = vcmp.eq.s32.totalorder %v4019_v15, 0 }
 0x128   :  { %3516 = vmatmul.msk.bf16.gmra.mxu0 %vm39_vm0, %v123_v19  ;;  %v3625_v19 = vld [vmem:[%s5373_s1 + $0x68] ss:$0 sm:$0xff] }
 0x195   :  { %v144_v22 = vpop.f32.mrf.mxu0 }
 0x196   :  { %v145_v23 = vadd.f32 %v3624_v21, %v144_v22 }
 0x198   :  { %v154_v24 = vsel %vm153_vm12, %v145_v23, 0.0 }
 0x199   :  { %155 = vadd.xlane.f32.xlu0 %v154_v24  ;;  %v26_v24 = vld [vmem:[%s5373_s1 + $0x70] sm:$0xff] }
 0x19d   :  { %v146_v25 = vpop.f32.mrf.mxu0 }
 0x19e   :  { %v147_v26 = vadd.f32 %v3624_v21, %v146_v25 }
 0x1a0   :  { %v157_v27 = vsel %vm153_vm12, %v147_v26, 0.0 }
 0x1a1   :  { %158 = vadd.xlane.f32.xlu1 %v157_v27 }
 0x1a5   :  { %v149_v20 = vpop.f32.mrf.mxu0 }
 0x1a6   :  { %v150_v28 = vadd.f32 %v3624_v21, %v149_v20 }
 0x1a8   :  { %v161_v29 = vsel %vm160_vm13, %v150_v28, 0.0 }
 0x1a9   :  { %162 = vadd.xlane.f32.xlu2 %v161_v29 }
 0x1ad   :  { %v151_v31 = vpop.f32.mrf.mxu0 }
 0x20c   :  { %v156_v42 = vpop.xlane.xlu0 %155 }
 0x20d   :  { %v171_v43 = vmul.f32 %v4001_v40, %v156_v42 }
 0x20f   :  { %v174_v44 = vsub.f32 %v145_v23, %v171_v43 }
 0x211   :  { %v177_v45 = vmul.f32 %v174_v44, %v174_v44 }
 0x213   :  { %v180_v46 = vsel %vm153_vm12, %v177_v45, 0.0 }
 0x214   :  { %v159_v47 = vpop.xlane.xlu1 %158  ;;  %181 = vadd.xlane.f32.xlu0 %v180_v46 }
 0x215   :  { %v172_v48 = vmul.f32 %v4001_v40, %v159_v47 }
 0x217   :  { %v175_v49 = vsub.f32 %v147_v26, %v172_v48 }
 0x219   :  { %v178_v50 = vmul.f32 %v175_v49, %v175_v49 }
 0x21b   :  { %v183_v51 = vsel %vm153_vm12, %v178_v50, 0.0 }
 0x21c   :  { %184 = vadd.xlane.f32.xlu1 %v183_v51  ;;  %v163_v52 = vpop.xlane.xlu2 %162 }
 0x21d   :  { %v173_v53 = vmul.f32 %v4001_v40, %v163_v52 }
 0x21f   :  { %v4008_v54 = vsub.f32 %v150_v28, %v173_v53 }
 0x221   :  { %v179_v55 = vmul.f32 %v4008_v54, %v4008_v54 }
 0x223   :  { %v186_v56 = vsel %vm160_vm13, %v179_v55, 0.0 }
 0x224   :  { %187 = vadd.xlane.f32.xlu2 %v186_v56 }
 0x287   :  { %v182_v57 = vpop.xlane.xlu0 %181 }
 0x288   :  { %v189_v58 = vmul.f32 %v182_v57, %v4001_v40 }
 0x28a   :  { %v192_v59 = vadd.f32 1e-05, %v189_v58 }
 0x28c   :  { %3668 = vrsqrt.f32 %v192_v59  ;;  %vm201_vm2 = vweird.f32 %v192_v59 }
 0x28f   :  { %v185_v60 = vpop.xlane.xlu1 %184 }
 0x290   :  { %v190_v61 = vmul.f32 %v185_v60, %v4001_v40 }
 0x292   :  { %v3669_v62 = vpop.eup %3668  ;;  %v193_v63 = vadd.f32 1e-05, %v190_v61 }
 0x293   :  { %v196_v0 = vmul.f32 %v3669_v62, %v192_v59  ;;  %vm202_vm15 = vweird.f32 %v3669_v62 }
 0x294   :  { %3670 = vrsqrt.f32 %v193_v63  ;;  %vm203_vm3 = vmor %vm201_vm2, %vm202_vm15  ;;  %vm211_vm6 = vweird.f32 %v193_v63 }
 0x295   :  { %v197_v1 = vmul.f32 %v3669_v62, %v196_v0 }
 0x297   :  { %v198_v2 = vmul.f32 0.5, %v197_v1  ;;  %v188_v3 = vpop.xlane.xlu2 %187 }
 0x298   :  { %v191_v4 = vmul.f32 %v188_v3, %v4001_v40 }
 0x299   :  { %v199_v5 = vsub.f32 1.5, %v198_v2 }
 0x29a   :  { %v3671_v7 = vpop.eup %3670  ;;  %v194_v8 = vadd.f32 1e-05, %v191_v4  ;;  %v323_v4 = vld [vmem:[%s5373_s1 + $0xa8] sm:$0xff] }
 0x29b   :  { %v200_v9 = vmul.f32 %v3669_v62, %v199_v5  ;;  %v206_v10 = vmul.f32 %v3671_v7, %v193_v63  ;;  %vm212_vm4 = vweird.f32 %v3671_v7  ;;  %v324_v5 = vld [vmem:[%s5373_s1 + $0xb0] sm:$0xff] }
 0x29c   :  { %3672 = vrsqrt.f32 %v194_v8  ;;  %vm213_vm7 = vmor %vm211_vm6, %vm212_vm4  ;;  %vm221_vm9 = vweird.f32 %v194_v8  ;;  %v328_v6 = vpack.c.bf16 %v324_v5, %v323_v4 }
 0x29d   :  { %v204_v13 = vsel %vm203_vm3, %v3669_v62, %v200_v9  ;;  %v207_v14 = vmul.f32 %v3671_v7, %v206_v10  ;;  %v322_v9 = vld [vmem:[%s5373_s1 + $0xa0] sm:$0xff] }
 0x29e   :  { %v225_v16 = vmul.f32 %v204_v13, %v174_v44  ;;  %341 = vmatpush.bf16.msrb.mxu0 %v328_v6  ;;  %3589 = vmatpush.bf16.msra.mxu1 %v328_v6 }
 0x29f   :  { %v208_v18 = vmul.f32 0.5, %v207_v14 }
 0x2a0   :  { %v229_v21 = vmul.f32 %v3626_v11, %v225_v16 }
 0x2a1   :  { %v209_v22 = vsub.f32 1.5, %v208_v18 }
 0x2a2   :  { %v3673_v23 = vpop.eup %3672  ;;  %v233_v25 = vadd.f32 %v3627_v17, %v229_v21 }
 0x2a3   :  { %v210_v26 = vmul.f32 %v3671_v7, %v209_v22  ;;  %v216_v27 = vmul.f32 %v3673_v23, %v194_v8  ;;  %vm222_vm8 = vweird.f32 %v3673_v23  ;;  %v321_v8 = vld [vmem:[%s5373_s1 + $0x98] sm:$0xff] }
 0x2a4   :  { %v239_v20 = vsel %vm236_vm5, %v3625_v19, %v233_v25  ;;  %vm223_vm10 = vmor %vm221_vm9, %vm222_vm8  ;;  %vm361_vm9 = vcmask 64512  }
 0x2a5   :  { %v214_v28 = vsel %vm213_vm7, %v3671_v7, %v210_v26  ;;  %v217_v29 = vmul.f32 %v3673_v23, %v216_v27  ;;  %v4033_v31 = vadd.f32 %v239_v20, %v26_v24 }
 0x2a6   :  { %v226_v32 = vmul.f32 %v214_v28, %v175_v49  ;;  %v28_v49 = vld [vmem:[%s5373_s1 + $0x80] sm:$0x1] }
 0x2a7   :  { %v218_v34 = vmul.f32 0.5, %v217_v29  ;;  %v247_v35 = vsel %vm153_vm12, %v4033_v31, 0.0 }
 0x2a8   :  { %248 = vadd.xlane.f32.xlu0 %v247_v35  ;;  %v230_v37 = vmul.f32 %v3626_v11, %v226_v32 }
 0x2a9   :  { %v219_v38 = vsub.f32 1.5, %v218_v34 }
 0x2aa   :  { %v234_v42 = vadd.f32 %v3627_v17, %v230_v37 }
 0x2ab   :  { %v220_v43 = vmul.f32 %v3673_v23, %v219_v38 }
 0x2ac   :  { %v4040_v44 = vadd.f32 %v234_v42, %v27_v39  ;;  %v3628_v39 = vld [vmem:[%s5373_s1 + $0x88] ss:$0 sm:$0xff] }
 0x2ad   :  { %v224_v45 = vsel %vm223_vm10, %v3673_v23, %v220_v43  ;;  %vm395_vm10 = vcmask 138240  }
 0x2ae   :  { %v250_v46 = vsel %vm153_vm12, %v4040_v44, 0.0  ;;  %v227_v47 = vmul.f32 %v224_v45, %v4008_v54 }
 0x2af   :  { %251 = vadd.xlane.f32.xlu1 %v250_v46 }
 0x2b0   :  { %v231_v48 = vmul.f32 %v3626_v11, %v227_v47  ;;  %v327_v11 = vpack.c.bf16 %v322_v9, %v321_v8 }
 0x2b2   :  { %v235_v50 = vadd.f32 %v3627_v17, %v231_v48  ;;  %342 = vmatpush.bf16.msrb.mxu0 %v327_v11  ;;  %3590 = vmatpush.bf16.msra.mxu1 %v327_v11 }
 0x2b4   :  { %v4048_v51 = vadd.f32 %v235_v50, %v28_v49  ;;  %v3629_v49 = vld [vmem:[%s5373_s1 + $0x90] ss:$0 sm:$0xff] }
 0x2b6   :  { %v253_v52 = vsel %vm160_vm13, %v4048_v51, 0.0 }
 0x2b7   :  { %254 = vadd.xlane.f32.xlu2 %v253_v52 }
 0x31b   :  { %v249_v53 = vpop.xlane.xlu0 %248 }
 0x31c   :  { %v256_v55 = vmul.f32 %v249_v53, %v4001_v40 }
 0x31e   :  { %v259_v56 = vsub.f32 %v4033_v31, %v256_v55 }
 0x320   :  { %v262_v57 = vmul.f32 %v259_v56, %v259_v56 }
 0x322   :  { %v252_v54 = vpop.xlane.xlu1 %251  ;;  %v265_v58 = vsel %vm153_vm12, %v262_v57, 0.0 }
 0x323   :  { %v257_v59 = vmul.f32 %v252_v54, %v4001_v40  ;;  %266 = vadd.xlane.f32.xlu0 %v265_v58 }
 0x325   :  { %v260_v60 = vsub.f32 %v4040_v44, %v257_v59 }
 0x327   :  { %v263_v61 = vmul.f32 %v260_v60, %v260_v60 }
 0x329   :  { %v268_v62 = vsel %vm153_vm12, %v263_v61, 0.0 }
 0x32a   :  { %269 = vadd.xlane.f32.xlu1 %v268_v62  ;;  %v255_v63 = vpop.xlane.xlu2 %254 }
 0x32b   :  { %v258_v0 = vmul.f32 %v255_v63, %v4001_v40 }
 0x32d   :  { %v4060_v1 = vsub.f32 %v4048_v51, %v258_v0 }
 0x32f   :  { %v264_v2 = vmul.f32 %v4060_v1, %v4060_v1 }
 0x331   :  { %v271_v3 = vsel %vm160_vm13, %v264_v2, 0.0 }
 0x332   :  { %272 = vadd.xlane.f32.xlu2 %v271_v3 }
 0x396   :  { %v267_v7 = vpop.xlane.xlu0 %266 }
 0x397   :  { %v274_v10 = vmul.f32 %v267_v7, %v4001_v40 }
 0x399   :  { %v277_v13 = vadd.f32 1e-05, %v274_v10 }
 0x39b   :  { %3674 = vrsqrt.f32 %v277_v13  ;;  %vm286_vm14 = vweird.f32 %v277_v13 }
 0x39d   :  { %v270_v14 = vpop.xlane.xlu1 %269 }
 0x39e   :  { %v275_v16 = vmul.f32 %v270_v14, %v4001_v40 }
 0x3a0   :  { %v278_v17 = vadd.f32 1e-05, %v275_v16 }
 0x3a1   :  { %v3675_v18 = vpop.eup %3674 }
 0x3a2   :  { %v281_v19 = vmul.f32 %v3675_v18, %v277_v13  ;;  %3676 = vrsqrt.f32 %v278_v17  ;;  %vm287_vm11 = vweird.f32 %v3675_v18  ;;  %vm296_vm3 = vweird.f32 %v278_v17 }
 0x3a3   :  { %vm288_vm15 = vmor %vm286_vm14, %vm287_vm11  ;;  %vm402_vm11 = vcmask 131072   ;;  %vm482_vm14 = vcmask 1040384  }
 0x3a4   :  { %v282_v21 = vmul.f32 %v3675_v18, %v281_v19 }
 0x3a5   :  { %v273_v22 = vpop.xlane.xlu2 %272 }
 0x3a6   :  { %v283_v23 = vmul.f32 0.5, %v282_v21  ;;  %v276_v24 = vmul.f32 %v273_v22, %v4001_v40 }
 0x3a8   :  { %v3677_v25 = vpop.eup %3676  ;;  %v284_v26 = vsub.f32 1.5, %v283_v23  ;;  %v279_v27 = vadd.f32 1e-05, %v276_v24 }
 0x3a9   :  { %v291_v20 = vmul.f32 %v3677_v25, %v278_v17  ;;  %vm297_vm2 = vweird.f32 %v3677_v25 }
 0x3aa   :  { %v285_v28 = vmul.f32 %v3675_v18, %v284_v26  ;;  %3678 = vrsqrt.f32 %v279_v27  ;;  %vm298_vm4 = vmor %vm296_vm3, %vm297_vm2  ;;  %vm306_vm7 = vweird.f32 %v279_v27 }
 0x3ab   :  { %v292_v29 = vmul.f32 %v3677_v25, %v291_v20 }
 0x3ac   :  { %v289_v32 = vsel %vm288_vm15, %v3675_v18, %v285_v28 }
 0x3ad   :  { %v293_v34 = vmul.f32 0.5, %v292_v29  ;;  %v310_v38 = vmul.f32 %v289_v32, %v259_v56 }
 0x3af   :  { %v294_v35 = vsub.f32 1.5, %v293_v34  ;;  %v314_v48 = vmul.f32 %v3628_v39, %v310_v38 }
 0x3b0   :  { %v3679_v37 = vpop.eup %3678 }
 0x3b1   :  { %v295_v42 = vmul.f32 %v3677_v25, %v294_v35  ;;  %v301_v43 = vmul.f32 %v3679_v37, %v279_v27  ;;  %vm307_vm6 = vweird.f32 %v3679_v37  ;;  %v318_v55 = vadd.f32 %v3629_v49, %v314_v48 }
 0x3b2   :  { %vm308_vm8 = vmor %vm306_vm7, %vm307_vm6 }
 0x3b3   :  { %v299_v45 = vsel %vm298_vm4, %v3677_v25, %v295_v42  ;;  %v302_v46 = vmul.f32 %v3679_v37, %v301_v43 }
 0x3b4   :  { %v311_v47 = vmul.f32 %v299_v45, %v260_v60 }
 0x3b5   :  { %v303_v50 = vmul.f32 0.5, %v302_v46 }
 0x3b6   :  { %v315_v52 = vmul.f32 %v3628_v39, %v311_v47 }
 0x3b7   :  { %v304_v53 = vsub.f32 1.5, %v303_v50 }
 0x3b8   :  { %v319_v56 = vadd.f32 %v3629_v49, %v315_v52 }
 0x3b9   :  { %v305_v57 = vmul.f32 %v3679_v37, %v304_v53 }
 0x3ba   :  { %v325_v54 = vpack.c.bf16 %v319_v56, %v318_v55 }
 0x3bb   :  { %v309_v58 = vsel %vm308_vm8, %v3679_v37, %v305_v57  ;;  %v3906_v57 = vmov 0  }
 0x3bc   :  { %3517 = vmatmul.msk.bf16.vlgmr.msrb.gmra.mxu0 %vm153_vm12, %v325_v54  ;;  %v312_v59 = vmul.f32 %v309_v58, %v4060_v1  ;;  %v4132_v54 = vsel %vm482_vm14, 65535, %v3906_v57 }
 0x3be   :  { %v316_v60 = vmul.f32 %v3628_v39, %v312_v59 }
 0x3c0   :  { %v320_v61 = vadd.f32 %v3629_v49, %v316_v60 }
 0x3c2   :  { %v326_v62 = vpack.c.bf16 %v320_v61, %v320_v61 }
 0x3c4   :  { %3518 = vmatmul.msk.bf16.vlgmr.msra.gmra.mxu1 %vm153_vm12, %v326_v62 }
 0x439   :  { %v344_v63 = vpop.f32.mrf.mxu0 }
 0x441   :  { %v346_v0 = vpop.f32.mrf.mxu0  ;;  %v349_v2 = vpop.f32.mrf.mxu1 }
 0x442   :  { %v4089_v3 = vpack.c.bf16 %v346_v0, %v344_v63  ;;  %v4091_v4 = vpack.c.bf16 %v349_v2, %v349_v2 }
 0x444   :  { %357 = vrot.lane.b32.xlu1 %v4089_v3, %s3901_s5  ;;  %512 = vrot.lane.b32.xlu2 %v4091_v4, %s3902_s6 }
 0x445   :  { %359 = vrot.lane.b32.xlu0 %v4091_v4, %s3901_s5 }
 0x449   :  { %v351_v1 = vpop.f32.mrf.mxu1 }
 0x44c   :  { %508 = vrot.lane.b32.xlu1 %v4091_v4, %s3903_s7  ;;  %506 = vrot.lane.b32.xlu2 %v4089_v3, %s3903_s7 }
 0x44d   :  { %510 = vrot.lane.b32.xlu0 %v4089_v3, %s3902_s6 }
 0x49e   :  { %v513_v5 = vpop.permute.xlu2 %512 }
 0x49f   :  { %v524_v6 = vsel %vm361_vm9, %v513_v5, 0 }
 0x4a0   :  { %532 = vmatpush.bf16.xpose.msrb.mxu1 %v524_v6 }
 0x4a6   :  { %v507_v14 = vpop.permute.xlu2 %506 }
 0x4b6   :  { %v358_v9 = vpop.permute.xlu1 %357 }
 0x4b7   :  { %v360_v7 = vpop.permute.xlu0 %359  ;;  %v369_v11 = vsel %vm361_vm9, %v358_v9, 0 }
 0x4b8   :  { %v372_v8 = vsel %vm361_vm9, %v360_v7, 0 }
 0x4b9   :  { %380 = vmatpush.bf16.xpose.msra.mxu2 %v372_v8 }
 0x4be   :  { %v509_v16 = vpop.permute.xlu1 %508 }
 0x4bf   :  { %v511_v10 = vpop.permute.xlu0 %510 }
 0x4c0   :  { %v521_v13 = vsel %vm361_vm9, %v511_v10, 0 }
 0x4c1   :  { %381 = vmatpush.bf16.xpose.msra.mxu2 %v369_v11  ;;  %533 = vmatpush.bf16.xpose.msrb.mxu1 %v521_v13 }
 0x4c8   :  { %3519 = vmatmul.msk.bf16.vlgmr.msra.gmra.mxu2 %vm361_vm9, %v4089_v3  ;;  %3523 = vmatmul.msk.bf16.vlgmr.msrb.gmra.mxu1 %vm361_vm9, %v507_v14 }
 0x4d8   :  { %3520 = vmatmul.msk.bf16.gmra.mxu2 %vm361_vm9, %v4091_v4  ;;  %3524 = vmatmul.msk.bf16.gmra.mxu1 %vm361_vm9, %v509_v16 }
 0x545   :  { %v535_v17 = vpop.f32.mrf.mxu1 }
 0x546   :  { %v544_v18 = vmul.f32 0.35355338, %v535_v17 }
 0x548   :  { %v547_v19 = vsel %vm395_vm10, %v544_v18, -inf }
 0x549   :  { %548 = vmax.xlane.f32.xlu2 %v547_v19 }
 0x54b   :  { %v383_v21 = vpop.f32.mrf.mxu2 }
 0x54c   :  { %v392_v22 = vmul.f32 0.35355338, %v383_v21 }
 0x54d   :  { %v537_v23 = vpop.f32.mrf.mxu1 }
 0x54e   :  { %v545_v24 = vmul.f32 0.35355338, %v537_v23  ;;  %v396_v25 = vsel %vm395_vm10, %v392_v22, -inf }
 0x550   :  { %v550_v26 = vsel %vm395_vm10, %v545_v24, -inf }
 0x551   :  { %397 = vmax.xlane.f32.xlu2 %v396_v25  ;;  %551 = vmax.xlane.f32.xlu1 %v550_v26 }
 0x553   :  { %v385_v27 = vpop.f32.mrf.mxu2 }
 0x554   :  { %v4118_v20 = vmul.f32 0.35355338, %v385_v27 }
 0x555   :  { %v540_v28 = vpop.f32.mrf.mxu1 }
 0x556   :  { %v399_v29 = vsel %vm395_vm10, %v4118_v20, -inf  ;;  %v546_v38 = vmul.f32 0.35355338, %v540_v28 }
 0x558   :  { %v553_v42 = vsel %vm402_vm11, %v546_v38, -inf }
 0x559   :  { %400 = vmax.xlane.f32.xlu1 %v399_v29 }
 0x55b   :  { %v388_v32 = vpop.f32.mrf.mxu2 }
 0x55c   :  { %v394_v34 = vmul.f32 0.35355338, %v388_v32 }
 0x55d   :  { %v542_v35 = vpop.f32.mrf.mxu1 }
 0x55e   :  { %v403_v37 = vsel %vm402_vm11, %v394_v34, -inf }
 0x55f   :  { %404 = vmax.xlane.f32.xlu0 %v403_v37 }
 0x563   :  { %v390_v39 = vpop.f32.mrf.mxu2 }
 0x567   :  { %554 = vmax.xlane.f32.xlu0 %v553_v42 }
 0x569   :  { %473 = vrot.lane.b32.xlu2 %v4091_v4, %s3904_s8 }
 0x571   :  { %621 = vrot.lane.b32.xlu2 %v4089_v3, %s3905_s9 }
 0x5bc   :  { %v549_v43 = vpop.xlane.xlu2 %548 }
 0x5bd   :  { %v556_v45 = vsub.f32 %v544_v18, %v549_v43 }
 0x5bf   :  { %v559_v46 = vmul.f32 1.442695, %v556_v45 }
 0x5c1   :  { %3680 = vpow2.f32 %v559_v46 }
 0x5c4   :  { %v398_v47 = vpop.xlane.xlu2 %397  ;;  %v552_v48 = vpop.xlane.xlu1 %551 }
 0x5c5   :  { %v406_v49 = vsub.f32 %v392_v22, %v398_v47  ;;  %v557_v50 = vsub.f32 %v545_v24, %v552_v48 }
 0x5c7   :  { %v4128_v52 = vpop.eup %3680  ;;  %v409_v53 = vmul.f32 1.442695, %v406_v49  ;;  %v561_v55 = vmul.f32 1.442695, %v557_v50 }
 0x5c8   :  { %v565_v56 = vsel %vm395_vm10, %v4128_v52, 0.0 }
 0x5c9   :  { %3682 = vpow2.f32 %v409_v53  ;;  %566 = vadd.xlane.f32.xlu1 %v565_v56 }
 0x5ca   :  { %3684 = vpow2.f32 %v561_v55 }
 0x5cc   :  { %v474_v58 = vpop.permute.xlu2 %473  ;;  %v401_v11 = vpop.xlane.xlu1 %400 }
 0x5cd   :  { %v486_v59 = vand.u32 %v4132_v54, %v474_v58  ;;  %v407_v13 = vsub.f32 %v4118_v20, %v401_v11 }
 0x5cf   :  { %v4135_v60 = vpop.eup %3682  ;;  %494 = vmatpush.bf16.msrb.mxu2 %v486_v59  ;;  %3591 = vmatpush.bf16.msra.mxu3 %v486_v59  ;;  %v411_v16 = vmul.f32 1.442695, %v407_v13 }
 0x5d0   :  { %v4137_v61 = vpop.eup %3684  ;;  %v415_v62 = vsel %vm395_vm10, %v4135_v60, 0.0 }
 0x5d1   :  { %416 = vadd.xlane.f32.xlu2 %v415_v62  ;;  %v568_v63 = vsel %vm395_vm10, %v4137_v61, 0.0 }
 0x5d2   :  { %569 = vadd.xlane.f32.xlu0 %v568_v63  ;;  %v405_v0 = vpop.xlane.xlu0 %404 }
 0x5d3   :  { %v408_v2 = vsub.f32 %v394_v34, %v405_v0 }
 0x5d4   :  { %v622_v58 = vpop.permute.xlu2 %621 }
 0x5d5   :  { %v413_v1 = vmul.f32 1.442695, %v408_v2 }
 0x5d7   :  { %3686 = vpow2.f32 %v413_v1 }
 0x5da   :  { %v555_v7 = vpop.xlane.xlu0 %554 }
 0x5db   :  { %v558_v8 = vsub.f32 %v546_v38, %v555_v7 }
 0x5dd   :  { %v3687_v5 = vpop.eup %3686  ;;  %v563_v9 = vmul.f32 1.442695, %v558_v8 }
 0x5de   :  { %v421_v6 = vsel %vm402_vm11, %v3687_v5, 0.0 }
 0x5df   :  { %422 = vadd.xlane.f32.xlu0 %v421_v6  ;;  %3688 = vpow2.f32 %v563_v9 }
 0x5e0   :  { %3690 = vpow2.f32 %v411_v16 }
 0x5e2   :  { %471 = vrot.lane.b32.xlu1 %v4089_v3, %s3904_s8 }
 0x5e5   :  { %v4148_v10 = vpop.eup %3688 }
 0x5e6   :  { %v571_v14 = vsel %vm402_vm11, %v4148_v10, 0.0  ;;  %v4153_v17 = vpop.eup %3690 }
 0x5e7   :  { %v418_v3 = vsel %vm395_vm10, %v4153_v17, 0.0 }
 0x5f3   :  { %623 = vrot.lane.b32.xlu0 %v4091_v4, %s3905_s9 }
 0x60c   :  { %572 = vadd.xlane.f32.xlu1 %v571_v14 }
 0x61d   :  { %419 = vadd.xlane.f32.xlu0 %v418_v3 }
 0x63c   :  { %v567_v18 = vpop.xlane.xlu1 %566 }
 0x63d   :  { %v585_v57 = vand.u32 2147483648, %v567_v18  ;;  %v583_v59 = vand.u32 2147483647, %v567_v18 }
 0x63f   :  { %v586_v2 = vor.u32 1.1754944e-38, %v585_v57 }
 0x644   :  { %v417_v11 = vpop.xlane.xlu2 %416 }
 0x645   :  { %v570_v4 = vpop.xlane.xlu0 %569 }
 0x646   :  { %3692 = vrcp.f32 %v570_v4  ;;  %v600_v53 = vand.u32 2147483648, %v570_v4  ;;  %vm594_vm8 = vweird.f32 %v570_v4  ;;  %v598_v56 = vand.u32 2147483647, %v570_v4 }
 0x648   :  { %v601_v63 = vor.u32 1.1754944e-38, %v600_v53 }
 0x64c   :  { %v3693_v22 = vpop.eup %3692 }
 0x64d   :  { %v590_v26 = vmul.f32 %v3693_v22, %v570_v4  ;;  %vm595_vm6 = vweird.f32 %v3693_v22 }
 0x64e   :  { %vm596_vm14 = vmor %vm594_vm8, %vm595_vm6 }
 0x64f   :  { %v591_v34 = vsub.f32 1.0, %v590_v26 }
 0x651   :  { %v592_v43 = vmul.f32 %v3693_v22, %v591_v34  ;;  %v435_v34 = vand.u32 2147483648, %v417_v11 }
 0x652   :  { %v423_v19 = vpop.xlane.xlu0 %422 }
 0x653   :  { %3694 = vrcp.f32 %v423_v19  ;;  %v465_v20 = vand.u32 2147483648, %v423_v19  ;;  %v463_v32 = vand.u32 2147483647, %v423_v19  ;;  %vm459_vm2 = vweird.f32 %v423_v19 }
 0x654   :  { %v472_v21 = vpop.permute.xlu1 %471  ;;  %3696 = vrcp.f32 %v567_v18  ;;  %v593_v50 = vadd.f32 %v3693_v22, %v592_v43 }
 0x655   :  { %495 = vmatpush.bf16.msrb.mxu2 %v472_v21  ;;  %3592 = vmatpush.bf16.msra.mxu3 %v472_v21  ;;  %v466_v37 = vor.u32 1.1754944e-38, %v465_v20  ;;  %vm464_vm4 = vcmp.eq.f32.partialorder %v463_v32, 8.507059e+37 }
 0x656   :  { %v597_v62 = vsel %vm596_vm14, %v3693_v22, %v593_v50 }
 0x659   :  { %v3695_v23 = vpop.eup %3694 }
 0x65a   :  { %v455_v24 = vmul.f32 %v3695_v23, %v423_v19  ;;  %v3697_v25 = vpop.eup %3696  ;;  %vm460_vm15 = vweird.f32 %v3695_v23 }
 0x65b   :  { %v575_v28 = vmul.f32 %v3697_v25, %v567_v18  ;;  %vm461_vm3 = vmor %vm459_vm2, %vm460_vm15  ;;  %vm580_vm7 = vweird.f32 %v3697_v25  ;;  %vm579_vm15 = vweird.f32 %v567_v18 }
 0x65c   :  { %v456_v27 = vsub.f32 1.0, %v455_v24  ;;  %vm581_vm2 = vmor %vm579_vm15, %vm580_vm7 }
 0x65d   :  { %v576_v38 = vsub.f32 1.0, %v575_v28 }
 0x65e   :  { %v457_v29 = vmul.f32 %v3695_v23, %v456_v27 }
 0x65f   :  { %v577_v47 = vmul.f32 %v3697_v25, %v576_v38 }
 0x660   :  { %v458_v35 = vadd.f32 %v3695_v23, %v457_v29 }
 0x661   :  { %v578_v55 = vadd.f32 %v3697_v25, %v577_v47 }
 0x662   :  { %v462_v39 = vsel %vm461_vm3, %v3695_v23, %v458_v35  ;;  %vm599_vm3 = vcmp.eq.f32.partialorder %v598_v56, 8.507059e+37  ;;  %v433_v35 = vand.u32 2147483647, %v417_v11 }
 0x663   :  { %v467_v42 = vsel %vm464_vm4, %v466_v37, %v462_v39  ;;  %v582_v0 = vsel %vm581_vm2, %v3697_v25, %v578_v55  ;;  %v602_v1 = vsel %vm599_vm3, %v601_v63, %v597_v62  ;;  %vm584_vm4 = vcmp.eq.f32.partialorder %v583_v59, 8.507059e+37 }
 0x664   :  { %v468_v45 = vmul.f32 %v3687_v5, %v467_v42  ;;  %v587_v5 = vsel %vm584_vm4, %v586_v2, %v582_v0  ;;  %v603_v6 = vmul.f32 %v4137_v61, %v602_v1  ;;  %vm429_vm2 = vweird.f32 %v417_v11 }
 0x665   :  { %v624_v46 = vpop.permute.xlu0 %623  ;;  %v588_v7 = vmul.f32 %v4128_v52, %v587_v5 }
 0x666   :  { %v633_v48 = vand.u32 %v624_v46, %v4132_v54  ;;  %v470_v49 = vpack.c.bf16 %v468_v45, %v468_v45  ;;  %v436_v45 = vor.u32 1.1754944e-38, %v435_v34 }
 0x667   :  { %v619_v8 = vpack.c.bf16 %v603_v6, %v588_v7 }
 0x668   :  { %3522 = vmatmul.msk.bf16.vlgmr.msra.gmra.mxu3 %vm395_vm10, %v470_v49 }
 0x669   :  { %641 = vmatpush.bf16.msrb.mxu3 %v633_v48 }
 0x66d   :  { %642 = vmatpush.bf16.msrb.mxu3 %v622_v58 }
 0x678   :  { %3525 = vmatmul.msk.bf16.vlgmr.msrb.gmra.mxu3 %vm395_vm10, %v619_v8 }
 0x67f   :  { %v573_v9 = vpop.xlane.xlu1 %572 }
 0x680   :  { %3698 = vrcp.f32 %v573_v9  ;;  %v615_v4 = vand.u32 2147483648, %v573_v9  ;;  %v613_v19 = vand.u32 2147483647, %v573_v9  ;;  %vm609_vm7 = vweird.f32 %v573_v9 }
 0x681   :  { %3700 = vrcp.f32 %v417_v11 }
 0x682   :  { %v616_v52 = vor.u32 1.1754944e-38, %v615_v4  ;;  %vm614_vm14 = vcmp.eq.f32.partialorder %v613_v19, 8.507059e+37  ;;  %v3630_v4 = vld [vmem:[%s5373_s1 + $0xc8] ss:$0 sm:$0xff] }
 0x686   :  { %v3699_v13 = vpop.eup %3698 }
 0x687   :  { %v605_v14 = vmul.f32 %v3699_v13, %v573_v9  ;;  %v3701_v16 = vpop.eup %3700  ;;  %vm610_vm6 = vweird.f32 %v3699_v13 }
 0x688   :  { %v425_v21 = vmul.f32 %v3701_v16, %v417_v11  ;;  %vm611_vm8 = vmor %vm609_vm7, %vm610_vm6  ;;  %vm430_vm15 = vweird.f32 %v3701_v16  ;;  %vm434_vm6 = vcmp.eq.f32.partialorder %v433_v35, 8.507059e+37 }
 0x689   :  { %v606_v3 = vsub.f32 1.0, %v605_v14  ;;  %vm431_vm3 = vmor %vm429_vm2, %vm430_vm15  ;;  %vm673_vm15 = vcmask 130048  }
 0x68a   :  { %v426_v23 = vsub.f32 1.0, %v425_v21 }
 0x68b   :  { %v607_v18 = vmul.f32 %v3699_v13, %v606_v3 }
 0x68c   :  { %v427_v27 = vmul.f32 %v3701_v16, %v426_v23 }
 0x68d   :  { %v608_v22 = vadd.f32 %v3699_v13, %v607_v18 }
 0x68e   :  { %v428_v29 = vadd.f32 %v3701_v16, %v427_v27 }
 0x68f   :  { %v612_v61 = vsel %vm611_vm8, %v3699_v13, %v608_v22 }
 0x690   :  { %v420_v24 = vpop.xlane.xlu0 %419  ;;  %v617_v25 = vsel %vm614_vm14, %v616_v52, %v612_v61  ;;  %v432_v39 = vsel %vm431_vm3, %v3701_v16, %v428_v29 }
 0x691   :  { %3702 = vrcp.f32 %v420_v24  ;;  %v618_v26 = vmul.f32 %v4148_v10, %v617_v25  ;;  %v450_v38 = vand.u32 2147483648, %v420_v24  ;;  %v448_v43 = vand.u32 2147483647, %v420_v24 }
 0x692   :  { %vm444_vm7 = vweird.f32 %v420_v24  ;;  %v437_v47 = vsel %vm434_vm6, %v436_v45, %v432_v39 }
 0x693   :  { %v620_v20 = vpack.c.bf16 %v618_v26, %v618_v26  ;;  %v451_v46 = vor.u32 1.1754944e-38, %v450_v38  ;;  %vm449_vm14 = vcmp.eq.f32.partialorder %v448_v43, 8.507059e+37  ;;  %v438_v50 = vmul.f32 %v4135_v60, %v437_v47  ;;  %v668_v60 = vld [vmem:[%s5373_s1 + $0xb8] sm:$0xff]  ;;  %v784_v47 = vld [vmem:[%s5373_s1 + $0xf0] sm:$0xff] }
 0x695   :  { %3526 = vmatmul.msk.bf16.gmra.mxu3 %vm395_vm10, %v620_v20 }
 0x697   :  { %v3703_v28 = vpop.eup %3702 }
 0x698   :  { %v440_v32 = vmul.f32 %v3703_v28, %v420_v24  ;;  %vm445_vm4 = vweird.f32 %v3703_v28 }
 0x699   :  { %vm446_vm8 = vmor %vm444_vm7, %vm445_vm4 }
 0x69a   :  { %v441_v37 = vsub.f32 1.0, %v440_v32 }
 0x69c   :  { %v442_v42 = vmul.f32 %v3703_v28, %v441_v37 }
 0x69e   :  { %v443_v10 = vadd.f32 %v3703_v28, %v442_v42 }
 0x6a0   :  { %v447_v48 = vsel %vm446_vm8, %v3703_v28, %v443_v10 }
 0x6a1   :  { %v452_v49 = vsel %vm449_vm14, %v451_v46, %v447_v48  ;;  %v785_v48 = vld [vmem:[%s5373_s1 + $0xf8] sm:$0xff] }
 0x6a2   :  { %v453_v53 = vmul.f32 %v4153_v17, %v452_v49  ;;  %v669_v17 = vld [vmem:[%s5373_s1 + $0xc0] sm:$0xff] }
 0x6a3   :  { %v672_v2 = vpack.c.bf16 %v669_v17, %v668_v60 }
 0x6a4   :  { %v469_v55 = vpack.c.bf16 %v453_v53, %v438_v50  ;;  %v789_v50 = vpack.c.bf16 %v785_v48, %v784_v47 }
 0x6a5   :  { %687 = vmatpush.bf16.msra.mxu0 %v672_v2 }
 0x6a6   :  { %3521 = vmatmul.msk.bf16.vlgmr.msrb.gmra.mxu2 %vm395_vm10, %v469_v55 }
 0x6a7   :  { %804 = vmatpush.bf16.msra.mxu2 %v789_v50 }
 0x6eb   :  { %v502_v56 = vpop.f32.mrf.mxu3 }
 0x6f3   :  { %v504_v57 = vpop.f32.mrf.mxu3 }
 0x6f4   :  { %v783_v57 = vld [vmem:[%s5373_s1 + $0xe8] sm:$0xff] }
 0x6fb   :  { %v644_v58 = vpop.f32.mrf.mxu3 }
 0x703   :  { %v646_v59 = vpop.f32.mrf.mxu3 }
 0x704   :  { %v3602_v62 = vpack.i.bf16 %v646_v59, %v644_v58 }
 0x706   :  { %3603 = vrot.lane.b32.xlu2 %v3602_v62, %s3907_s10 }
 0x718   :  { %v649_v63 = vpop.f32.mrf.mxu3 }
 0x719   :  { %660 = vrot.lane.b32.xlu0 %v649_v63, %s3907_s10 }
 0x720   :  { %v651_v0 = vpop.f32.mrf.mxu3 }
 0x729   :  { %v497_v1 = vpop.f32.mrf.mxu2 }
 0x731   :  { %v499_v8 = vpop.f32.mrf.mxu2 }
 0x760   :  { %v3604_v5 = vpop.permute.xlu2 %3603 }
 0x761   :  { %v3606_v6 = vunpack.i.h.bf16 %v3604_v5  ;;  %v3605_v7 = vunpack.i.l.bf16 %v3604_v5 }
 0x763   :  { %v665_v9 = vsel %vm361_vm9, %v497_v1, %v3605_v7  ;;  %v666_v11 = vsel %vm361_vm9, %v499_v8, %v3606_v6 }
 0x764   :  { %v670_v13 = vpack.c.bf16 %v666_v11, %v665_v9 }
 0x766   :  { %3527 = vmatmul.msk.bf16.vlgmr.msra.gmra.mxu0 %vm673_vm15, %v670_v13 }
 0x78b   :  { %v661_v14 = vpop.permute.xlu0 %660 }
 0x78c   :  { %v667_v16 = vsel %vm361_vm9, %v502_v56, %v661_v14  ;;  %v782_v56 = vld [vmem:[%s5373_s1 + $0xe0] sm:$0xff]  ;;  %v3631_v14 = vld [vmem:[%s5373_s1 + $0xd0] ss:$0 sm:$0xff] }
 0x78d   :  { %v671_v3 = vpack.c.bf16 %v667_v16, %v667_v16  ;;  %v788_v58 = vpack.c.bf16 %v783_v57, %v782_v56 }
 0x78f   :  { %3528 = vmatmul.msk.bf16.gmra.mxu0 %vm673_vm15, %v671_v3  ;;  %805 = vmatpush.bf16.msra.mxu2 %v788_v58 }
 0x7e3   :  { %v689_v18 = vpop.f32.mrf.mxu0 }
 0x7e4   :  { %v698_v19 = vadd.f32 %v689_v18, %v4033_v31  ;;  %v3632_v18 = vld [vmem:[%s5373_s1 + $0xd8] ss:$0 sm:$0xff] }
 0x7e6   :  { %v4184_v21 = vadd.f32 %v3630_v4, %v698_v19 }
 0x7e8   :  { %v708_v22 = vsel %vm153_vm12, %v4184_v21, 0.0 }
 0x7e9   :  { %709 = vadd.xlane.f32.xlu1 %v708_v22 }
 0x7eb   :  { %v691_v52 = vpop.f32.mrf.mxu0 }
 0x7ec   :  { %v699_v61 = vadd.f32 %v691_v52, %v4040_v44 }
 0x7ee   :  { %v4189_v23 = vadd.f32 %v3630_v4, %v699_v61 }
 0x7f0   :  { %v711_v24 = vsel %vm153_vm12, %v4189_v23, 0.0 }
 0x7f1   :  { %712 = vadd.xlane.f32.xlu1 %v711_v24 }
 0x80c   :  { %v694_v25 = vpop.f32.mrf.mxu0 }
 0x80d   :  { %v700_v26 = vadd.f32 %v694_v25, %v4048_v51 }
 0x80f   :  { %v4194_v27 = vadd.f32 %v3630_v4, %v700_v26 }
 0x811   :  { %v714_v31 = vsel %vm160_vm13, %v4194_v27, 0.0 }
 0x812   :  { %715 = vadd.xlane.f32.xlu1 %v714_v31 }
 0x814   :  { %v696_v20 = vpop.f32.mrf.mxu0 }
 0x85c   :  { %v710_v28 = vpop.xlane.xlu1 %709 }
 0x85d   :  { %v717_v29 = vmul.f32 %v710_v28, %v4001_v40 }
 0x85f   :  { %v720_v44 = vsub.f32 %v4184_v21, %v717_v29 }
 0x861   :  { %v723_v32 = vmul.f32 %v720_v44, %v720_v44 }
 0x863   :  { %v726_v34 = vsel %vm153_vm12, %v723_v32, 0.0 }
 0x864   :  { %727 = vadd.xlane.f32.xlu0 %v726_v34  ;;  %v713_v35 = vpop.xlane.xlu1 %712 }
 0x865   :  { %v718_v37 = vmul.f32 %v713_v35, %v4001_v40 }
 0x867   :  { %v721_v51 = vsub.f32 %v4189_v23, %v718_v37 }
 0x869   :  { %v724_v38 = vmul.f32 %v721_v51, %v721_v51 }
 0x86b   :  { %v729_v39 = vsel %vm153_vm12, %v724_v38, 0.0 }
 0x86c   :  { %730 = vadd.xlane.f32.xlu2 %v729_v39 }
 0x885   :  { %v716_v42 = vpop.xlane.xlu1 %715 }
 0x886   :  { %v719_v43 = vmul.f32 %v716_v42, %v4001_v40 }
 0x888   :  { %v4206_v45 = vsub.f32 %v4194_v27, %v719_v43  ;;  %v4238_v43 = vld [vmem:[%s5373_s1 + $0x100] ss:$0 sm:$0xff] }
 0x88a   :  { %v725_v10 = vmul.f32 %v4206_v45, %v4206_v45 }
 0x88c   :  { %v732_v46 = vsel %vm160_vm13, %v725_v10, 0.0 }
 0x88d   :  { %733 = vadd.xlane.f32.xlu1 %v732_v46 }
 0x8d7   :  { %v728_v49 = vpop.xlane.xlu0 %727 }
 0x8d8   :  { %v735_v53 = vmul.f32 %v728_v49, %v4001_v40 }
 0x8da   :  { %v738_v55 = vadd.f32 1e-05, %v735_v53 }
 0x8dc   :  { %3704 = vrsqrt.f32 %v738_v55  ;;  %vm747_vm3 = vweird.f32 %v738_v55 }
 0x8df   :  { %v731_v59 = vpop.xlane.xlu2 %730 }
 0x8e0   :  { %v736_v62 = vmul.f32 %v731_v59, %v4001_v40 }
 0x8e2   :  { %v3705_v63 = vpop.eup %3704  ;;  %v739_v0 = vadd.f32 1e-05, %v736_v62 }
 0x8e3   :  { %v742_v60 = vmul.f32 %v3705_v63, %v738_v55  ;;  %vm748_vm2 = vweird.f32 %v3705_v63 }
 0x8e4   :  { %3706 = vrsqrt.f32 %v739_v0  ;;  %vm749_vm4 = vmor %vm747_vm3, %vm748_vm2  ;;  %vm757_vm7 = vweird.f32 %v739_v0 }
 0x8e5   :  { %v743_v17 = vmul.f32 %v3705_v63, %v742_v60 }
 0x8e7   :  { %v744_v2 = vmul.f32 0.5, %v743_v17 }
 0x8e9   :  { %v745_v1 = vsub.f32 1.5, %v744_v2 }
 0x8ea   :  { %v3707_v5 = vpop.eup %3706 }
 0x8eb   :  { %v746_v6 = vmul.f32 %v3705_v63, %v745_v1  ;;  %v752_v7 = vmul.f32 %v3707_v5, %v739_v0  ;;  %vm758_vm6 = vweird.f32 %v3707_v5  ;;  %v943_v0 = vld [vmem:[%s5373_s1 + $0x140] sm:$0xff] }
 0x8ec   :  { %vm759_vm8 = vmor %vm757_vm7, %vm758_vm6 }
 0x8ed   :  { %v753_v8 = vmul.f32 %v3707_v5, %v752_v7  ;;  %v750_v9 = vsel %vm749_vm4, %v3705_v63, %v746_v6  ;;  %v942_v63 = vld [vmem:[%s5373_s1 + $0x138] sm:$0xff]  ;;  %v940_v6 = vld [vmem:[%s5373_s1 + $0x128] sm:$0xff]  ;;  %v941_v7 = vld [vmem:[%s5373_s1 + $0x130] sm:$0xff] }
 0x8ee   :  { %v771_v16 = vmul.f32 %v750_v9, %v720_v44  ;;  %v949_v2 = vpack.c.bf16 %v943_v0, %v942_v63  ;;  %v948_v9 = vpack.c.bf16 %v941_v7, %v940_v6 }
 0x8ef   :  { %v754_v11 = vmul.f32 0.5, %v753_v8 }
 0x8f0   :  { %v775_v19 = vmul.f32 %v3631_v14, %v771_v16  ;;  %960 = vmatpush.bf16.msra.mxu1 %v949_v2 }
 0x8f1   :  { %v755_v13 = vsub.f32 1.5, %v754_v11 }
 0x8f2   :  { %v779_v61 = vadd.f32 %v3632_v18, %v775_v19  ;;  %v939_v19 = vld [vmem:[%s5373_s1 + $0x120] sm:$0xff] }
 0x8f3   :  { %v756_v3 = vmul.f32 %v3707_v5, %v755_v13 }
 0x8f4   :  { %961 = vmatpush.bf16.msra.mxu1 %v948_v9 }
 0x8f5   :  { %v760_v4 = vsel %vm759_vm8, %v3707_v5, %v756_v3 }
 0x8f6   :  { %v772_v22 = vmul.f32 %v760_v4, %v721_v51 }
 0x8f8   :  { %v776_v52 = vmul.f32 %v3631_v14, %v772_v22 }
 0x8fa   :  { %v780_v24 = vadd.f32 %v3632_v18, %v776_v52 }
 0x8fc   :  { %v786_v25 = vpack.c.bf16 %v780_v24, %v779_v61 }
 0x8fe   :  { %3529 = vmatmul.msk.bf16.vlgmr.msra.gmra.mxu2 %vm153_vm12, %v786_v25 }
 0x900   :  { %v734_v26 = vpop.xlane.xlu1 %733 }
 0x901   :  { %v737_v31 = vmul.f32 %v734_v26, %v4001_v40 }
 0x903   :  { %v740_v20 = vadd.f32 1e-05, %v737_v31 }
 0x905   :  { %3708 = vrsqrt.f32 %v740_v20  ;;  %vm767_vm2 = vweird.f32 %v740_v20 }
 0x90b   :  { %v3709_v28 = vpop.eup %3708 }
 0x90c   :  { %v762_v29 = vmul.f32 %v3709_v28, %v740_v20  ;;  %vm768_vm14 = vweird.f32 %v3709_v28 }
 0x90d   :  { %vm769_vm3 = vmor %vm767_vm2, %vm768_vm14 }
 0x90e   :  { %v763_v44 = vmul.f32 %v3709_v28, %v762_v29  ;;  %v937_v29 = vld [vmem:[%s5373_s1 + $0x110] sm:$0xff] }
 0x910   :  { %v764_v32 = vmul.f32 0.5, %v763_v44 }
 0x912   :  { %v765_v34 = vsub.f32 1.5, %v764_v32 }
 0x914   :  { %v766_v35 = vmul.f32 %v3709_v28, %v765_v34 }
 0x916   :  { %v770_v37 = vsel %vm769_vm3, %v3709_v28, %v766_v35  ;;  %v936_v28 = vld [vmem:[%s5373_s1 + $0x108] sm:$0xff] }
 0x917   :  { %v773_v51 = vmul.f32 %v770_v37, %v4206_v45  ;;  %v946_v32 = vpack.c.bf16 %v937_v29, %v936_v28 }
 0x919   :  { %v777_v38 = vmul.f32 %v3631_v14, %v773_v51 }
 0x91b   :  { %v781_v39 = vadd.f32 %v3632_v18, %v777_v38  ;;  %v938_v18 = vld [vmem:[%s5373_s1 + $0x118] sm:$0xff] }
 0x91c   :  { %v947_v52 = vpack.c.bf16 %v939_v19, %v938_v18 }
 0x91d   :  { %v787_v42 = vpack.c.bf16 %v781_v39, %v781_v39 }
 0x91e   :  { %962 = vmatpush.bf16.msra.mxu1 %v947_v52 }
 0x91f   :  { %3530 = vmatmul.msk.bf16.gmra.mxu2 %vm153_vm12, %v787_v42 }
 0x922   :  { %963 = vmatpush.bf16.msra.mxu1 %v946_v32 }
 0x981   :  { %v807_v10 = vpop.f32.mrf.mxu2 }
 0x982   :  { %v4241_v46 = vadd.f32 %v4238_v43, %v807_v10 }
 0x984   :  { %v4244_v47 = vmul.f32 0.70710677, %v4241_v46 }
 0x986   :  { %v822_v48 = vand.u32 2147483647, %v4244_v47 }
 0x988   :  { %v825_v45 = vmul.f32 0.3275911, %v822_v48  ;;  %v903_v3 = vsub.f32 0.0, %v822_v48 }
 0x989   :  { %v809_v49 = vpop.f32.mrf.mxu2 }
 0x98a   :  { %v828_v50 = vadd.f32 1.0, %v825_v45  ;;  %v4248_v53 = vadd.f32 %v4238_v43, %v809_v49  ;;  %v906_v26 = vmul.f32 %v903_v3, %v822_v48 }
 0x98c   :  { %3710 = vrcp.f32 %v828_v50  ;;  %v4251_v55 = vmul.f32 0.70710677, %v4248_v53  ;;  %v842_v17 = vand.u32 2147483648, %v828_v50  ;;  %v840_v5 = vand.u32 2147483647, %v828_v50 }
 0x98d   :  { %vm836_vm6 = vweird.f32 %v828_v50  ;;  %v909_v38 = vmul.f32 1.442695, %v906_v26 }
 0x98e   :  { %v4254_v56 = vand.u32 2147483647, %v4251_v55  ;;  %v843_v11 = vor.u32 1.1754944e-38, %v842_v17  ;;  %vm841_vm8 = vcmp.eq.f32.partialorder %v840_v5, 8.507059e+37 }
 0x990   :  { %v826_v57 = vmul.f32 0.3275911, %v4254_v56  ;;  %v904_v45 = vsub.f32 0.0, %v4254_v56 }
 0x992   :  { %v3711_v58 = vpop.eup %3710  ;;  %v829_v62 = vadd.f32 1.0, %v826_v57  ;;  %v907_v63 = vmul.f32 %v904_v45, %v4254_v56 }
 0x993   :  { %v832_v59 = vmul.f32 %v3711_v58, %v828_v50  ;;  %vm837_vm4 = vweird.f32 %v3711_v58 }
 0x994   :  { %3712 = vrcp.f32 %v829_v62  ;;  %vm838_vm7 = vmor %vm836_vm6, %vm837_vm4  ;;  %v857_v25 = vand.u32 2147483648, %v829_v62  ;;  %v855_v20 = vand.u32 2147483647, %v829_v62  ;;  %vm851_vm2 = vweird.f32 %v829_v62 }
 0x995   :  { %v833_v60 = vsub.f32 1.0, %v832_v59  ;;  %3714 = vpow2.f32 %v909_v38  ;;  %v911_v6 = vmul.f32 1.442695, %v907_v63  ;;  %vm921_vm6 = vcmp.ge.f32.partialorder %v4244_v47, 0.0 }
 0x996   :  { %v858_v37 = vor.u32 1.1754944e-38, %v857_v25  ;;  %vm856_vm4 = vcmp.eq.f32.partialorder %v855_v20, 8.507059e+37  ;;  %v816_v47 = vmul.f32 0.5, %v4241_v46 }
 0x997   :  { %v834_v1 = vmul.f32 %v3711_v58, %v833_v60 }
 0x999   :  { %v835_v8 = vadd.f32 %v3711_v58, %v834_v1 }
 0x99a   :  { %v3713_v13 = vpop.eup %3712 }
 0x99b   :  { %v839_v14 = vsel %vm838_vm7, %v3711_v58, %v835_v8  ;;  %v847_v4 = vmul.f32 %v3713_v13, %v829_v62  ;;  %vm852_vm14 = vweird.f32 %v3713_v13  ;;  %v3715_v7 = vpop.eup %3714 }
 0x99c   :  { %v844_v16 = vsel %vm841_vm8, %v843_v11, %v839_v14  ;;  %vm853_vm3 = vmor %vm851_vm2, %vm852_vm14  ;;  %vm922_vm2 = vcmp.ge.f32.partialorder %v4251_v55, 0.0 }
 0x99d   :  { %v876_v22 = vmul.f32 1.0614054, %v844_v16  ;;  %v848_v61 = vsub.f32 1.0, %v847_v4 }
 0x99f   :  { %v879_v24 = vadd.f32 -1.4531521, %v876_v22  ;;  %v849_v31 = vmul.f32 %v3713_v13, %v848_v61 }
 0x9a1   :  { %v882_v44 = vmul.f32 %v879_v24, %v844_v16  ;;  %v850_v34 = vadd.f32 %v3713_v13, %v849_v31 }
 0x9a2   :  { %v812_v51 = vpop.f32.mrf.mxu2 }
 0x9a3   :  { %v885_v35 = vadd.f32 1.4214138, %v882_v44  ;;  %v854_v39 = vsel %vm853_vm3, %v3713_v13, %v850_v34  ;;  %v4282_v42 = vadd.f32 %v4238_v43, %v812_v51  ;;  %v817_v51 = vmul.f32 0.5, %v4248_v53 }
 0x9a4   :  { %v859_v48 = vsel %vm856_vm4, %v858_v37, %v854_v39 }
 0x9a5   :  { %v888_v10 = vmul.f32 %v885_v35, %v844_v16  ;;  %v877_v49 = vmul.f32 1.0614054, %v859_v48  ;;  %v4286_v50 = vmul.f32 0.70710677, %v4282_v42 }
 0x9a7   :  { %v891_v57 = vadd.f32 -0.28449672, %v888_v10  ;;  %v880_v58 = vadd.f32 -1.4531521, %v877_v49  ;;  %v824_v59 = vand.u32 2147483647, %v4286_v50 }
 0x9a8   :  { %vm923_vm4 = vcmp.ge.f32.partialorder %v4286_v50, 0.0 }
 0x9a9   :  { %v894_v62 = vmul.f32 %v891_v57, %v844_v16  ;;  %v883_v0 = vmul.f32 %v880_v58, %v859_v48  ;;  %v827_v43 = vmul.f32 0.3275911, %v824_v59  ;;  %v905_v35 = vsub.f32 0.0, %v824_v59 }
 0x9aa   :  { %v814_v17 = vpop.f32.mrf.mxu2 }
 0x9ab   :  { %v897_v60 = vadd.f32 0.2548296, %v894_v62  ;;  %v886_v2 = vadd.f32 1.4214138, %v883_v0  ;;  %v830_v1 = vadd.f32 1.0, %v827_v43  ;;  %v908_v49 = vmul.f32 %v905_v35, %v824_v59 }
 0x9ac   :  { %v818_v59 = vmul.f32 0.5, %v4282_v42 }
 0x9ad   :  { %v900_v5 = vmul.f32 %v897_v60, %v844_v16  ;;  %v889_v8 = vmul.f32 %v886_v2, %v859_v48  ;;  %3716 = vrcp.f32 %v830_v1  ;;  %v872_v24 = vand.u32 2147483648, %v830_v1 }
 0x9ae   :  { %3718 = vpow2.f32 %v911_v6  ;;  %v870_v25 = vand.u32 2147483647, %v830_v1  ;;  %vm866_vm8 = vweird.f32 %v830_v1  ;;  %v913_v62 = vmul.f32 1.442695, %v908_v49 }
 0x9af   :  { %v915_v9 = vmul.f32 %v3715_v7, %v900_v5  ;;  %v892_v11 = vadd.f32 -0.28449672, %v889_v8  ;;  %v873_v29 = vor.u32 1.1754944e-38, %v872_v24 }
 0x9b0   :  { %vm871_vm3 = vcmp.eq.f32.partialorder %v870_v25, 8.507059e+37  ;;  %3720 = vpow2.f32 %v913_v62 }
 0x9b1   :  { %v918_v13 = vsub.f32 1.0, %v915_v9  ;;  %v895_v14 = vmul.f32 %v892_v11, %v859_v48  ;;  %v3634_v9 = vld [vmem:[%s5373_s1 + $0x148] ss:$0 sm:$0xff] }
 0x9b3   :  { %v3717_v3 = vpop.eup %3716  ;;  %v898_v4 = vadd.f32 0.2548296, %v895_v14  ;;  %v924_v56 = vsub.f32 0.0, %v918_v13 }
 0x9b4   :  { %v862_v18 = vmul.f32 %v3717_v3, %v830_v1  ;;  %v3719_v22 = vpop.eup %3718  ;;  %vm867_vm7 = vweird.f32 %v3717_v3 }
 0x9b5   :  { %v901_v19 = vmul.f32 %v898_v4, %v859_v48  ;;  %v927_v26 = vsel %vm921_vm6, %v918_v13, %v924_v56  ;;  %vm868_vm14 = vmor %vm866_vm8, %vm867_vm7 }
 0x9b6   :  { %v863_v52 = vsub.f32 1.0, %v862_v18  ;;  %v930_v44 = vadd.f32 1.0, %v927_v26  ;;  %v3721_v17 = vpop.eup %3720 }
 0x9b7   :  { %v916_v61 = vmul.f32 %v3719_v22, %v901_v19 }
 0x9b8   :  { %v864_v16 = vmul.f32 %v3717_v3, %v863_v52  ;;  %v933_v10 = vmul.f32 %v930_v44, %v816_v47  ;;  %v1061_v47 = vld [vmem:[%s5373_s1 + $0x178] sm:$0xff] }
 0x9b9   :  { %v919_v31 = vsub.f32 1.0, %v916_v61 }
 0x9ba   :  { %v865_v20 = vadd.f32 %v3717_v3, %v864_v16 }
 0x9bb   :  { %v925_v28 = vsub.f32 0.0, %v919_v31 }
 0x9bc   :  { %v869_v32 = vsel %vm868_vm14, %v3717_v3, %v865_v20 }
 0x9bd   :  { %v928_v34 = vsel %vm922_vm2, %v919_v31, %v925_v28  ;;  %v874_v37 = vsel %vm871_vm3, %v873_v29, %v869_v32 }
 0x9be   :  { %v931_v38 = vadd.f32 1.0, %v928_v34  ;;  %v878_v39 = vmul.f32 1.0614054, %v874_v37 }
 0x9c0   :  { %v934_v48 = vmul.f32 %v931_v38, %v817_v51  ;;  %v881_v45 = vadd.f32 -1.4531521, %v878_v39 }
 0x9c2   :  { %v944_v57 = vpack.c.bf16 %v934_v48, %v933_v10  ;;  %v884_v58 = vmul.f32 %v881_v45, %v874_v37  ;;  %v1058_v10 = vld [vmem:[%s5373_s1 + $0x160] sm:$0xff]  ;;  %v1059_v48 = vld [vmem:[%s5373_s1 + $0x168] sm:$0xff] }
 0x9c3   :  { %v1064_v49 = vpack.c.bf16 %v1059_v48, %v1058_v10 }
 0x9c4   :  { %3531 = vmatmul.msk.bf16.vlgmr.msra.gmra.mxu1 %vm39_vm0, %v944_v57  ;;  %v887_v55 = vadd.f32 1.4214138, %v884_v58 }
 0x9c6   :  { %v890_v63 = vmul.f32 %v887_v55, %v874_v37 }
 0x9c8   :  { %v893_v0 = vadd.f32 -0.28449672, %v890_v63 }
 0x9ca   :  { %v896_v43 = vmul.f32 %v893_v0, %v874_v37 }
 0x9cc   :  { %v899_v60 = vadd.f32 0.2548296, %v896_v43 }
 0x9ce   :  { %v902_v46 = vmul.f32 %v899_v60, %v874_v37  ;;  %v1060_v37 = vld [vmem:[%s5373_s1 + $0x170] sm:$0xff] }
 0x9cf   :  { %v1065_v51 = vpack.c.bf16 %v1061_v47, %v1060_v37 }
 0x9d0   :  { %v917_v53 = vmul.f32 %v3721_v17, %v902_v46 }
 0x9d1   :  { %1078 = vmatpush.bf16.msra.mxu3 %v1065_v51  ;;  %v3550_v51 = vld [vmem:[%s5372_s0 + $0x20] sm:$0xff] }
 0x9d2   :  { %v920_v2 = vsub.f32 1.0, %v917_v53 }
 0x9d4   :  { %v926_v1 = vsub.f32 0.0, %v920_v2 }
 0x9d5   :  { %1079 = vmatpush.bf16.msra.mxu3 %v1064_v49 }
 0x9d6   :  { %v929_v5 = vsel %vm923_vm4, %v920_v2, %v926_v1 }
 0x9d7   :  { %v932_v6 = vadd.f32 1.0, %v929_v5 }
 0x9d9   :  { %v935_v7 = vmul.f32 %v932_v6, %v818_v59 }
 0x9db   :  { %v945_v8 = vpack.c.bf16 %v935_v7, %v935_v7 }
 0x9dd   :  { %3532 = vmatmul.msk.bf16.gmra.mxu1 %vm39_vm0, %v945_v8  ;;  %v3635_v8 = vld [vmem:[%s5373_s1 + $0x150] ss:$0 sm:$0xff] }
 0xa41   :  { %v965_v11 = vpop.f32.mrf.mxu1 }
 0xa42   :  { %v974_v13 = vadd.f32 %v965_v11, %v4184_v21 }
 0xa44   :  { %v4302_v14 = vadd.f32 %v3634_v9, %v974_v13 }
 0xa46   :  { %v984_v50 = vsel %vm153_vm12, %v4302_v14, 0.0 }
 0xa47   :  { %985 = vadd.xlane.f32.xlu1 %v984_v50 }
 0xa49   :  { %v967_v3 = vpop.f32.mrf.mxu1 }
 0xa4a   :  { %v975_v42 = vadd.f32 %v967_v3, %v4189_v23  ;;  %v3636_v3 = vld [vmem:[%s5373_s1 + $0x158] ss:$0 sm:$0xff] }
 0xa4c   :  { %v4307_v4 = vadd.f32 %v3634_v9, %v975_v42 }
 0xa4e   :  { %v987_v18 = vsel %vm153_vm12, %v4307_v4, 0.0 }
 0xa4f   :  { %988 = vadd.xlane.f32.xlu1 %v987_v18 }
 0xa5a   :  { %v970_v56 = vpop.f32.mrf.mxu1 }
 0xa5b   :  { %v976_v19 = vadd.f32 %v970_v56, %v4194_v27 }
 0xa5d   :  { %v4312_v22 = vadd.f32 %v3634_v9, %v976_v19 }
 0xa5f   :  { %v990_v21 = vsel %vm160_vm13, %v4312_v22, 0.0 }
 0xa60   :  { %991 = vadd.xlane.f32.xlu1 %v990_v21 }
 0xa62   :  { %v972_v52 = vpop.f32.mrf.mxu1 }
 0xaba   :  { %v986_v61 = vpop.xlane.xlu1 %985 }
 0xabb   :  { %v993_v24 = vmul.f32 %v986_v61, %v4001_v40 }
 0xabd   :  { %v996_v23 = vsub.f32 %v4302_v14, %v993_v24 }
 0xabf   :  { %v999_v16 = vmul.f32 %v996_v23, %v996_v23 }
 0xac1   :  { %v1002_v25 = vsel %vm153_vm12, %v999_v16, 0.0 }
 0xac2   :  { %v989_v26 = vpop.xlane.xlu1 %988  ;;  %1003 = vadd.xlane.f32.xlu1 %v1002_v25 }
 0xac3   :  { %v994_v31 = vmul.f32 %v989_v26, %v4001_v40 }
 0xac5   :  { %v997_v27 = vsub.f32 %v4307_v4, %v994_v31 }
 0xac7   :  { %v1000_v20 = vmul.f32 %v997_v27, %v997_v27 }
 0xac9   :  { %v1005_v28 = vsel %vm153_vm12, %v1000_v20, 0.0 }
 0xaca   :  { %1006 = vadd.xlane.f32.xlu0 %v1005_v28 }
 0xad3   :  { %v992_v29 = vpop.xlane.xlu1 %991 }
 0xad4   :  { %v995_v44 = vmul.f32 %v992_v29, %v4001_v40 }
 0xad6   :  { %v4324_v32 = vsub.f32 %v4312_v22, %v995_v44 }
 0xad8   :  { %v1001_v34 = vmul.f32 %v4324_v32, %v4324_v32 }
 0xada   :  { %v1008_v35 = vsel %vm160_vm13, %v1001_v34, 0.0 }
 0xadb   :  { %1009 = vadd.xlane.f32.xlu2 %v1008_v35 }
 0xb35   :  { %v1004_v38 = vpop.xlane.xlu1 %1003 }
 0xb36   :  { %v1011_v39 = vmul.f32 %v1004_v38, %v4001_v40  ;;  %v1799_v38 = vsel %vm39_vm0, %v3550_v51, 0.0 }
 0xb38   :  { %v1014_v45 = vadd.f32 1e-05, %v1011_v39 }
 0xb3a   :  { %3722 = vrsqrt.f32 %v1014_v45  ;;  %vm1023_vm7 = vweird.f32 %v1014_v45 }
 0xb3d   :  { %v1007_v57 = vpop.xlane.xlu0 %1006 }
 0xb3e   :  { %v1012_v58 = vmul.f32 %v1007_v57, %v4001_v40 }
 0xb40   :  { %v3723_v55 = vpop.eup %3722  ;;  %v1015_v62 = vadd.f32 1e-05, %v1012_v58 }
 0xb41   :  { %v1018_v63 = vmul.f32 %v3723_v55, %v1014_v45  ;;  %vm1024_vm6 = vweird.f32 %v3723_v55 }
 0xb42   :  { %3724 = vrsqrt.f32 %v1015_v62  ;;  %vm1025_vm8 = vmor %vm1023_vm7, %vm1024_vm6  ;;  %vm1033_vm2 = vweird.f32 %v1015_v62 }
 0xb43   :  { %v1019_v0 = vmul.f32 %v3723_v55, %v1018_v63  ;;  %v3549_v63 = vld [vmem:[%s5372_s0 + $0x18] sm:$0xff] }
 0xb45   :  { %v1020_v43 = vmul.f32 0.5, %v1019_v0  ;;  %v1796_v0 = vsel %vm39_vm0, %v3549_v63, 0.0 }
 0xb47   :  { %v1021_v60 = vsub.f32 1.5, %v1020_v43 }
 0xb48   :  { %v3725_v46 = vpop.eup %3724 }
 0xb49   :  { %v1022_v17 = vmul.f32 %v3723_v55, %v1021_v60  ;;  %v1028_v53 = vmul.f32 %v3725_v46, %v1015_v62  ;;  %vm1034_vm14 = vweird.f32 %v3725_v46 }
 0xb4a   :  { %vm1035_vm3 = vmor %vm1033_vm2, %vm1034_vm14 }
 0xb4b   :  { %v1029_v2 = vmul.f32 %v3725_v46, %v1028_v53  ;;  %v1026_v1 = vsel %vm1025_vm8, %v3723_v55, %v1022_v17 }
 0xb4c   :  { %v1047_v9 = vmul.f32 %v1026_v1, %v996_v23 }
 0xb4d   :  { %v1030_v5 = vmul.f32 0.5, %v1029_v2 }
 0xb4e   :  { %v1010_v59 = vpop.xlane.xlu2 %1009  ;;  %v1051_v42 = vmul.f32 %v3635_v8, %v1047_v9 }
 0xb4f   :  { %v1031_v6 = vsub.f32 1.5, %v1030_v5  ;;  %v1013_v7 = vmul.f32 %v1010_v59, %v4001_v40 }
 0xb50   :  { %v1055_v19 = vadd.f32 %v3636_v3, %v1051_v42 }
 0xb51   :  { %v1032_v11 = vmul.f32 %v3725_v46, %v1031_v6  ;;  %v1016_v13 = vadd.f32 1e-05, %v1013_v7 }
 0xb53   :  { %v1036_v50 = vsel %vm1035_vm3, %v3725_v46, %v1032_v11  ;;  %3726 = vrsqrt.f32 %v1016_v13  ;;  %vm1043_vm6 = vweird.f32 %v1016_v13 }
 0xb54   :  { %v1048_v18 = vmul.f32 %v1036_v50, %v997_v27 }
 0xb56   :  { %v1052_v56 = vmul.f32 %v3635_v8, %v1048_v18 }
 0xb58   :  { %v1056_v21 = vadd.f32 %v3636_v3, %v1052_v56 }
 0xb59   :  { %v3727_v52 = vpop.eup %3726 }
 0xb5a   :  { %v1038_v61 = vmul.f32 %v3727_v52, %v1016_v13  ;;  %v1062_v24 = vpack.c.bf16 %v1056_v21, %v1055_v19  ;;  %vm1044_vm4 = vweird.f32 %v3727_v52 }
 0xb5b   :  { %vm1045_vm7 = vmor %vm1043_vm6, %vm1044_vm4 }
 0xb5c   :  { %v1039_v16 = vmul.f32 %v3727_v52, %v1038_v61  ;;  %3533 = vmatmul.msk.bf16.vlgmr.msra.gmra.mxu3 %vm153_vm12, %v1062_v24 }
 0xb5e   :  { %v1040_v23 = vmul.f32 0.5, %v1039_v16 }
 0xb60   :  { %v1041_v25 = vsub.f32 1.5, %v1040_v23 }
 0xb62   :  { %v1042_v26 = vmul.f32 %v3727_v52, %v1041_v25 }
 0xb64   :  { %v1046_v31 = vsel %vm1045_vm7, %v3727_v52, %v1042_v26 }
 0xb65   :  { %v1049_v20 = vmul.f32 %v1046_v31, %v4324_v32 }
 0xb67   :  { %v1053_v28 = vmul.f32 %v3635_v8, %v1049_v20  ;;  %v3551_v8 = vld [vmem:[%s5372_s0 + $0x28] sm:$0x1] }
 0xb68   :  { %v1802_v11 = vsel %vm46_vm1, %v3551_v8, 0.0 }
 0xb69   :  { %v1057_v27 = vadd.f32 %v3636_v3, %v1053_v28 }
 0xb6b   :  { %v1063_v29 = vpack.c.bf16 %v1057_v27, %v1057_v27 }
 0xb6d   :  { %3534 = vmatmul.msk.bf16.gmra.mxu3 %vm153_vm12, %v1063_v29 }
 0xbdf   :  { %v1081_v44 = vpop.f32.mrf.mxu3 }
 0xbe7   :  { %v1083_v34 = vpop.f32.mrf.mxu3 }
 0xbe8   :  { %v4353_v35 = vpack.c.bf16 %v1083_v34, %v1081_v44 }
 0xbea   :  { %1237 = vrot.lane.b32.xlu2 %v4353_v35, %s3903_s7  ;;  %1241 = vrot.lane.b32.xlu0 %v4353_v35, %s3902_s6 }
 0xbf0   :  { %v1086_v37 = vpop.f32.mrf.mxu3 }
 0xbf1   :  { %v4359_v47 = vpack.c.bf16 %v1086_v37, %v1086_v37 }
 0xbf3   :  { %1239 = vrot.lane.b32.xlu0 %v4359_v47, %s3903_s7  ;;  %1243 = vrot.lane.b32.xlu1 %v4359_v47, %s3902_s6 }
 0xbf8   :  { %v1088_v32 = vpop.f32.mrf.mxu3 }
 0xc13   :  { %1797 = vadd.xlane.f32.xlu2 %v1796_v0 }
 0xc1d   :  { %1800 = vadd.xlane.f32.xlu0 %v1799_v38 }
 0xc31   :  { %1354 = vrot.lane.b32.xlu0 %v4359_v47, %s3905_s9 }
 0xc44   :  { %v1238_v49 = vpop.permute.xlu2 %1237 }
 0xc5c   :  { %v1242_v48 = vpop.permute.xlu0 %1241 }
 0xc5d   :  { %v1252_v45 = vsel %vm361_vm9, %v1242_v48, 0 }
 0xc65   :  { %v1244_v39 = vpop.permute.xlu1 %1243  ;;  %v1240_v57 = vpop.permute.xlu0 %1239 }
 0xc66   :  { %v1255_v10 = vsel %vm361_vm9, %v1244_v39, 0 }
 0xc67   :  { %1263 = vmatpush.bf16.xpose.msrb.mxu1 %v1255_v10 }
 0xc6f   :  { %1264 = vmatpush.bf16.xpose.msrb.mxu1 %v1252_v45 }
 0xc76   :  { %3539 = vmatmul.msk.bf16.vlgmr.msrb.gmra.mxu1 %vm361_vm9, %v1238_v49 }
 0xc86   :  { %3540 = vmatmul.msk.bf16.gmra.mxu1 %vm361_vm9, %v1240_v57  ;;  %v1798_v3 = vpop.xlane.xlu2 %1797 }
 0xc90   :  { %v1801_v58 = vpop.xlane.xlu0 %1800 }
 0xc91   :  { %v1806_v7 = vmul.f32 %v1801_v58, %v3935_v12 }
 0xc93   :  { %v4391_v9 = vsub.f32 %v3550_v51, %v1806_v7  ;;  %v1805_v51 = vmul.f32 %v1798_v3, %v3935_v12 }
 0xc95   :  { %v1812_v13 = vmul.f32 %v4391_v9, %v4391_v9  ;;  %v4423_v10 = vsub.f32 %v3549_v63, %v1805_v51 }
 0xc97   :  { %v1817_v50 = vsel %vm39_vm0, %v1812_v13, 0.0  ;;  %v1811_v45 = vmul.f32 %v4423_v10, %v4423_v10 }
 0xc99   :  { %v1814_v49 = vsel %vm39_vm0, %v1811_v45, 0.0 }
 0xca3   :  { %v1355_v55 = vpop.permute.xlu0 %1354 }
 0xca4   :  { %v1364_v62 = vand.u32 %v1355_v55, %v4132_v54 }
 0xca6   :  { %1372 = vmatpush.bf16.msrb.mxu3 %v1364_v62 }
 0xcf3   :  { %v1266_v43 = vpop.f32.mrf.mxu1 }
 0xcf4   :  { %v1275_v60 = vmul.f32 0.35355338, %v1266_v43 }
 0xcf6   :  { %v1278_v46 = vsel %vm395_vm10, %v1275_v60, -inf }
 0xcf7   :  { %1279 = vmax.xlane.f32.xlu1 %v1278_v46 }
 0xcfb   :  { %v1268_v17 = vpop.f32.mrf.mxu1 }
 0xcfc   :  { %v1276_v53 = vmul.f32 0.35355338, %v1268_v17 }
 0xcfe   :  { %v1281_v2 = vsel %vm395_vm10, %v1276_v53, -inf }
 0xcff   :  { %1282 = vmax.xlane.f32.xlu2 %v1281_v2 }
 0xd03   :  { %v1271_v1 = vpop.f32.mrf.mxu1 }
 0xd04   :  { %v1277_v5 = vmul.f32 0.35355338, %v1271_v1 }
 0xd06   :  { %v1284_v59 = vsel %vm402_vm11, %v1277_v5, -inf }
 0xd07   :  { %1285 = vmax.xlane.f32.xlu0 %v1284_v59 }
 0xd0b   :  { %v1273_v6 = vpop.f32.mrf.mxu1 }
 0xd10   :  { %1096 = vrot.lane.b32.xlu1 %v4359_v47, %s3901_s5 }
 0xd17   :  { %1094 = vrot.lane.b32.xlu2 %v4353_v35, %s3901_s5 }
 0xd3a   :  { %1803 = vadd.xlane.f32.xlu1 %v1802_v11 }
 0xd42   :  { %1818 = vadd.xlane.f32.xlu1 %v1817_v50 }
 0xd6a   :  { %v1280_v42 = vpop.xlane.xlu1 %1279 }
 0xd6b   :  { %v1287_v18 = vsub.f32 %v1275_v60, %v1280_v42 }
 0xd6d   :  { %v1290_v56 = vmul.f32 1.442695, %v1287_v18 }
 0xd6f   :  { %3728 = vpow2.f32 %v1290_v56 }
 0xd72   :  { %v1283_v19 = vpop.xlane.xlu2 %1282 }
 0xd73   :  { %v1288_v21 = vsub.f32 %v1276_v53, %v1283_v19 }
 0xd75   :  { %v4397_v52 = vpop.eup %3728  ;;  %v1292_v61 = vmul.f32 1.442695, %v1288_v21 }
 0xd76   :  { %v1296_v24 = vsel %vm395_vm10, %v4397_v52, 0.0 }
 0xd77   :  { %3730 = vpow2.f32 %v1292_v61  ;;  %1297 = vadd.xlane.f32.xlu0 %v1296_v24 }
 0xd7a   :  { %v1286_v16 = vpop.xlane.xlu0 %1285  ;;  %v1095_v44 = vpop.permute.xlu2 %1094 }
 0xd7b   :  { %v1289_v23 = vsub.f32 %v1277_v5, %v1286_v16  ;;  %v1105_v34 = vsel %vm361_vm9, %v1095_v44, 0 }
 0xd7d   :  { %v4401_v25 = vpop.eup %3730  ;;  %v1294_v26 = vmul.f32 1.442695, %v1289_v23 }
 0xd7e   :  { %v1299_v31 = vsel %vm395_vm10, %v4401_v25, 0.0 }
 0xd7f   :  { %3732 = vpow2.f32 %v1294_v26  ;;  %1300 = vadd.xlane.f32.xlu0 %v1299_v31 }
 0xd82   :  { %v1097_v20 = vpop.permute.xlu1 %1096 }
 0xd83   :  { %v1108_v28 = vsel %vm361_vm9, %v1097_v20, 0 }
 0xd84   :  { %1116 = vmatpush.bf16.xpose.msrb.mxu0 %v1108_v28 }
 0xd85   :  { %v4406_v27 = vpop.eup %3732 }
 0xd86   :  { %v1302_v29 = vsel %vm402_vm11, %v4406_v27, 0.0 }
 0xd87   :  { %1303 = vadd.xlane.f32.xlu2 %v1302_v29 }
 0xd8c   :  { %1117 = vmatpush.bf16.xpose.msrb.mxu0 %v1105_v34 }
 0xd93   :  { %3535 = vmatmul.msk.bf16.vlgmr.msrb.gmra.mxu0 %vm361_vm9, %v4353_v35  ;;  %1352 = vrot.lane.b32.xlu0 %v4353_v35, %s3905_s9 }
 0xda3   :  { %3536 = vmatmul.msk.bf16.gmra.mxu0 %vm361_vm9, %v4359_v47 }
 0xdad   :  { %v1804_v37 = vpop.xlane.xlu1 %1803 }
 0xdae   :  { %v1807_v32 = vmul.f32 %v1804_v37, %v3935_v12 }
 0xdb0   :  { %v4419_v38 = vsub.f32 %v3551_v8, %v1807_v32 }
 0xdb2   :  { %v1813_v39 = vmul.f32 %v4419_v38, %v4419_v38 }
 0xdb4   :  { %v1820_v48 = vsel %vm46_vm1, %v1813_v39, 0.0 }
 0xdb5   :  { %1821 = vadd.xlane.f32.xlu1 %v1820_v48 }
 0xdbd   :  { %1815 = vadd.xlane.f32.xlu0 %v1814_v49 }
 0xdd1   :  { %1205 = vrot.lane.b32.xlu0 %v4353_v35, %s3904_s8 }
 0xdea   :  { %v1298_v57 = vpop.xlane.xlu0 %1297 }
 0xdeb   :  { %3734 = vrcp.f32 %v1298_v57  ;;  %v1316_v53 = vand.u32 2147483648, %v1298_v57  ;;  %vm1310_vm8 = vweird.f32 %v1298_v57  ;;  %v1314_v2 = vand.u32 2147483647, %v1298_v57 }
 0xded   :  { %v1317_v7 = vor.u32 1.1754944e-38, %v1316_v53  ;;  %vm1315_vm3 = vcmp.eq.f32.partialorder %v1314_v2, 8.507059e+37 }
 0xdf1   :  { %v3735_v58 = vpop.eup %3734 }
 0xdf2   :  { %v1306_v55 = vmul.f32 %v3735_v58, %v1298_v57  ;;  %v1301_v62 = vpop.xlane.xlu0 %1300  ;;  %vm1311_vm1 = vweird.f32 %v3735_v58 }
 0xdf3   :  { %3736 = vrcp.f32 %v1301_v62  ;;  %vm1312_vm14 = vmor %vm1310_vm8, %vm1311_vm1  ;;  %v1331_v35 = vand.u32 2147483648, %v1301_v62  ;;  %v1329_v6 = vand.u32 2147483647, %v1301_v62  ;;  %vm1325_vm4 = vweird.f32 %v1301_v62 }
 0xdf4   :  { %v1307_v63 = vsub.f32 1.0, %v1306_v55 }
 0xdf5   :  { %v1332_v50 = vor.u32 1.1754944e-38, %v1331_v35  ;;  %vm1330_vm7 = vcmp.eq.f32.partialorder %v1329_v6, 8.507059e+37 }
 0xdf6   :  { %v1308_v0 = vmul.f32 %v3735_v58, %v1307_v63 }
 0xdf8   :  { %v1309_v60 = vadd.f32 %v3735_v58, %v1308_v0 }
 0xdf9   :  { %v3737_v43 = vpop.eup %3736 }
 0xdfa   :  { %v1321_v46 = vmul.f32 %v3737_v43, %v1301_v62  ;;  %v1304_v17 = vpop.xlane.xlu2 %1303  ;;  %v1313_v5 = vsel %vm1312_vm14, %v3735_v58, %v1309_v60  ;;  %vm1326_vm2 = vweird.f32 %v3737_v43 }
 0xdfb   :  { %3738 = vrcp.f32 %v1304_v17  ;;  %v1318_v13 = vsel %vm1315_vm3, %v1317_v7, %v1313_v5  ;;  %vm1327_vm6 = vmor %vm1325_vm4, %vm1326_vm2  ;;  %v1346_v26 = vand.u32 2147483648, %v1304_v17  ;;  %vm1340_vm8 = vweird.f32 %v1304_v17 }
 0xdfc   :  { %v1322_v1 = vsub.f32 1.0, %v1321_v46  ;;  %v1319_v56 = vmul.f32 %v4397_v52, %v1318_v13  ;;  %v1344_v31 = vand.u32 2147483647, %v1304_v17 }
 0xdfd   :  { %v1347_v20 = vor.u32 1.1754944e-38, %v1346_v26 }
 0xdfe   :  { %v1323_v59 = vmul.f32 %v3737_v43, %v1322_v1  ;;  %vm1345_vm2 = vcmp.eq.f32.partialorder %v1344_v31, 8.507059e+37 }
 0xe00   :  { %v1324_v8 = vadd.f32 %v3737_v43, %v1323_v59 }
 0xe01   :  { %v3739_v11 = vpop.eup %3738 }
 0xe02   :  { %v1328_v3 = vsel %vm1327_vm6, %v3737_v43, %v1324_v8  ;;  %v1336_v42 = vmul.f32 %v3739_v11, %v1304_v17  ;;  %vm1341_vm1 = vweird.f32 %v3739_v11 }
 0xe03   :  { %v1333_v18 = vsel %vm1330_vm7, %v1332_v50, %v1328_v3  ;;  %vm1342_vm14 = vmor %vm1340_vm8, %vm1341_vm1 }
 0xe04   :  { %v1334_v19 = vmul.f32 %v4401_v25, %v1333_v18  ;;  %v1337_v21 = vsub.f32 1.0, %v1336_v42  ;;  %v3890_v18 = vld [vmem:[%s5373_s1] ss:$0 sm:$0xff] }
 0xe05   :  { %v1353_v61 = vpop.permute.xlu0 %1352 }
 0xe06   :  { %v1338_v24 = vmul.f32 %v3739_v11, %v1337_v21  ;;  %1373 = vmatpush.bf16.msrb.mxu3 %v1353_v61  ;;  %v1350_v16 = vpack.c.bf16 %v1334_v19, %v1319_v56 }
 0xe08   :  { %v1339_v23 = vadd.f32 %v3739_v11, %v1338_v24 }
 0xe09   :  { %3541 = vmatmul.msk.bf16.vlgmr.msrb.gmra.mxu3 %vm395_vm10, %v1350_v16 }
 0xe0a   :  { %1880 = vmatpush.bf16.msra.mxu3 %v3953_v30  ;;  %v1343_v52 = vsel %vm1342_vm14, %v3739_v11, %v1339_v23 }
 0xe0b   :  { %v1348_v28 = vsel %vm1345_vm2, %v1347_v20, %v1343_v52 }
 0xe0c   :  { %v1349_v44 = vmul.f32 %v4406_v27, %v1348_v28 }
 0xe0e   :  { %1881 = vmatpush.bf16.msra.mxu3 %v3962_v33  ;;  %v1351_v34 = vpack.c.bf16 %v1349_v44, %v1349_v44  ;;  %v1819_v33 = vpop.xlane.xlu1 %1818 }
 0xe10   :  { %v1119_v25 = vpop.f32.mrf.mxu0 }
 0xe11   :  { %v4437_v29 = vmul.f32 0.35355338, %v1119_v25 }
 0xe12   :  { %1882 = vmatpush.bf16.msra.mxu3 %v3971_v36  ;;  %v1824_v36 = vmul.f32 %v1819_v33, %v3935_v12 }
 0xe13   :  { %v1131_v30 = vsel %vm395_vm10, %v4437_v29, -inf }
 0xe14   :  { %1132 = vmax.xlane.f32.xlu2 %v1131_v30  ;;  %v1827_v39 = vadd.f32 1e-05, %v1824_v36 }
 0xe16   :  { %1883 = vmatpush.bf16.msra.mxu3 %v3981_v41  ;;  %3740 = vrsqrt.f32 %v1827_v39  ;;  %vm1845_vm3 = vweird.f32 %v1827_v39 }
 0xe18   :  { %v1121_v37 = vpop.f32.mrf.mxu0 }
 0xe19   :  { %v4443_v32 = vmul.f32 0.35355338, %v1121_v37  ;;  %3542 = vmatmul.msk.bf16.gmra.mxu3 %vm395_vm10, %v1351_v34 }
 0xe1b   :  { %v1134_v51 = vsel %vm395_vm10, %v4443_v32, -inf }
 0xe1c   :  { %1135 = vmax.xlane.f32.xlu1 %v1134_v51  ;;  %v3741_v57 = vpop.eup %3740 }
 0xe1d   :  { %v1840_v55 = vmul.f32 %v3741_v57, %v1827_v39  ;;  %vm1846_vm4 = vweird.f32 %v3741_v57 }
 0xe1e   :  { %vm1847_vm6 = vmor %vm1845_vm3, %vm1846_vm4 }
 0xe1f   :  { %v1841_v63 = vmul.f32 %v3741_v57, %v1840_v55 }
 0xe20   :  { %v1124_v48 = vpop.f32.mrf.mxu0 }
 0xe21   :  { %v4449_v45 = vmul.f32 0.35355338, %v1124_v48  ;;  %v1842_v46 = vmul.f32 0.5, %v1841_v63 }
 0xe23   :  { %v1137_v41 = vsel %vm402_vm11, %v4449_v45, -inf  ;;  %v1843_v53 = vsub.f32 1.5, %v1842_v46 }
 0xe24   :  { %1138 = vmax.xlane.f32.xlu2 %v1137_v41 }
 0xe25   :  { %v1844_v35 = vmul.f32 %v3741_v57, %v1843_v53 }
 0xe27   :  { %v1848_v7 = vsel %vm1847_vm6, %v3741_v57, %v1844_v35  ;;  %v3892_v57 = vld [vmem:[%s5373_s1 + $0x50] ss:$0 sm:$0xff] }
 0xe28   :  { %v1822_v27 = vpop.xlane.xlu1 %1821  ;;  %v1126_v49 = vpop.f32.mrf.mxu0 }
 0xe29   :  { %v1825_v58 = vmul.f32 %v1822_v27, %v3935_v12 }
 0xe2b   :  { %v1828_v62 = vadd.f32 1e-05, %v1825_v58 }
 0xe2d   :  { %3742 = vrsqrt.f32 %v1828_v62  ;;  %vm1855_vm14 = vweird.f32 %v1828_v62 }
 0xe30   :  { %v1816_v0 = vpop.xlane.xlu0 %1815 }
 0xe31   :  { %v1823_v43 = vmul.f32 %v1816_v0, %v3935_v12  ;;  %v1860_v12 = vmul.f32 %v1848_v7, %v4391_v9  ;;  %v3891_v9 = vld [vmem:[%s5373_s1 + $0x8] ss:$0 sm:$0xff] }
 0xe33   :  { %v1826_v60 = vadd.f32 1e-05, %v1823_v43  ;;  %v3743_v17 = vpop.eup %3742  ;;  %v1863_v56 = vmul.f32 %v3890_v18, %v1860_v12 }
 0xe34   :  { %v1850_v2 = vmul.f32 %v3743_v17, %v1828_v62  ;;  %vm1856_vm2 = vweird.f32 %v3743_v17 }
 0xe35   :  { %3744 = vrsqrt.f32 %v1826_v60  ;;  %vm1835_vm1 = vweird.f32 %v1826_v60  ;;  %v1866_v24 = vadd.f32 %v3891_v9, %v1863_v56  ;;  %vm1857_vm3 = vmor %vm1855_vm14, %vm1856_vm2 }
 0xe36   :  { %v1851_v59 = vmul.f32 %v3743_v17, %v1850_v2 }
 0xe38   :  { %v1852_v11 = vmul.f32 0.5, %v1851_v59 }
 0xe3a   :  { %v1853_v3 = vsub.f32 1.5, %v1852_v11 }
 0xe3b   :  { %v3745_v1 = vpop.eup %3744 }
 0xe3c   :  { %v1830_v5 = vmul.f32 %v3745_v1, %v1826_v60  ;;  %vm1836_vm7 = vweird.f32 %v3745_v1  ;;  %v1854_v61 = vmul.f32 %v3743_v17, %v1853_v3 }
 0xe3d   :  { %vm1837_vm8 = vmor %vm1835_vm1, %vm1836_vm7 }
 0xe3e   :  { %v1831_v6 = vmul.f32 %v3745_v1, %v1830_v5  ;;  %v1858_v26 = vsel %vm1857_vm3, %v3743_v17, %v1854_v61 }
 0xe3f   :  { %v1861_v31 = vmul.f32 %v1858_v26, %v4419_v38 }
 0xe40   :  { %v1832_v8 = vmul.f32 0.5, %v1831_v6 }
 0xe41   :  { %v1864_v52 = vmul.f32 %v3890_v18, %v1861_v31 }
 0xe42   :  { %v1833_v13 = vsub.f32 1.5, %v1832_v8 }
 0xe43   :  { %v1867_v20 = vadd.f32 %v3891_v9, %v1864_v52 }
 0xe44   :  { %v1834_v50 = vmul.f32 %v3745_v1, %v1833_v13 }
 0xe46   :  { %v1838_v42 = vsel %vm1837_vm8, %v3745_v1, %v1834_v50 }
 0xe47   :  { %v1859_v19 = vmul.f32 %v1838_v42, %v4423_v10  ;;  %v1869_v10 = vpack.c.bf16 %v1867_v20, %v1867_v20  ;;  %v1206_v20 = vpop.permute.xlu0 %1205 }
 0xe49   :  { %v1862_v21 = vmul.f32 %v3890_v18, %v1859_v19 }
 0xe4b   :  { %v1865_v16 = vadd.f32 %v3891_v9, %v1862_v21 }
 0xe4d   :  { %v1868_v23 = vpack.c.bf16 %v1866_v24, %v1865_v16 }
 0xe4f   :  { %3552 = vmatmul.msk.bf16.vlgmr.msra.gmra.mxu3 %vm39_vm0, %v1868_v23 }
 0xe5f   :  { %3553 = vmatmul.msk.bf16.gmra.mxu3 %vm39_vm0, %v1869_v10 }
 0xe87   :  { %v1133_v25 = vpop.xlane.xlu2 %1132 }
 0xe88   :  { %v1140_v28 = vsub.f32 %v4437_v29, %v1133_v25 }
 0xe8a   :  { %v1143_v30 = vmul.f32 1.442695, %v1140_v28 }
 0xe8c   :  { %3746 = vpow2.f32 %v1143_v30  ;;  %v1375_v44 = vpop.f32.mrf.mxu3 }
 0xe8f   :  { %v1136_v34 = vpop.xlane.xlu1 %1135 }
 0xe90   :  { %v1141_v33 = vsub.f32 %v4443_v32, %v1136_v34 }
 0xe92   :  { %v4468_v37 = vpop.eup %3746  ;;  %v1145_v36 = vmul.f32 1.442695, %v1141_v33 }
 0xe93   :  { %v1149_v38 = vsel %vm395_vm10, %v4468_v37, 0.0 }
 0xe94   :  { %3748 = vpow2.f32 %v1145_v36  ;;  %1150 = vadd.xlane.f32.xlu1 %v1149_v38  ;;  %v1377_v51 = vpop.f32.mrf.mxu3 }
 0xe95   :  { %v3607_v39 = vpack.i.bf16 %v1377_v51, %v1375_v44 }
 0xe97   :  { %v1139_v32 = vpop.xlane.xlu2 %1138 }
 0xe98   :  { %v1142_v55 = vsub.f32 %v4449_v45, %v1139_v32 }
 0xe9a   :  { %v4472_v48 = vpop.eup %3748  ;;  %v1147_v63 = vmul.f32 1.442695, %v1142_v55 }
 0xe9b   :  { %v1152_v29 = vsel %vm395_vm10, %v4472_v48, 0.0 }
 0xe9c   :  { %1153 = vadd.xlane.f32.xlu2 %v1152_v29  ;;  %v4476_v41 = vpop.f32.mrf.mxu3  ;;  %3750 = vpow2.f32 %v1147_v63 }
 0xea4   :  { %v1382_v27 = vpop.f32.mrf.mxu3 }
 0xead   :  { %1207 = vrot.lane.b32.xlu1 %v4359_v47, %s3904_s8  ;;  %v4486_v47 = vpop.eup %3750 }
 0xeae   :  { %v1155_v45 = vsel %vm402_vm11, %v4486_v47, 0.0 }
 0xed2   :  { %v1885_v49 = vpop.f32.mrf.mxu3 }
 0xed3   :  { %v1886_v58 = vadd.f32 %v3892_v57, %v1885_v49 }
 0xed5   :  { %v1894_v62 = vsel %vm153_vm12, %v1886_v58, 0.0 }
 0xed6   :  { %1895 = vadd.xlane.f32.xlu2 %v1894_v62 }
 0xeda   :  { %v1887_v0 = vpop.f32.mrf.mxu3 }
 0xedb   :  { %v1888_v43 = vadd.f32 %v3892_v57, %v1887_v0 }
 0xedd   :  { %v1897_v60 = vsel %vm153_vm12, %v1888_v43, 0.0 }
 0xede   :  { %1898 = vadd.xlane.f32.xlu2 %v1897_v60 }
 0xee2   :  { %v1890_v46 = vpop.f32.mrf.mxu3 }
 0xee3   :  { %v4488_v17 = vadd.f32 %v3892_v57, %v1890_v46 }
 0xee5   :  { %v1900_v53 = vsel %vm160_vm13, %v4488_v17, 0.0 }
 0xee6   :  { %1901 = vadd.xlane.f32.xlu0 %v1900_v53  ;;  %1156 = vadd.xlane.f32.xlu2 %v1155_v45 }
 0xeea   :  { %v1892_v2 = vpop.f32.mrf.mxu3 }
 0xefa   :  { %3608 = vrot.lane.b32.xlu0 %v3607_v39, %s3907_s10 }
 0xf07   :  { %v1151_v1 = vpop.xlane.xlu1 %1150 }
 0xf08   :  { %3752 = vrcp.f32 %v1151_v1  ;;  %vm1163_vm7 = vweird.f32 %v1151_v1  ;;  %v1169_v18 = vand.u32 2147483648, %v1151_v1  ;;  %v1167_v56 = vand.u32 2147483647, %v1151_v1 }
 0xf0a   :  { %v1170_v16 = vor.u32 1.1754944e-38, %v1169_v18  ;;  %vm1168_vm3 = vcmp.eq.f32.partialorder %v1167_v56, 8.507059e+37 }
 0xf0e   :  { %v3753_v35 = vpop.eup %3752 }
 0xf0f   :  { %v1159_v5 = vmul.f32 %v3753_v35, %v1151_v1  ;;  %v1154_v59 = vpop.xlane.xlu2 %1153  ;;  %vm1164_vm4 = vweird.f32 %v3753_v35  ;;  %v1399_v1 = vld [vmem:[%s5373_s1 + $0x180] sm:$0xff] }
 0xf10   :  { %3754 = vrcp.f32 %v1154_v59  ;;  %v1184_v12 = vand.u32 2147483648, %v1154_v59  ;;  %v1182_v42 = vand.u32 2147483647, %v1154_v59  ;;  %vm1165_vm1 = vmor %vm1163_vm7, %vm1164_vm4  ;;  %vm1178_vm8 = vweird.f32 %v1154_v59 }
 0xf11   :  { %v1160_v6 = vsub.f32 1.0, %v1159_v5 }
 0xf12   :  { %v1185_v21 = vor.u32 1.1754944e-38, %v1184_v12  ;;  %vm1183_vm2 = vcmp.eq.f32.partialorder %v1182_v42, 8.507059e+37 }
 0xf13   :  { %v1161_v8 = vmul.f32 %v3753_v35, %v1160_v6 }
 0xf15   :  { %v1162_v50 = vadd.f32 %v3753_v35, %v1161_v8 }
 0xf16   :  { %v3755_v7 = vpop.eup %3754 }
 0xf17   :  { %v1174_v11 = vmul.f32 %v3755_v7, %v1154_v59  ;;  %vm1179_vm6 = vweird.f32 %v3755_v7  ;;  %v1166_v61 = vsel %vm1165_vm1, %v3753_v35, %v1162_v50  ;;  %v1400_v35 = vld [vmem:[%s5373_s1 + $0x188] sm:$0xff] }
 0xf18   :  { %vm1180_vm14 = vmor %vm1178_vm8, %vm1179_vm6  ;;  %v1171_v31 = vsel %vm1168_vm3, %v1170_v16, %v1166_v61  ;;  %v1403_v5 = vpack.c.bf16 %v1400_v35, %v1399_v1 }
 0xf19   :  { %v1175_v13 = vsub.f32 1.0, %v1174_v11  ;;  %v1172_v10 = vmul.f32 %v4468_v37, %v1171_v31 }
 0xf1a   :  { %1417 = vmatpush.bf16.msra.mxu0 %v1403_v5 }
 0xf1b   :  { %v1176_v3 = vmul.f32 %v3755_v7, %v1175_v13 }
 0xf1d   :  { %v1177_v19 = vadd.f32 %v3755_v7, %v1176_v3 }
 0xf1f   :  { %v1181_v9 = vsel %vm1180_vm14, %v3755_v7, %v1177_v19  ;;  %v1208_v24 = vpop.permute.xlu1 %1207 }
 0xf20   :  { %v1186_v23 = vsel %vm1183_vm2, %v1185_v21, %v1181_v9  ;;  %v1217_v26 = vand.u32 %v1208_v24, %v4132_v54 }
 0xf21   :  { %v1187_v52 = vmul.f32 %v4472_v48, %v1186_v23 }
 0xf22   :  { %1225 = vmatpush.bf16.msrb.mxu2 %v1217_v26 }
 0xf23   :  { %v1203_v25 = vpack.c.bf16 %v1187_v52, %v1172_v10 }
 0xf26   :  { %1226 = vmatpush.bf16.msrb.mxu2 %v1206_v20 }
 0xf29   :  { %3537 = vmatmul.msk.bf16.vlgmr.msrb.gmra.mxu2 %vm395_vm10, %v1203_v25 }
 0xf49   :  { %v1896_v28 = vpop.xlane.xlu2 %1895 }
 0xf4a   :  { %v1903_v30 = vmul.f32 %v1896_v28, %v4001_v40 }
 0xf4c   :  { %v4500_v44 = vsub.f32 %v1886_v58, %v1903_v30 }
 0xf4e   :  { %v1909_v34 = vmul.f32 %v4500_v44, %v4500_v44 }
 0xf50   :  { %v1912_v33 = vsel %vm153_vm12, %v1909_v34, 0.0 }
 0xf51   :  { %1913 = vadd.xlane.f32.xlu1 %v1912_v33  ;;  %v1899_v36 = vpop.xlane.xlu2 %1898  ;;  %v3893_v33 = vld [vmem:[%s5373_s1 + $0x58] ss:$0 sm:$0xff] }
 0xf52   :  { %v1904_v38 = vmul.f32 %v1899_v36, %v4001_v40 }
 0xf54   :  { %v4506_v51 = vsub.f32 %v1888_v43, %v1904_v38 }
 0xf56   :  { %v1910_v37 = vmul.f32 %v4506_v51, %v4506_v51 }
 0xf58   :  { %v1915_v39 = vsel %vm153_vm12, %v1910_v37, 0.0 }
 0xf59   :  { %1916 = vadd.xlane.f32.xlu2 %v1915_v39  ;;  %v1157_v48 = vpop.xlane.xlu2 %1156  ;;  %v1902_v29 = vpop.xlane.xlu0 %1901  ;;  %v3894_v39 = vld [vmem:[%s5373_s1 + $0x60] ss:$0 sm:$0xff] }
 0xf5a   :  { %3756 = vrcp.f32 %v1157_v48  ;;  %v1905_v27 = vmul.f32 %v1902_v29, %v4001_v40  ;;  %v1199_v63 = vand.u32 2147483648, %v1157_v48  ;;  %v1197_v43 = vand.u32 2147483647, %v1157_v48 }
 0xf5b   :  { %vm1193_vm6 = vweird.f32 %v1157_v48 }
 0xf5c   :  { %v4513_v32 = vsub.f32 %v4488_v17, %v1905_v27  ;;  %v1200_v46 = vor.u32 1.1754944e-38, %v1199_v63  ;;  %vm1198_vm1 = vcmp.eq.f32.partialorder %v1197_v43, 8.507059e+37 }
 0xf5e   :  { %v1911_v49 = vmul.f32 %v4513_v32, %v4513_v32 }
 0xf60   :  { %v3757_v57 = vpop.eup %3756  ;;  %v1918_v58 = vsel %vm160_vm13, %v1911_v49, 0.0 }
 0xf61   :  { %v1189_v55 = vmul.f32 %v3757_v57, %v1157_v48  ;;  %1919 = vadd.xlane.f32.xlu2 %v1918_v58  ;;  %vm1194_vm4 = vweird.f32 %v3757_v57 }
 0xf62   :  { %vm1195_vm7 = vmor %vm1193_vm6, %vm1194_vm4 }
 0xf63   :  { %v1190_v62 = vsub.f32 1.0, %v1189_v55  ;;  %v3896_v55 = vld [vmem:[%s5373_s1 + $0x70] sm:$0xff] }
 0xf65   :  { %v1191_v0 = vmul.f32 %v3757_v57, %v1190_v62 }
 0xf67   :  { %v1192_v60 = vadd.f32 %v3757_v57, %v1191_v0 }
 0xf69   :  { %v1196_v53 = vsel %vm1195_vm7, %v3757_v57, %v1192_v60 }
 0xf6a   :  { %v1201_v17 = vsel %vm1198_vm1, %v1200_v46, %v1196_v53 }
 0xf6b   :  { %v1202_v45 = vmul.f32 %v4486_v47, %v1201_v17  ;;  %v3897_v17 = vld [vmem:[%s5373_s1 + $0x78] sm:$0xff] }
 0xf6c   :  { %v3609_v6 = vpop.permute.xlu0 %3608 }
 0xf6d   :  { %v1204_v2 = vpack.c.bf16 %v1202_v45, %v1202_v45  ;;  %v3611_v7 = vunpack.i.h.bf16 %v3609_v6  ;;  %v3610_v8 = vunpack.i.l.bf16 %v3609_v6 }
 0xf6f   :  { %3538 = vmatmul.msk.bf16.gmra.mxu2 %vm395_vm10, %v1204_v2 }
 0xfac   :  { %v1228_v59 = vpop.f32.mrf.mxu2 }
 0xfad   :  { %v1396_v47 = vsel %vm361_vm9, %v1228_v59, %v3610_v8  ;;  %v3898_v59 = vld [vmem:[%s5373_s1 + $0x80] sm:$0x1] }
 0xfb4   :  { %v1230_v11 = vpop.f32.mrf.mxu2 }
 0xfb5   :  { %v1397_v13 = vsel %vm361_vm9, %v1230_v11, %v3611_v7 }
 0xfb6   :  { %v1401_v12 = vpack.c.bf16 %v1397_v13, %v1396_v47  ;;  %v4570_v13 = vld [vmem:[%s5373_s1 + $0x190] ss:$0 sm:$0xff] }
 0xfb8   :  { %3543 = vmatmul.msk.bf16.vlgmr.msra.gmra.mxu0 %vm673_vm15, %v1401_v12 }
 0xfc4   :  { %v1914_v50 = vpop.xlane.xlu1 %1913 }
 0xfc5   :  { %v1921_v3 = vmul.f32 %v1914_v50, %v4001_v40 }
 0xfc7   :  { %v1924_v42 = vadd.f32 1e-05, %v1921_v3 }
 0xfc9   :  { %3758 = vrsqrt.f32 %v1924_v42  ;;  %vm1933_vm14 = vweird.f32 %v1924_v42 }
 0xfcc   :  { %v1917_v18 = vpop.xlane.xlu2 %1916 }
 0xfcd   :  { %v1922_v56 = vmul.f32 %v1917_v18, %v4001_v40 }
 0xfcf   :  { %v3759_v19 = vpop.eup %3758  ;;  %v1925_v21 = vadd.f32 1e-05, %v1922_v56 }
 0xfd0   :  { %v1928_v61 = vmul.f32 %v3759_v19, %v1924_v42  ;;  %vm1934_vm8 = vweird.f32 %v3759_v19 }
 0xfd1   :  { %3760 = vrsqrt.f32 %v1925_v21  ;;  %vm1935_vm2 = vmor %vm1933_vm14, %vm1934_vm8  ;;  %vm1943_vm4 = vweird.f32 %v1925_v21 }
 0xfd2   :  { %v1929_v9 = vmul.f32 %v3759_v19, %v1928_v61 }
 0xfd4   :  { %v1930_v24 = vmul.f32 0.5, %v1929_v9  ;;  %v1920_v16 = vpop.xlane.xlu2 %1919 }
 0xfd5   :  { %v1923_v23 = vmul.f32 %v1920_v16, %v4001_v40 }
 0xfd6   :  { %v1931_v26 = vsub.f32 1.5, %v1930_v24 }
 0xfd7   :  { %v3761_v31 = vpop.eup %3760  ;;  %v1926_v52 = vadd.f32 1e-05, %v1923_v23 }
 0xfd8   :  { %v1932_v20 = vmul.f32 %v3759_v19, %v1931_v26  ;;  %v1938_v10 = vmul.f32 %v3761_v31, %v1925_v21  ;;  %vm1944_vm3 = vweird.f32 %v3761_v31 }
 0xfd9   :  { %3762 = vrsqrt.f32 %v1926_v52  ;;  %vm1945_vm6 = vmor %vm1943_vm4, %vm1944_vm3 }
 0xfda   :  { %v1936_v25 = vsel %vm1935_vm2, %v3759_v19, %v1932_v20  ;;  %v1939_v28 = vmul.f32 %v3761_v31, %v1938_v10 }
 0xfdb   :  { %v1957_v30 = vmul.f32 %v1936_v25, %v4500_v44  ;;  %v3895_v44 = vld [vmem:[%s5373_s1 + $0x68] ss:$0 sm:$0xff] }
 0xfdc   :  { %v1940_v34 = vmul.f32 0.5, %v1939_v28 }
 0xfdd   :  { %v1960_v36 = vmul.f32 %v3893_v33, %v1957_v30  ;;  %v2050_v30 = vld [vmem:[%s5373_s1 + $0xa8] sm:$0xff] }
 0xfde   :  { %v1941_v38 = vsub.f32 1.5, %v1940_v34 }
 0xfdf   :  { %v3763_v37 = vpop.eup %3762  ;;  %v1963_v48 = vadd.f32 %v3894_v39, %v1960_v36 }
 0xfe0   :  { %v1942_v29 = vmul.f32 %v3761_v31, %v1941_v38  ;;  %v1948_v27 = vmul.f32 %v3763_v37, %v1926_v52  ;;  %vm1954_vm7 = vweird.f32 %v3763_v37  ;;  %v2048_v38 = vld [vmem:[%s5373_s1 + $0x98] sm:$0xff] }
 0xfe1   :  { %v1966_v49 = vsel %vm236_vm5, %v3895_v44, %v1963_v48  ;;  %vm1953_vm5 = vweird.f32 %v1926_v52 }
 0xfe2   :  { %v1946_v57 = vsel %vm1945_vm6, %v3761_v31, %v1942_v29  ;;  %v1949_v58 = vmul.f32 %v3763_v37, %v1948_v27  ;;  %v4547_v62 = vadd.f32 %v3896_v55, %v1966_v49  ;;  %vm1955_vm1 = vmor %vm1953_vm5, %vm1954_vm7 }
 0xfe3   :  { %v1958_v63 = vmul.f32 %v1946_v57, %v4506_v51 }
 0xfe4   :  { %v1950_v0 = vmul.f32 0.5, %v1949_v58  ;;  %v1974_v43 = vsel %vm153_vm12, %v4547_v62, 0.0 }
 0xfe5   :  { %1975 = vadd.xlane.f32.xlu2 %v1974_v43  ;;  %v1961_v60 = vmul.f32 %v3893_v33, %v1958_v63 }
 0xfe6   :  { %v1951_v46 = vsub.f32 1.5, %v1950_v0 }
 0xfe7   :  { %v1964_v15 = vadd.f32 %v3894_v39, %v1961_v60 }
 0xfe8   :  { %v1952_v53 = vmul.f32 %v3763_v37, %v1951_v46 }
 0xfe9   :  { %v4555_v45 = vadd.f32 %v3897_v17, %v1964_v15 }
 0xfea   :  { %v1956_v2 = vsel %vm1955_vm1, %v3763_v37, %v1952_v53 }
 0xfeb   :  { %v1959_v51 = vmul.f32 %v1956_v2, %v4513_v32  ;;  %v1977_v1 = vsel %vm153_vm12, %v4555_v45, 0.0 }
 0xfed   :  { %1978 = vadd.xlane.f32.xlu2 %v1977_v1  ;;  %v1962_v35 = vmul.f32 %v3893_v33, %v1959_v51 }
 0xfef   :  { %v1965_v5 = vadd.f32 %v3894_v39, %v1962_v35 }
 0xff1   :  { %v4563_v6 = vadd.f32 %v3898_v59, %v1965_v5 }
 0xff2   :  { %v1233_v7 = vpop.f32.mrf.mxu2 }
 0xff3   :  { %v1980_v8 = vsel %vm160_vm13, %v4563_v6, 0.0 }
 0xff5   :  { %1981 = vadd.xlane.f32.xlu2 %v1980_v8 }
 0xffa   :  { %v1235_v11 = vpop.f32.mrf.mxu2 }
 0xffb   :  { %v3638_v11 = vld [vmem:[%s5373_s1 + $0x88] ss:$0 sm:$0xff] }
0x1035   :  { %v1419_v47 = vpop.f32.mrf.mxu0 }
0x1036   :  { %v1428_v20 = vadd.f32 %v1419_v47, %v4302_v14  ;;  %v2051_v14 = vld [vmem:[%s5373_s1 + $0xb0] sm:$0xff] }
0x1037   :  { %v2055_v34 = vpack.c.bf16 %v2051_v14, %v2050_v30 }
0x1038   :  { %v4601_v25 = vadd.f32 %v4570_v13, %v1428_v20 }
0x1039   :  { %2068 = vmatpush.bf16.msrb.mxu0 %v2055_v34 }
0x103a   :  { %v1438_v28 = vsel %vm153_vm12, %v4601_v25, 0.0 }
0x103d   :  { %v1421_v32 = vpop.f32.mrf.mxu0 }
0x103e   :  { %v1429_v12 = vadd.f32 %v1421_v32, %v4307_v4 }
0x1040   :  { %v4574_v50 = vadd.f32 %v4570_v13, %v1429_v12 }
0x1042   :  { %v1441_v3 = vsel %vm153_vm12, %v4574_v50, 0.0 }
0x1043   :  { %1442 = vadd.xlane.f32.xlu0 %v1441_v3 }
0x1058   :  { %v1976_v42 = vpop.xlane.xlu2 %1975 }
0x1059   :  { %v1983_v18 = vmul.f32 %v1976_v42, %v4001_v40 }
0x105b   :  { %v4580_v56 = vsub.f32 %v4547_v62, %v1983_v18 }
0x105d   :  { %v1989_v19 = vmul.f32 %v4580_v56, %v4580_v56 }
0x105f   :  { %v1992_v21 = vsel %vm153_vm12, %v1989_v19, 0.0 }
0x1060   :  { %1993 = vadd.xlane.f32.xlu2 %v1992_v21  ;;  %v1979_v4 = vpop.xlane.xlu2 %1978  ;;  %v3639_v21 = vld [vmem:[%s5373_s1 + $0x90] ss:$0 sm:$0xff] }
0x1061   :  { %v1984_v61 = vmul.f32 %v1979_v4, %v4001_v40 }
0x1063   :  { %v4587_v9 = vsub.f32 %v4555_v45, %v1984_v61 }
0x1065   :  { %v1990_v24 = vmul.f32 %v4587_v9, %v4587_v9 }
0x1067   :  { %v1995_v16 = vsel %vm153_vm12, %v1990_v24, 0.0 }
0x1068   :  { %1996 = vadd.xlane.f32.xlu1 %v1995_v16  ;;  %v1982_v23 = vpop.xlane.xlu2 %1981 }
0x1069   :  { %v1985_v26 = vmul.f32 %v1982_v23, %v4001_v40 }
0x106b   :  { %v4594_v31 = vsub.f32 %v4563_v6, %v1985_v26 }
0x106d   :  { %v1991_v52 = vmul.f32 %v4594_v31, %v4594_v31 }
0x106f   :  { %v1998_v10 = vsel %vm160_vm13, %v1991_v52, 0.0 }
0x1070   :  { %1999 = vadd.xlane.f32.xlu1 %v1998_v10 }
0x1078   :  { %1391 = vrot.lane.b32.xlu2 %v4476_v41, %s3907_s10  ;;  %1439 = vadd.xlane.f32.xlu1 %v1438_v28  ;;  %v2049_v41 = vld [vmem:[%s5373_s1 + $0xa0] sm:$0xff] }
0x1079   :  { %v2054_v39 = vpack.c.bf16 %v2049_v41, %v2048_v38 }
0x107b   :  { %2069 = vmatpush.bf16.msrb.mxu0 %v2054_v39 }
0x10d3   :  { %v1994_v33 = vpop.xlane.xlu2 %1993 }
0x10d4   :  { %v2001_v36 = vmul.f32 %v1994_v33, %v4001_v40  ;;  %v1443_v33 = vpop.xlane.xlu0 %1442 }
0x10d5   :  { %v1448_v38 = vmul.f32 %v1443_v33, %v4001_v40 }
0x10d6   :  { %v2004_v37 = vadd.f32 1e-05, %v2001_v36 }
0x10d7   :  { %v4648_v39 = vsub.f32 %v4574_v50, %v1448_v38 }
0x10d8   :  { %3764 = vrsqrt.f32 %v2004_v37  ;;  %vm2013_vm14 = vweird.f32 %v2004_v37 }
0x10db   :  { %v1997_v48 = vpop.xlane.xlu1 %1996  ;;  %v1392_v29 = vpop.permute.xlu2 %1391 }
0x10dc   :  { %v2002_v27 = vmul.f32 %v1997_v48, %v4001_v40  ;;  %v1398_v44 = vsel %vm361_vm9, %v1233_v7, %v1392_v29  ;;  %v1454_v29 = vmul.f32 %v4648_v39, %v4648_v39 }
0x10dd   :  { %v1402_v49 = vpack.c.bf16 %v1398_v44, %v1398_v44 }
0x10de   :  { %v3765_v57 = vpop.eup %3764  ;;  %v2005_v58 = vadd.f32 1e-05, %v2002_v27  ;;  %v1459_v27 = vsel %vm153_vm12, %v1454_v29, 0.0 }
0x10df   :  { %v2008_v55 = vmul.f32 %v3765_v57, %v2004_v37  ;;  %3544 = vmatmul.msk.bf16.gmra.mxu0 %vm673_vm15, %v1402_v49  ;;  %vm2014_vm8 = vweird.f32 %v3765_v57 }
0x10e0   :  { %3766 = vrsqrt.f32 %v2005_v58  ;;  %vm2015_vm2 = vmor %vm2013_vm14, %vm2014_vm8  ;;  %vm2023_vm4 = vweird.f32 %v2005_v58 }
0x10e1   :  { %v2009_v63 = vmul.f32 %v3765_v57, %v2008_v55  ;;  %v1514_v55 = vld [vmem:[%s5373_s1 + $0x1b8] sm:$0xff] }
0x10e3   :  { %v2010_v0 = vmul.f32 0.5, %v2009_v63  ;;  %v2000_v43 = vpop.xlane.xlu1 %1999  ;;  %v1515_v63 = vld [vmem:[%s5373_s1 + $0x1c0] sm:$0xff] }
0x10e4   :  { %v2003_v60 = vmul.f32 %v2000_v43, %v4001_v40  ;;  %v1512_v43 = vld [vmem:[%s5373_s1 + $0x1a8] sm:$0xff] }
0x10e5   :  { %v2011_v46 = vsub.f32 1.5, %v2010_v0  ;;  %v1519_v0 = vpack.c.bf16 %v1515_v63, %v1514_v55 }
0x10e6   :  { %v3767_v15 = vpop.eup %3766  ;;  %v2006_v53 = vadd.f32 1e-05, %v2003_v60  ;;  %v1513_v60 = vld [vmem:[%s5373_s1 + $0x1b0] sm:$0xff] }
0x10e7   :  { %v2012_v17 = vmul.f32 %v3765_v57, %v2011_v46  ;;  %v2018_v2 = vmul.f32 %v3767_v15, %v2005_v58  ;;  %vm2024_vm3 = vweird.f32 %v3767_v15  ;;  %1534 = vmatpush.bf16.msra.mxu2 %v1519_v0  ;;  %v1518_v46 = vpack.c.bf16 %v1513_v60, %v1512_v43 }
0x10e8   :  { %3768 = vrsqrt.f32 %v2006_v53  ;;  %vm2025_vm6 = vmor %vm2023_vm4, %vm2024_vm3  ;;  %vm2033_vm5 = vweird.f32 %v2006_v53 }
0x10e9   :  { %v2019_v51 = vmul.f32 %v3767_v15, %v2018_v2  ;;  %v2016_v1 = vsel %vm2015_vm2, %v3765_v57, %v2012_v17 }
0x10ea   :  { %v2037_v47 = vmul.f32 %v2016_v1, %v4580_v56 }
0x10eb   :  { %v2020_v35 = vmul.f32 0.5, %v2019_v51  ;;  %v1440_v5 = vpop.xlane.xlu1 %1439  ;;  %1535 = vmatpush.bf16.msra.mxu2 %v1518_v46 }
0x10ec   :  { %v1447_v59 = vmul.f32 %v1440_v5, %v4001_v40  ;;  %v2041_v4 = vmul.f32 %v3638_v11, %v2037_v47 }
0x10ed   :  { %v2021_v7 = vsub.f32 1.5, %v2020_v35 }
0x10ee   :  { %v3769_v8 = vpop.eup %3768  ;;  %v4630_v32 = vsub.f32 %v4601_v25, %v1447_v59  ;;  %v2045_v26 = vadd.f32 %v3639_v21, %v2041_v4 }
0x10ef   :  { %v2022_v12 = vmul.f32 %v3767_v15, %v2021_v7  ;;  %v2028_v3 = vmul.f32 %v3769_v8, %v2006_v53  ;;  %vm2034_vm7 = vweird.f32 %v3769_v8 }
0x10f0   :  { %v1453_v42 = vmul.f32 %v4630_v32, %v4630_v32  ;;  %vm2035_vm1 = vmor %vm2033_vm5, %vm2034_vm7 }
0x10f1   :  { %v2026_v18 = vsel %vm2025_vm6, %v3767_v15, %v2022_v12  ;;  %v2029_v19 = vmul.f32 %v3769_v8, %v2028_v3 }
0x10f2   :  { %v2038_v61 = vmul.f32 %v2026_v18, %v4587_v9  ;;  %v1456_v56 = vsel %vm153_vm12, %v1453_v42, 0.0 }
0x10f3   :  { %v2030_v24 = vmul.f32 0.5, %v2029_v19  ;;  %1457 = vadd.xlane.f32.xlu2 %v1456_v56 }
0x10f4   :  { %v2042_v16 = vmul.f32 %v3638_v11, %v2038_v61 }
0x10f5   :  { %v2031_v23 = vsub.f32 1.5, %v2030_v24 }
0x10f6   :  { %v2046_v52 = vadd.f32 %v3639_v21, %v2042_v16 }
0x10f7   :  { %v2032_v20 = vmul.f32 %v3769_v8, %v2031_v23 }
0x10f8   :  { %v2052_v10 = vpack.c.bf16 %v2046_v52, %v2045_v26  ;;  %v3640_v26 = vld [vmem:[%s5373_s1 + $0x198] ss:$0 sm:$0xff] }
0x10f9   :  { %v2036_v28 = vsel %vm2035_vm1, %v3769_v8, %v2032_v20 }
0x10fa   :  { %3554 = vmatmul.msk.bf16.vlgmr.msrb.gmra.mxu0 %vm153_vm12, %v2052_v10  ;;  %v2039_v30 = vmul.f32 %v2036_v28, %v4594_v31  ;;  %v3641_v28 = vld [vmem:[%s5373_s1 + $0x1a0] ss:$0 sm:$0xff] }
0x10fc   :  { %v2043_v14 = vmul.f32 %v3638_v11, %v2039_v30 }
0x10fe   :  { %v2047_v9 = vadd.f32 %v3639_v21, %v2043_v14 }
0x1100   :  { %v2053_v34 = vpack.c.bf16 %v2047_v9, %v2047_v9 }
0x110a   :  { %3555 = vmatmul.msk.bf16.gmra.mxu0 %vm153_vm12, %v2053_v34 }
0x115c   :  { %v1424_v36 = vpop.f32.mrf.mxu0 }
0x115d   :  { %v1430_v41 = vadd.f32 %v1424_v36, %v4312_v22 }
0x115f   :  { %v4645_v37 = vadd.f32 %v4570_v13, %v1430_v41 }
0x1161   :  { %v1444_v31 = vsel %vm160_vm13, %v4645_v37, 0.0 }
0x1162   :  { %1445 = vadd.xlane.f32.xlu1 %v1444_v31 }
0x1164   :  { %v1426_v48 = vpop.f32.mrf.mxu0 }
0x1166   :  { %v1458_v15 = vpop.xlane.xlu2 %1457 }
0x1167   :  { %v1465_v53 = vmul.f32 %v1458_v15, %v4001_v40 }
0x1169   :  { %v1468_v17 = vadd.f32 1e-05, %v1465_v53 }
0x116a   :  { %1460 = vadd.xlane.f32.xlu1 %v1459_v27 }
0x116b   :  { %3770 = vrsqrt.f32 %v1468_v17  ;;  %vm1477_vm14 = vweird.f32 %v1468_v17 }
0x1171   :  { %v3771_v51 = vpop.eup %3770 }
0x1172   :  { %v1472_v5 = vmul.f32 %v3771_v51, %v1468_v17  ;;  %vm1478_vm8 = vweird.f32 %v3771_v51 }
0x1173   :  { %vm1479_vm2 = vmor %vm1477_vm14, %vm1478_vm8 }
0x1174   :  { %v1473_v8 = vmul.f32 %v3771_v51, %v1472_v5 }
0x1176   :  { %v1474_v3 = vmul.f32 0.5, %v1473_v8 }
0x1177   :  { %v2071_v44 = vpop.f32.mrf.mxu0 }
0x1178   :  { %v1475_v18 = vsub.f32 1.5, %v1474_v3 }
0x117a   :  { %v1476_v4 = vmul.f32 %v3771_v51, %v1475_v18 }
0x117c   :  { %v1480_v24 = vsel %vm1479_vm2, %v3771_v51, %v1476_v4  ;;  %v4713_v51 = vld [vmem:[%s5373_s1 + $0x1c8] ss:$0 sm:$0xff]  ;;  %v1672_v4 = vld [vmem:[%s5373_s1 + $0x200] sm:$0xff] }
0x117d   :  { %v1501_v52 = vmul.f32 %v1480_v24, %v4630_v32 }
0x117f   :  { %v2073_v49 = vpop.f32.mrf.mxu0  ;;  %v1505_v30 = vmul.f32 %v3640_v26, %v1501_v52  ;;  %v1670_v52 = vld [vmem:[%s5373_s1 + $0x1f0] sm:$0xff] }
0x1180   :  { %v4661_v58 = vpack.c.bf16 %v2073_v49, %v2071_v44 }
0x1181   :  { %v1509_v34 = vadd.f32 %v3641_v28, %v1505_v30 }
0x1187   :  { %v2076_v22 = vpop.f32.mrf.mxu0 }
0x1188   :  { %v4655_v57 = vpack.c.bf16 %v2076_v22, %v2076_v22 }
0x118a   :  { %2086 = vrot.lane.b32.xlu2 %v4655_v57, %s3901_s5  ;;  %2233 = vrot.lane.b32.xlu1 %v4655_v57, %s3902_s6 }
0x118f   :  { %v2078_v13 = vpop.f32.mrf.mxu0 }
0x1192   :  { %2231 = vrot.lane.b32.xlu1 %v4661_v58, %s3902_s6 }
0x119a   :  { %2084 = vrot.lane.b32.xlu1 %v4661_v58, %s3901_s5 }
0x11a2   :  { %2229 = vrot.lane.b32.xlu1 %v4655_v57, %s3903_s7 }
0x11d5   :  { %v1446_v2 = vpop.xlane.xlu1 %1445 }
0x11d6   :  { %v1449_v1 = vmul.f32 %v1446_v2, %v4001_v40 }
0x11d8   :  { %v4684_v35 = vsub.f32 %v4645_v37, %v1449_v1 }
0x11da   :  { %v1455_v59 = vmul.f32 %v4684_v35, %v4684_v35 }
0x11dc   :  { %v1462_v7 = vsel %vm160_vm13, %v1455_v59, 0.0 }
0x11dd   :  { %1463 = vadd.xlane.f32.xlu0 %v1462_v7  ;;  %v1461_v11 = vpop.xlane.xlu1 %1460 }
0x11de   :  { %v1466_v47 = vmul.f32 %v1461_v11, %v4001_v40 }
0x11e0   :  { %v1469_v12 = vadd.f32 1e-05, %v1466_v47 }
0x11e2   :  { %3772 = vrsqrt.f32 %v1469_v12  ;;  %vm1487_vm4 = vweird.f32 %v1469_v12 }
0x11e4   :  { %v2087_v42 = vpop.permute.xlu2 %2086 }
0x11e5   :  { %v2098_v19 = vsel %vm361_vm9, %v2087_v42, 0 }
0x11e6   :  { %2106 = vmatpush.bf16.xpose.msrb.mxu2 %v2098_v19 }
0x11e8   :  { %v3773_v21 = vpop.eup %3772 }
0x11e9   :  { %v1482_v61 = vmul.f32 %v3773_v21, %v1469_v12  ;;  %vm1488_vm3 = vweird.f32 %v3773_v21 }
0x11ea   :  { %vm1489_vm6 = vmor %vm1487_vm4, %vm1488_vm3 }
0x11eb   :  { %v1483_v56 = vmul.f32 %v3773_v21, %v1482_v61  ;;  %v1673_v61 = vld [vmem:[%s5373_s1 + $0x208] sm:$0xff] }
0x11ed   :  { %v1484_v16 = vmul.f32 0.5, %v1483_v56 }
0x11ef   :  { %v1485_v23 = vsub.f32 1.5, %v1484_v16  ;;  %v1679_v16 = vpack.c.bf16 %v1673_v61, %v1672_v4 }
0x11f1   :  { %v1486_v20 = vmul.f32 %v3773_v21, %v1485_v23  ;;  %2227 = vrot.lane.b32.xlu0 %v4661_v58, %s3903_s7  ;;  %1690 = vmatpush.bf16.msra.mxu1 %v1679_v16 }
0x11f3   :  { %v1490_v10 = vsel %vm1489_vm6, %v3773_v21, %v1486_v20  ;;  %v1671_v20 = vld [vmem:[%s5373_s1 + $0x1f8] sm:$0xff] }
0x11f4   :  { %v1502_v14 = vmul.f32 %v1490_v10, %v4648_v39 }
0x11f6   :  { %v1506_v9 = vmul.f32 %v3640_v26, %v1502_v14 }
0x11f8   :  { %v1510_v33 = vadd.f32 %v3641_v28, %v1506_v9 }
0x11fa   :  { %v1516_v36 = vpack.c.bf16 %v1510_v33, %v1509_v34 }
0x11fc   :  { %3545 = vmatmul.msk.bf16.vlgmr.msra.gmra.mxu2 %vm153_vm12, %v1516_v36  ;;  %v2234_v32 = vpop.permute.xlu1 %2233 }
0x11fd   :  { %v2245_v38 = vsel %vm361_vm9, %v2234_v32, 0  ;;  %v1668_v32 = vld [vmem:[%s5373_s1 + $0x1e0] sm:$0xff] }
0x11fe   :  { %2253 = vmatpush.bf16.xpose.msrb.mxu3 %v2245_v38  ;;  %v1669_v38 = vld [vmem:[%s5373_s1 + $0x1e8] sm:$0xff] }
0x1204   :  { %v2232_v41 = vpop.permute.xlu1 %2231 }
0x1205   :  { %v2242_v31 = vsel %vm361_vm9, %v2232_v41, 0 }
0x1206   :  { %2254 = vmatpush.bf16.xpose.msrb.mxu3 %v2242_v31  ;;  %v1677_v31 = vpack.c.bf16 %v1669_v38, %v1668_v32 }
0x120c   :  { %v2085_v48 = vpop.permute.xlu1 %2084 }
0x120d   :  { %v2095_v29 = vsel %vm361_vm9, %v2085_v48, 0 }
0x120e   :  { %2107 = vmatpush.bf16.xpose.msrb.mxu2 %v2095_v29 }
0x1214   :  { %v2230_v2 = vpop.permute.xlu1 %2229 }
0x1250   :  { %v1464_v27 = vpop.xlane.xlu0 %1463 }
0x1251   :  { %v1467_v39 = vmul.f32 %v1464_v27, %v4001_v40 }
0x1253   :  { %v1470_v44 = vadd.f32 1e-05, %v1467_v39 }
0x1255   :  { %3774 = vrsqrt.f32 %v1470_v44  ;;  %vm1497_vm5 = vweird.f32 %v1470_v44 }
0x125b   :  { %v3775_v49 = vpop.eup %3774 }
0x125c   :  { %v1492_v22 = vmul.f32 %v3775_v49, %v1470_v44  ;;  %vm1498_vm7 = vweird.f32 %v3775_v49 }
0x125d   :  { %vm1499_vm1 = vmor %vm1497_vm5, %vm1498_vm7 }
0x125e   :  { %v1493_v13 = vmul.f32 %v3775_v49, %v1492_v22  ;;  %v1666_v22 = vld [vmem:[%s5373_s1 + $0x1d0] sm:$0xff] }
0x1260   :  { %v1494_v55 = vmul.f32 0.5, %v1493_v13  ;;  %v1667_v13 = vld [vmem:[%s5373_s1 + $0x1d8] sm:$0xff] }
0x1262   :  { %v1495_v63 = vsub.f32 1.5, %v1494_v55 }
0x1263   :  { %v2228_v0 = vpop.permute.xlu0 %2227 }
0x1264   :  { %v1496_v43 = vmul.f32 %v3775_v49, %v1495_v63  ;;  %3560 = vmatmul.msk.bf16.vlgmr.msrb.gmra.mxu3 %vm361_vm9, %v2228_v0  ;;  %v1676_v63 = vpack.c.bf16 %v1667_v13, %v1666_v22 }
0x1266   :  { %v1500_v60 = vsel %vm1499_vm1, %v3775_v49, %v1496_v43 }
0x1267   :  { %v1503_v46 = vmul.f32 %v1500_v60, %v4684_v35 }
0x1269   :  { %v1507_v15 = vmul.f32 %v3640_v26, %v1503_v46 }
0x126b   :  { %v1511_v53 = vadd.f32 %v3641_v28, %v1507_v15  ;;  %v1678_v28 = vpack.c.bf16 %v1671_v20, %v1670_v52 }
0x126d   :  { %v1517_v17 = vpack.c.bf16 %v1511_v53, %v1511_v53  ;;  %1691 = vmatpush.bf16.msra.mxu1 %v1678_v28 }
0x126f   :  { %3546 = vmatmul.msk.bf16.gmra.mxu2 %vm153_vm12, %v1517_v17 }
0x1271   :  { %1692 = vmatpush.bf16.msra.mxu1 %v1677_v31 }
0x1274   :  { %3561 = vmatmul.msk.bf16.gmra.mxu3 %vm361_vm9, %v2230_v2 }
0x1275   :  { %1693 = vmatpush.bf16.msra.mxu1 %v1676_v63 }
0x127f   :  { %v1537_v1 = vpop.f32.mrf.mxu2  ;;  %3556 = vmatmul.msk.bf16.vlgmr.msrb.gmra.mxu2 %vm361_vm9, %v4661_v58 }
0x1280   :  { %v4718_v5 = vadd.f32 %v4713_v51, %v1537_v1 }
0x1282   :  { %v4721_v35 = vmul.f32 0.70710677, %v4718_v5 }
0x1284   :  { %v1552_v59 = vand.u32 2147483647, %v4721_v35  ;;  %vm1651_vm1 = vcmp.ge.f32.partialorder %v4721_v35, 0.0 }
0x1286   :  { %v1555_v7 = vmul.f32 0.3275911, %v1552_v59  ;;  %v1633_v33 = vsub.f32 0.0, %v1552_v59 }
0x1287   :  { %v1539_v8 = vpop.f32.mrf.mxu2 }
0x1288   :  { %v1558_v11 = vadd.f32 1.0, %v1555_v7  ;;  %v4725_v47 = vadd.f32 %v4713_v51, %v1539_v8  ;;  %v1636_v39 = vmul.f32 %v1633_v33, %v1552_v59 }
0x128a   :  { %3776 = vrcp.f32 %v1558_v11  ;;  %v4728_v12 = vmul.f32 0.70710677, %v4725_v47  ;;  %v1572_v24 = vand.u32 2147483648, %v1558_v11  ;;  %v1570_v26 = vand.u32 2147483647, %v1558_v11 }
0x128b   :  { %vm1566_vm14 = vweird.f32 %v1558_v11  ;;  %v1639_v46 = vmul.f32 1.442695, %v1636_v39  ;;  %v1547_v32 = vmul.f32 0.5, %v4725_v47 }
0x128c   :  { %v4731_v3 = vand.u32 2147483647, %v4728_v12  ;;  %v1573_v30 = vor.u32 1.1754944e-38, %v1572_v24  ;;  %vm1571_vm3 = vcmp.eq.f32.partialorder %v1570_v26, 8.507059e+37 }
0x128e   :  { %v1556_v42 = vmul.f32 0.3275911, %v4731_v3  ;;  %v1634_v2 = vsub.f32 0.0, %v4731_v3 }
0x128f   :  { %3557 = vmatmul.msk.bf16.gmra.mxu2 %vm361_vm9, %v4655_v57 }
0x1290   :  { %v3777_v18 = vpop.eup %3776  ;;  %v1559_v21 = vadd.f32 1.0, %v1556_v42 }
0x1291   :  { %v1562_v19 = vmul.f32 %v3777_v18, %v1558_v11  ;;  %vm1567_vm8 = vweird.f32 %v3777_v18  ;;  %v1637_v11 = vmul.f32 %v1634_v2, %v4731_v3 }
0x1292   :  { %3778 = vrcp.f32 %v1559_v21  ;;  %vm1568_vm2 = vmor %vm1566_vm14, %vm1567_vm8  ;;  %v1587_v27 = vand.u32 2147483648, %v1559_v21  ;;  %v1585_v49 = vand.u32 2147483647, %v1559_v21  ;;  %vm1581_vm6 = vweird.f32 %v1559_v21 }
0x1293   :  { %v1563_v56 = vsub.f32 1.0, %v1562_v19  ;;  %3780 = vpow2.f32 %v1639_v46  ;;  %v1641_v4 = vmul.f32 1.442695, %v1637_v11  ;;  %vm1652_vm8 = vcmp.ge.f32.partialorder %v4728_v12, 0.0 }
0x1294   :  { %v1588_v60 = vor.u32 1.1754944e-38, %v1587_v27  ;;  %vm1586_vm5 = vcmp.eq.f32.partialorder %v1585_v49, 8.507059e+37 }
0x1295   :  { %v1564_v23 = vmul.f32 %v3777_v18, %v1563_v56  ;;  %3782 = vpow2.f32 %v1641_v4 }
0x1297   :  { %v1565_v10 = vadd.f32 %v3777_v18, %v1564_v23 }
0x1298   :  { %v3779_v14 = vpop.eup %3778 }
0x1299   :  { %v1569_v9 = vsel %vm1568_vm2, %v3777_v18, %v1565_v10  ;;  %v1577_v36 = vmul.f32 %v3779_v14, %v1559_v21  ;;  %vm1582_vm4 = vweird.f32 %v3779_v14  ;;  %v3781_v61 = vpop.eup %3780 }
0x129a   :  { %v1574_v34 = vsel %vm1571_vm3, %v1573_v30, %v1569_v9  ;;  %vm1583_vm7 = vmor %vm1581_vm6, %vm1582_vm4 }
0x129b   :  { %v1606_v41 = vmul.f32 1.0614054, %v1574_v34  ;;  %v1578_v48 = vsub.f32 1.0, %v1577_v36  ;;  %v3783_v28 = vpop.eup %3782  ;;  %v1546_v36 = vmul.f32 0.5, %v4718_v5 }
0x129d   :  { %v1609_v29 = vadd.f32 -1.4531521, %v1606_v41  ;;  %v1579_v44 = vmul.f32 %v3779_v14, %v1578_v48 }
0x129f   :  { %v1612_v55 = vmul.f32 %v1609_v29, %v1574_v34  ;;  %v1580_v0 = vadd.f32 %v3779_v14, %v1579_v44 }
0x12a1   :  { %v1615_v43 = vadd.f32 1.4214138, %v1612_v55  ;;  %v1584_v15 = vsel %vm1583_vm7, %v3779_v14, %v1580_v0 }
0x12a2   :  { %v1589_v17 = vsel %vm1586_vm5, %v1588_v60, %v1584_v15 }
0x12a3   :  { %v1618_v53 = vmul.f32 %v1615_v43, %v1574_v34  ;;  %v1607_v1 = vmul.f32 1.0614054, %v1589_v17 }
0x12a5   :  { %v1621_v59 = vadd.f32 -0.28449672, %v1618_v53  ;;  %v1610_v7 = vadd.f32 -1.4531521, %v1607_v1 }
0x12a7   :  { %v1624_v8 = vmul.f32 %v1621_v59, %v1574_v34  ;;  %v1613_v42 = vmul.f32 %v1610_v7, %v1589_v17 }
0x12a9   :  { %v1627_v18 = vadd.f32 0.2548296, %v1624_v8  ;;  %v1616_v19 = vadd.f32 1.4214138, %v1613_v42 }
0x12ab   :  { %v1630_v21 = vmul.f32 %v1627_v18, %v1574_v34  ;;  %v1619_v56 = vmul.f32 %v1616_v19, %v1589_v17 }
0x12ad   :  { %v1645_v24 = vmul.f32 %v3781_v61, %v1630_v21  ;;  %v1622_v16 = vadd.f32 -0.28449672, %v1619_v56 }
0x12af   :  { %v1648_v23 = vsub.f32 1.0, %v1645_v24  ;;  %v1625_v26 = vmul.f32 %v1622_v16, %v1589_v17 }
0x12b1   :  { %v1628_v52 = vadd.f32 0.2548296, %v1625_v26  ;;  %v1654_v20 = vsub.f32 0.0, %v1648_v23 }
0x12b3   :  { %v1631_v10 = vmul.f32 %v1628_v52, %v1589_v17  ;;  %v1657_v3 = vsel %vm1651_vm1, %v1648_v23, %v1654_v20 }
0x12b4   :  { %v1660_v33 = vadd.f32 1.0, %v1657_v3 }
0x12b5   :  { %v1646_v30 = vmul.f32 %v3783_v28, %v1631_v10 }
0x12b6   :  { %v1663_v41 = vmul.f32 %v1660_v33, %v1546_v36 }
0x12b7   :  { %v1649_v14 = vsub.f32 1.0, %v1646_v30 }
0x12b9   :  { %v1655_v9 = vsub.f32 0.0, %v1649_v14 }
0x12bb   :  { %v1658_v34 = vsel %vm1652_vm8, %v1649_v14, %v1655_v9 }
0x12bc   :  { %v1661_v38 = vadd.f32 1.0, %v1658_v34 }
0x12be   :  { %v1664_v31 = vmul.f32 %v1661_v38, %v1547_v32 }
0x12c0   :  { %v1674_v48 = vpack.c.bf16 %v1664_v31, %v1663_v41 }
0x12c2   :  { %3547 = vmatmul.msk.bf16.vlgmr.msra.gmra.mxu1 %vm39_vm0, %v1674_v48 }
0x12e7   :  { %v2256_v29 = vpop.f32.mrf.mxu3 }
0x12e8   :  { %v4767_v27 = vmul.f32 0.35355338, %v2256_v29 }
0x12ea   :  { %v2268_v35 = vsel %vm395_vm10, %v4767_v27, -inf }
0x12eb   :  { %2269 = vmax.xlane.f32.xlu0 %v2268_v35 }
0x12ef   :  { %v2258_v39 = vpop.f32.mrf.mxu3 }
0x12f0   :  { %v4771_v12 = vmul.f32 0.35355338, %v2258_v39 }
0x12f2   :  { %v1542_v44 = vpop.f32.mrf.mxu2  ;;  %v2271_v5 = vsel %vm395_vm10, %v4771_v12, -inf }
0x12f3   :  { %v1543_v47 = vadd.f32 %v4713_v51, %v1542_v44  ;;  %2272 = vmax.xlane.f32.xlu1 %v2271_v5 }
0x12f5   :  { %v1551_v49 = vmul.f32 0.70710677, %v1543_v47  ;;  %v1548_v29 = vmul.f32 0.5, %v1543_v47 }
0x12f7   :  { %v1554_v22 = vand.u32 2147483647, %v1551_v49  ;;  %v2261_v13 = vpop.f32.mrf.mxu3  ;;  %vm1653_vm6 = vcmp.ge.f32.partialorder %v1551_v49, 0.0 }
0x12f8   :  { %v4776_v55 = vmul.f32 0.35355338, %v2261_v13 }
0x12f9   :  { %v1557_v63 = vmul.f32 0.3275911, %v1554_v22  ;;  %v1635_v4 = vsub.f32 0.0, %v1554_v22 }
0x12fa   :  { %v1544_v0 = vpop.f32.mrf.mxu2  ;;  %v2274_v43 = vsel %vm402_vm11, %v4776_v55, -inf }
0x12fb   :  { %v1560_v60 = vadd.f32 1.0, %v1557_v63  ;;  %2275 = vmax.xlane.f32.xlu1 %v2274_v43  ;;  %v1638_v23 = vmul.f32 %v1635_v4, %v1554_v22 }
0x12fd   :  { %3784 = vrcp.f32 %v1560_v60  ;;  %v1602_v59 = vand.u32 2147483648, %v1560_v60  ;;  %v1600_v8 = vand.u32 2147483647, %v1560_v60  ;;  %vm1596_vm2 = vweird.f32 %v1560_v60 }
0x12fe   :  { %v1643_v28 = vmul.f32 1.442695, %v1638_v23 }
0x12ff   :  { %v2263_v46 = vpop.f32.mrf.mxu3  ;;  %v1603_v18 = vor.u32 1.1754944e-38, %v1602_v59  ;;  %vm1601_vm4 = vcmp.eq.f32.partialorder %v1600_v8, 8.507059e+37 }
0x1300   :  { %3786 = vpow2.f32 %v1643_v28 }
0x1302   :  { %v2109_v15 = vpop.f32.mrf.mxu2 }
0x1303   :  { %v3785_v53 = vpop.eup %3784  ;;  %v4780_v17 = vmul.f32 0.35355338, %v2109_v15 }
0x1304   :  { %v1592_v51 = vmul.f32 %v3785_v53, %v1560_v60  ;;  %vm1597_vm14 = vweird.f32 %v3785_v53 }
0x1305   :  { %v2121_v2 = vsel %vm395_vm10, %v4780_v17, -inf  ;;  %vm1598_vm3 = vmor %vm1596_vm2, %vm1597_vm14 }
0x1306   :  { %v1593_v1 = vsub.f32 1.0, %v1592_v51  ;;  %2122 = vmax.xlane.f32.xlu2 %v2121_v2  ;;  %v3787_v32 = vpop.eup %3786 }
0x1308   :  { %v1594_v7 = vmul.f32 %v3785_v53, %v1593_v1 }
0x130a   :  { %v1595_v11 = vadd.f32 %v3785_v53, %v1594_v7  ;;  %v2111_v42 = vpop.f32.mrf.mxu2 }
0x130b   :  { %v4784_v19 = vmul.f32 0.35355338, %v2111_v42 }
0x130c   :  { %v1599_v21 = vsel %vm1598_vm3, %v3785_v53, %v1595_v11 }
0x130d   :  { %v2124_v61 = vsel %vm395_vm10, %v4784_v19, -inf  ;;  %v1604_v56 = vsel %vm1601_vm4, %v1603_v18, %v1599_v21 }
0x130e   :  { %2125 = vmax.xlane.f32.xlu0 %v2124_v61  ;;  %v1608_v24 = vmul.f32 1.0614054, %v1604_v56 }
0x1310   :  { %v1611_v16 = vadd.f32 -1.4531521, %v1608_v24 }
0x1312   :  { %v2114_v26 = vpop.f32.mrf.mxu2  ;;  %v1614_v52 = vmul.f32 %v1611_v16, %v1604_v56 }
0x1313   :  { %v4788_v20 = vmul.f32 0.35355338, %v2114_v26 }
0x1314   :  { %2344 = vrot.lane.b32.xlu1 %v4655_v57, %s3905_s9  ;;  %v1617_v10 = vadd.f32 1.4214138, %v1614_v52 }
0x1315   :  { %v2127_v30 = vsel %vm402_vm11, %v4788_v20, -inf }
0x1316   :  { %2128 = vmax.xlane.f32.xlu0 %v2127_v30  ;;  %v1620_v3 = vmul.f32 %v1617_v10, %v1604_v56 }
0x1318   :  { %v1623_v14 = vadd.f32 -0.28449672, %v1620_v3 }
0x131a   :  { %v2116_v9 = vpop.f32.mrf.mxu2  ;;  %v1626_v33 = vmul.f32 %v1623_v14, %v1604_v56 }
0x131c   :  { %v1629_v34 = vadd.f32 0.2548296, %v1626_v33 }
0x131e   :  { %v1632_v36 = vmul.f32 %v1629_v34, %v1604_v56 }
0x1320   :  { %v1647_v38 = vmul.f32 %v3787_v32, %v1632_v36 }
0x1322   :  { %v1650_v41 = vsub.f32 1.0, %v1647_v38 }
0x1324   :  { %v1656_v31 = vsub.f32 0.0, %v1650_v41 }
0x1326   :  { %v1659_v48 = vsel %vm1653_vm6, %v1650_v41, %v1656_v31 }
0x1327   :  { %v1662_v35 = vadd.f32 1.0, %v1659_v48 }
0x1329   :  { %v1665_v39 = vmul.f32 %v1662_v35, %v1548_v29 }
0x132b   :  { %v1675_v44 = vpack.c.bf16 %v1665_v39, %v1665_v39 }
0x132d   :  { %3548 = vmatmul.msk.bf16.gmra.mxu1 %vm39_vm0, %v1675_v44 }
0x133f   :  { %v4825_v4 = vpop.f32.mrf.mxu1 }
0x1347   :  { %v4827_v56 = vpop.f32.mrf.mxu1 }
0x135e   :  { %v2270_v5 = vpop.xlane.xlu0 %2269 }
0x135f   :  { %v2277_v22 = vsub.f32 %v4767_v27, %v2270_v5 }
0x1361   :  { %v2280_v13 = vmul.f32 1.442695, %v2277_v22 }
0x1363   :  { %3788 = vpow2.f32 %v2280_v13 }
0x1366   :  { %v2273_v63 = vpop.xlane.xlu1 %2272 }
0x1367   :  { %v2278_v0 = vsub.f32 %v4771_v12, %v2273_v63 }
0x1369   :  { %v4797_v43 = vpop.eup %3788  ;;  %v2282_v60 = vmul.f32 1.442695, %v2278_v0 }
0x136a   :  { %v2286_v49 = vsel %vm395_vm10, %v4797_v43, 0.0 }
0x136b   :  { %3790 = vpow2.f32 %v2282_v60  ;;  %2287 = vadd.xlane.f32.xlu2 %v2286_v49 }
0x136e   :  { %v2276_v47 = vpop.xlane.xlu1 %2275 }
0x136f   :  { %v2279_v46 = vsub.f32 %v4776_v55, %v2276_v47 }
0x1371   :  { %v4802_v15 = vpop.eup %3790  ;;  %v2284_v53 = vmul.f32 1.442695, %v2279_v46 }
0x1372   :  { %v2289_v27 = vsel %vm395_vm10, %v4802_v15, 0.0 }
0x1373   :  { %3792 = vpow2.f32 %v2284_v53  ;;  %2290 = vadd.xlane.f32.xlu0 %v2289_v27 }
0x1379   :  { %v4806_v12 = vpop.eup %3792  ;;  %v2123_v51 = vpop.xlane.xlu2 %2122 }
0x137a   :  { %v2130_v2 = vsub.f32 %v4780_v17, %v2123_v51  ;;  %v2292_v1 = vsel %vm402_vm11, %v4806_v12, 0.0 }
0x137b   :  { %2293 = vadd.xlane.f32.xlu1 %v2292_v1 }
0x137c   :  { %v2133_v59 = vmul.f32 1.442695, %v2130_v2 }
0x137e   :  { %3794 = vpow2.f32 %v2133_v59 }
0x1381   :  { %v2126_v55 = vpop.xlane.xlu0 %2125 }
0x1382   :  { %v2131_v7 = vsub.f32 %v4784_v19, %v2126_v55 }
0x1383   :  { %2342 = vrot.lane.b32.xlu2 %v4661_v58, %s3905_s9 }
0x1384   :  { %v4814_v8 = vpop.eup %3794  ;;  %v2135_v11 = vmul.f32 1.442695, %v2131_v7 }
0x1385   :  { %v2139_v42 = vsel %vm395_vm10, %v4814_v8, 0.0 }
0x1386   :  { %3796 = vpow2.f32 %v2135_v11  ;;  %2140 = vadd.xlane.f32.xlu0 %v2139_v42  ;;  %v2345_v17 = vpop.permute.xlu1 %2344 }
0x1387   :  { %v2354_v18 = vand.u32 %v2345_v17, %v4132_v54 }
0x1389   :  { %2362 = vmatpush.bf16.msra.mxu0 %v2354_v18  ;;  %v2129_v61 = vpop.xlane.xlu0 %2128 }
0x138a   :  { %v2132_v24 = vsub.f32 %v4788_v20, %v2129_v61 }
0x138b   :  { %2197 = vrot.lane.b32.xlu2 %v4655_v57, %s3904_s8 }
0x138c   :  { %v4821_v21 = vpop.eup %3796  ;;  %v2137_v16 = vmul.f32 1.442695, %v2132_v24 }
0x138d   :  { %v2142_v19 = vsel %vm395_vm10, %v4821_v21, 0.0 }
0x138e   :  { %2143 = vadd.xlane.f32.xlu0 %v2142_v19  ;;  %3798 = vpow2.f32 %v2137_v16 }
0x1394   :  { %v4834_v57 = vpop.eup %3798 }
0x1395   :  { %v2145_v52 = vsel %vm402_vm11, %v4834_v57, 0.0 }
0x13a2   :  { %2195 = vrot.lane.b32.xlu0 %v4661_v58, %s3904_s8 }
0x13aa   :  { %v4832_v23 = vpop.f32.mrf.mxu1 }
0x13b2   :  { %v1702_v26 = vpop.f32.mrf.mxu1 }
0x13b4   :  { %2146 = vadd.xlane.f32.xlu2 %v2145_v52 }
0x13de   :  { %v2288_v10 = vpop.xlane.xlu2 %2287 }
0x13df   :  { %3800 = vrcp.f32 %v2288_v10  ;;  %v2306_v41 = vand.u32 2147483648, %v2288_v10  ;;  %vm2300_vm5 = vweird.f32 %v2288_v10  ;;  %v2304_v48 = vand.u32 2147483647, %v2288_v10 }
0x13e1   :  { %v2307_v5 = vor.u32 1.1754944e-38, %v2306_v41  ;;  %vm2305_vm2 = vcmp.eq.f32.partialorder %v2304_v48, 8.507059e+37 }
0x13e5   :  { %v3801_v28 = vpop.eup %3800 }
0x13e6   :  { %v2296_v30 = vmul.f32 %v3801_v28, %v2288_v10  ;;  %v2343_v3 = vpop.permute.xlu2 %2342  ;;  %v2291_v20 = vpop.xlane.xlu0 %2290  ;;  %vm2301_vm7 = vweird.f32 %v3801_v28 }
0x13e7   :  { %3802 = vrcp.f32 %v2291_v20  ;;  %2363 = vmatpush.bf16.msra.mxu0 %v2343_v3  ;;  %v2321_v29 = vand.u32 2147483648, %v2291_v20  ;;  %vm2302_vm1 = vmor %vm2300_vm5, %vm2301_vm7  ;;  %v2319_v39 = vand.u32 2147483647, %v2291_v20  ;;  %vm2315_vm14 = vweird.f32 %v2291_v20 }
0x13e8   :  { %v2297_v58 = vsub.f32 1.0, %v2296_v30 }
0x13e9   :  { %v2322_v63 = vor.u32 1.1754944e-38, %v2321_v29  ;;  %vm2320_vm4 = vcmp.eq.f32.partialorder %v2319_v39, 8.507059e+37 }
0x13ea   :  { %v2298_v14 = vmul.f32 %v3801_v28, %v2297_v58 }
0x13ec   :  { %v2299_v32 = vadd.f32 %v3801_v28, %v2298_v14 }
0x13ed   :  { %v3803_v9 = vpop.eup %3802 }
0x13ee   :  { %v2311_v33 = vmul.f32 %v3803_v9, %v2291_v20  ;;  %v2198_v34 = vpop.permute.xlu2 %2197  ;;  %v2294_v36 = vpop.xlane.xlu1 %2293  ;;  %vm2316_vm8 = vweird.f32 %v3803_v9  ;;  %v2303_v44 = vsel %vm2302_vm1, %v3801_v28, %v2299_v32 }
0x13ef   :  { %v2207_v38 = vand.u32 %v2198_v34, %v4132_v54  ;;  %3804 = vrcp.f32 %v2294_v36  ;;  %vm2317_vm3 = vmor %vm2315_vm14, %vm2316_vm8  ;;  %v2308_v0 = vsel %vm2305_vm2, %v2307_v5, %v2303_v44  ;;  %v2336_v55 = vand.u32 2147483648, %v2294_v36 }
0x13f0   :  { %v2312_v31 = vsub.f32 1.0, %v2311_v33  ;;  %v2309_v27 = vmul.f32 %v4797_v43, %v2308_v0  ;;  %vm2330_vm7 = vweird.f32 %v2294_v36  ;;  %v2334_v7 = vand.u32 2147483647, %v2294_v36 }
0x13f1   :  { %2215 = vmatpush.bf16.msrb.mxu1 %v2207_v38 }
0x13f2   :  { %v2313_v35 = vmul.f32 %v3803_v9, %v2312_v31  ;;  %vm2335_vm1 = vcmp.eq.f32.partialorder %v2334_v7, 8.507059e+37 }
0x13f4   :  { %v2314_v22 = vadd.f32 %v3803_v9, %v2313_v35 }
0x13f5   :  { %v3805_v13 = vpop.eup %3804 }
0x13f6   :  { %v2318_v60 = vsel %vm2317_vm3, %v3803_v9, %v2314_v22  ;;  %v2326_v49 = vmul.f32 %v3805_v13, %v2294_v36  ;;  %vm2331_vm6 = vweird.f32 %v3805_v13 }
0x13f7   :  { %v2323_v47 = vsel %vm2320_vm4, %v2322_v63, %v2318_v60  ;;  %vm2332_vm5 = vmor %vm2330_vm7, %vm2331_vm6 }
0x13f8   :  { %v2324_v46 = vmul.f32 %v4802_v15, %v2323_v47  ;;  %v2327_v53 = vsub.f32 1.0, %v2326_v49  ;;  %v2337_v15 = vor.u32 1.1754944e-38, %v2336_v55 }
0x13f9   :  { %v2141_v51 = vpop.xlane.xlu0 %2140 }
0x13fa   :  { %v2328_v2 = vmul.f32 %v3805_v13, %v2327_v53  ;;  %3806 = vrcp.f32 %v2141_v51  ;;  %v2340_v1 = vpack.c.bf16 %v2324_v46, %v2309_v27  ;;  %v2159_v10 = vand.u32 2147483648, %v2141_v51 }
0x13fb   :  { %vm2153_vm14 = vweird.f32 %v2141_v51  ;;  %v2157_v28 = vand.u32 2147483647, %v2141_v51 }
0x13fc   :  { %v2329_v59 = vadd.f32 %v3805_v13, %v2328_v2  ;;  %3562 = vmatmul.msk.bf16.vlgmr.msra.gmra.mxu0 %vm395_vm10, %v2340_v1  ;;  %v2160_v33 = vor.u32 1.1754944e-38, %v2159_v10  ;;  %v2389_v1 = vld [vmem:[%s5373_s1 + $0xb8] sm:$0xff] }
0x13fd   :  { %vm2158_vm4 = vcmp.eq.f32.partialorder %v2157_v28, 8.507059e+37 }
0x13fe   :  { %v2333_v18 = vsel %vm2332_vm5, %v3805_v13, %v2329_v59 }
0x13ff   :  { %v2338_v19 = vsel %vm2335_vm1, %v2337_v15, %v2333_v18 }
0x1400   :  { %v3807_v11 = vpop.eup %3806  ;;  %v2339_v24 = vmul.f32 %v4806_v12, %v2338_v19 }
0x1401   :  { %v2149_v42 = vmul.f32 %v3807_v11, %v2141_v51  ;;  %v2144_v17 = vpop.xlane.xlu0 %2143  ;;  %vm2154_vm8 = vweird.f32 %v3807_v11 }
0x1402   :  { %3808 = vrcp.f32 %v2144_v17  ;;  %v2341_v3 = vpack.c.bf16 %v2339_v24, %v2339_v24  ;;  %vm2155_vm2 = vmor %vm2153_vm14, %vm2154_vm8  ;;  %v2174_v20 = vand.u32 2147483648, %v2144_v17  ;;  %v2172_v9 = vand.u32 2147483647, %v2144_v17 }
0x1403   :  { %v2150_v43 = vsub.f32 1.0, %v2149_v42  ;;  %vm2168_vm6 = vweird.f32 %v2144_v17 }
0x1404   :  { %v2175_v36 = vor.u32 1.1754944e-38, %v2174_v20  ;;  %vm2173_vm5 = vcmp.eq.f32.partialorder %v2172_v9, 8.507059e+37 }
0x1405   :  { %v2151_v61 = vmul.f32 %v3807_v11, %v2150_v43 }
0x1407   :  { %v2152_v26 = vadd.f32 %v3807_v11, %v2151_v61 }
0x1408   :  { %v3809_v16 = vpop.eup %3808 }
0x1409   :  { %v2164_v52 = vmul.f32 %v3809_v16, %v2144_v17  ;;  %v2156_v58 = vsel %vm2155_vm2, %v3807_v11, %v2152_v26  ;;  %vm2169_vm3 = vweird.f32 %v3809_v16 }
0x140a   :  { %v2161_v34 = vsel %vm2158_vm4, %v2160_v33, %v2156_v58  ;;  %vm2170_vm7 = vmor %vm2168_vm6, %vm2169_vm3 }
0x140b   :  { %v2165_v30 = vsub.f32 1.0, %v2164_v52  ;;  %v2162_v41 = vmul.f32 %v4814_v8, %v2161_v34  ;;  %v3644_v52 = vld [vmem:[%s5373_s1 + $0xc8] ss:$0 sm:$0xff] }
0x140c   :  { %3563 = vmatmul.msk.bf16.gmra.mxu0 %vm395_vm10, %v2341_v3 }
0x140d   :  { %v2166_v14 = vmul.f32 %v3809_v16, %v2165_v30 }
0x140f   :  { %v2167_v12 = vadd.f32 %v3809_v16, %v2166_v14 }
0x1411   :  { %v2171_v32 = vsel %vm2170_vm7, %v3809_v16, %v2167_v12 }
0x1412   :  { %v2176_v38 = vsel %vm2173_vm5, %v2175_v36, %v2171_v32 }
0x1413   :  { %v2177_v31 = vmul.f32 %v4821_v21, %v2176_v38 }
0x1414   :  { %v2196_v48 = vpop.permute.xlu0 %2195 }
0x1415   :  { %2216 = vmatpush.bf16.msrb.mxu1 %v2196_v48  ;;  %v2193_v29 = vpack.c.bf16 %v2177_v31, %v2162_v41 }
0x1418   :  { %3558 = vmatmul.msk.bf16.vlgmr.msrb.gmra.mxu1 %vm395_vm10, %v2193_v29 }
0x1427   :  { %v2147_v35 = vpop.xlane.xlu2 %2146 }
0x1428   :  { %3810 = vrcp.f32 %v2147_v35  ;;  %v2189_v22 = vand.u32 2147483648, %v2147_v35  ;;  %v2187_v63 = vand.u32 2147483647, %v2147_v35  ;;  %vm2183_vm8 = vweird.f32 %v2147_v35 }
0x142a   :  { %v2190_v8 = vor.u32 1.1754944e-38, %v2189_v22  ;;  %vm2188_vm2 = vcmp.eq.f32.partialorder %v2187_v63, 8.507059e+37 }
0x142e   :  { %v3811_v39 = vpop.eup %3810 }
0x142f   :  { %v2179_v44 = vmul.f32 %v3811_v39, %v2147_v35  ;;  %vm2184_vm1 = vweird.f32 %v3811_v39 }
0x1430   :  { %vm2185_vm14 = vmor %vm2183_vm8, %vm2184_vm1 }
0x1431   :  { %v2180_v5 = vsub.f32 1.0, %v2179_v44 }
0x1433   :  { %v2181_v13 = vmul.f32 %v3811_v39, %v2180_v5 }
0x1435   :  { %v2182_v0 = vadd.f32 %v3811_v39, %v2181_v13 }
0x1437   :  { %v2186_v60 = vsel %vm2185_vm14, %v3811_v39, %v2182_v0  ;;  %v2504_v0 = vld [vmem:[%s5373_s1 + $0xf0] sm:$0xff] }
0x1438   :  { %v2191_v21 = vsel %vm2188_vm2, %v2190_v8, %v2186_v60  ;;  %v2505_v8 = vld [vmem:[%s5373_s1 + $0xf8] sm:$0xff] }
0x1439   :  { %v2192_v49 = vmul.f32 %v4834_v57, %v2191_v21  ;;  %v2390_v57 = vld [vmem:[%s5373_s1 + $0xc0] sm:$0xff]  ;;  %v2509_v60 = vpack.c.bf16 %v2505_v8, %v2504_v0 }
0x143a   :  { %v2393_v59 = vpack.c.bf16 %v2390_v57, %v2389_v1 }
0x143b   :  { %v2194_v47 = vpack.c.bf16 %v2192_v49, %v2192_v49  ;;  %2524 = vmatpush.bf16.msra.mxu1 %v2509_v60 }
0x143c   :  { %2407 = vmatpush.bf16.msra.mxu2 %v2393_v59 }
0x143d   :  { %3559 = vmatmul.msk.bf16.gmra.mxu1 %vm395_vm10, %v2194_v47  ;;  %v2502_v47 = vld [vmem:[%s5373_s1 + $0xe0] sm:$0xff] }
0x1479   :  { %v2365_v46 = vpop.f32.mrf.mxu0 }
0x1481   :  { %v2367_v53 = vpop.f32.mrf.mxu0 }
0x1482   :  { %v3612_v27 = vpack.i.bf16 %v2367_v53, %v2365_v46  ;;  %v2503_v46 = vld [vmem:[%s5373_s1 + $0xe8] sm:$0xff] }
0x1484   :  { %3613 = vrot.lane.b32.xlu0 %v3612_v27, %s3907_s10  ;;  %v2508_v27 = vpack.c.bf16 %v2503_v46, %v2502_v47 }
0x1486   :  { %2525 = vmatpush.bf16.msra.mxu1 %v2508_v27 }
0x1489   :  { %v2370_v51 = vpop.f32.mrf.mxu0 }
0x148c   :  { %2381 = vrot.lane.b32.xlu0 %v2370_v51, %s3907_s10 }
0x1491   :  { %v2372_v2 = vpop.f32.mrf.mxu0 }
0x1495   :  { %v2218_v55 = vpop.f32.mrf.mxu1 }
0x149d   :  { %v2220_v7 = vpop.f32.mrf.mxu1 }
0x14ba   :  { %v2223_v11 = vpop.f32.mrf.mxu1 }
0x14c2   :  { %v2225_v42 = vpop.f32.mrf.mxu1 }
0x14f6   :  { %v3614_v17 = vpop.permute.xlu0 %3613 }
0x14f7   :  { %v3616_v18 = vunpack.i.h.bf16 %v3614_v17  ;;  %v3615_v15 = vunpack.i.l.bf16 %v3614_v17 }
0x14f9   :  { %v2386_v43 = vsel %vm361_vm9, %v2218_v55, %v3615_v15  ;;  %v2387_v19 = vsel %vm361_vm9, %v2220_v7, %v3616_v18 }
0x14fa   :  { %v2391_v61 = vpack.c.bf16 %v2387_v19, %v2386_v43 }
0x14fc   :  { %3564 = vmatmul.msk.bf16.vlgmr.msra.gmra.mxu2 %vm673_vm15, %v2391_v61 }
0x14fe   :  { %v2382_v24 = vpop.permute.xlu0 %2381 }
0x14ff   :  { %v2388_v16 = vsel %vm361_vm9, %v2223_v11, %v2382_v24 }
0x1500   :  { %v2392_v26 = vpack.c.bf16 %v2388_v16, %v2388_v16 }
0x150c   :  { %3565 = vmatmul.msk.bf16.gmra.mxu2 %vm673_vm15, %v2392_v26 }
0x157f   :  { %v2409_v10 = vpop.f32.mrf.mxu2 }
0x1580   :  { %v2418_v28 = vadd.f32 %v2409_v10, %v4547_v62  ;;  %v3645_v10 = vld [vmem:[%s5373_s1 + $0xd0] ss:$0 sm:$0xff] }
0x1582   :  { %v4866_v30 = vadd.f32 %v3644_v52, %v2418_v28 }
0x1584   :  { %v2428_v3 = vsel %vm153_vm12, %v4866_v30, 0.0 }
0x1585   :  { %2429 = vadd.xlane.f32.xlu0 %v2428_v3 }
0x1587   :  { %v2411_v20 = vpop.f32.mrf.mxu2 }
0x1588   :  { %v2419_v58 = vadd.f32 %v2411_v20, %v4555_v45 }
0x158a   :  { %v4871_v14 = vadd.f32 %v3644_v52, %v2419_v58 }
0x158c   :  { %v2431_v9 = vsel %vm153_vm12, %v4871_v14, 0.0 }
0x158d   :  { %2432 = vadd.xlane.f32.xlu1 %v2431_v9 }
0x158f   :  { %v2414_v33 = vpop.f32.mrf.mxu2 }
0x1590   :  { %v2420_v12 = vadd.f32 %v2414_v33, %v4563_v6  ;;  %v3646_v33 = vld [vmem:[%s5373_s1 + $0xd8] ss:$0 sm:$0xff] }
0x1592   :  { %v4876_v34 = vadd.f32 %v3644_v52, %v2420_v12 }
0x1594   :  { %v2434_v62 = vsel %vm160_vm13, %v4876_v34, 0.0 }
0x1595   :  { %2435 = vadd.xlane.f32.xlu1 %v2434_v62 }
0x1597   :  { %v2416_v36 = vpop.f32.mrf.mxu2 }
0x15f8   :  { %v2430_v32 = vpop.xlane.xlu0 %2429 }
0x15f9   :  { %v2437_v38 = vmul.f32 %v2430_v32, %v4001_v40 }
0x15fb   :  { %v2440_v45 = vsub.f32 %v4866_v30, %v2437_v38 }
0x15fd   :  { %v2443_v41 = vmul.f32 %v2440_v45, %v2440_v45 }
0x15ff   :  { %v2446_v31 = vsel %vm153_vm12, %v2443_v41, 0.0 }
0x1600   :  { %2447 = vadd.xlane.f32.xlu2 %v2446_v31  ;;  %v2433_v48 = vpop.xlane.xlu1 %2432 }
0x1601   :  { %v2438_v29 = vmul.f32 %v2433_v48, %v4001_v40 }
0x1603   :  { %v2441_v6 = vsub.f32 %v4871_v14, %v2438_v29 }
0x1605   :  { %v2444_v35 = vmul.f32 %v2441_v6, %v2441_v6 }
0x1607   :  { %v2449_v39 = vsel %vm153_vm12, %v2444_v35, 0.0 }
0x1608   :  { %2450 = vadd.xlane.f32.xlu1 %v2449_v39  ;;  %v2436_v44 = vpop.xlane.xlu1 %2435 }
0x1609   :  { %v2439_v5 = vmul.f32 %v2436_v44, %v4001_v40 }
0x160b   :  { %v4888_v22 = vsub.f32 %v4876_v34, %v2439_v5 }
0x160d   :  { %v2445_v13 = vmul.f32 %v4888_v22, %v4888_v22 }
0x160f   :  { %v2452_v63 = vsel %vm160_vm13, %v2445_v13, 0.0 }
0x1610   :  { %2453 = vadd.xlane.f32.xlu2 %v2452_v63 }
0x1673   :  { %v2448_v21 = vpop.xlane.xlu2 %2447 }
0x1674   :  { %v2455_v49 = vmul.f32 %v2448_v21, %v4001_v40 }
0x1676   :  { %v2458_v53 = vadd.f32 1e-05, %v2455_v49 }
0x1678   :  { %3812 = vrsqrt.f32 %v2458_v53  ;;  %vm2467_vm4 = vweird.f32 %v2458_v53 }
0x167b   :  { %v2451_v51 = vpop.xlane.xlu1 %2450 }
0x167c   :  { %v2456_v2 = vmul.f32 %v2451_v51, %v4001_v40 }
0x167e   :  { %v3813_v1 = vpop.eup %3812  ;;  %v2459_v57 = vadd.f32 1e-05, %v2456_v2 }
0x167f   :  { %v2462_v59 = vmul.f32 %v3813_v1, %v2458_v53  ;;  %vm2468_vm3 = vweird.f32 %v3813_v1 }
0x1680   :  { %3814 = vrsqrt.f32 %v2459_v57  ;;  %vm2469_vm6 = vmor %vm2467_vm4, %vm2468_vm3  ;;  %vm2477_vm5 = vweird.f32 %v2459_v57 }
0x1681   :  { %v2463_v55 = vmul.f32 %v3813_v1, %v2462_v59 }
0x1683   :  { %v2464_v7 = vmul.f32 0.5, %v2463_v55  ;;  %v2454_v11 = vpop.xlane.xlu2 %2453  ;;  %v2662_v55 = vld [vmem:[%s5373_s1 + $0x138] sm:$0xff] }
0x1684   :  { %v2457_v42 = vmul.f32 %v2454_v11, %v4001_v40 }
0x1685   :  { %v2465_v17 = vsub.f32 1.5, %v2464_v7  ;;  %v2663_v7 = vld [vmem:[%s5373_s1 + $0x140] sm:$0xff] }
0x1686   :  { %v3815_v18 = vpop.eup %3814  ;;  %v2460_v15 = vadd.f32 1e-05, %v2457_v42 }
0x1687   :  { %v2466_v43 = vmul.f32 %v3813_v1, %v2465_v17  ;;  %v2472_v19 = vmul.f32 %v3815_v18, %v2459_v57  ;;  %vm2478_vm7 = vweird.f32 %v3815_v18 }
0x1688   :  { %3816 = vrsqrt.f32 %v2460_v15  ;;  %vm2479_vm1 = vmor %vm2477_vm5, %vm2478_vm7  ;;  %vm2487_vm14 = vweird.f32 %v2460_v15 }
0x1689   :  { %v2473_v61 = vmul.f32 %v3815_v18, %v2472_v19  ;;  %v2470_v24 = vsel %vm2469_vm6, %v3813_v1, %v2466_v43  ;;  %v2669_v43 = vpack.c.bf16 %v2663_v7, %v2662_v55 }
0x168a   :  { %v2491_v28 = vmul.f32 %v2470_v24, %v2440_v45  ;;  %v2661_v24 = vld [vmem:[%s5373_s1 + $0x130] sm:$0xff] }
0x168b   :  { %v2474_v16 = vmul.f32 0.5, %v2473_v61  ;;  %v2660_v61 = vld [vmem:[%s5373_s1 + $0x128] sm:$0xff]  ;;  %2680 = vmatpush.bf16.msra.mxu3 %v2669_v43 }
0x168c   :  { %v2495_v12 = vmul.f32 %v3645_v10, %v2491_v28 }
0x168d   :  { %v2475_v26 = vsub.f32 1.5, %v2474_v16 }
0x168e   :  { %v3817_v52 = vpop.eup %3816  ;;  %v2499_v41 = vadd.f32 %v3646_v33, %v2495_v12  ;;  %v2658_v12 = vld [vmem:[%s5373_s1 + $0x118] sm:$0xff] }
0x168f   :  { %v2476_v3 = vmul.f32 %v3815_v18, %v2475_v26  ;;  %v2482_v20 = vmul.f32 %v3817_v52, %v2460_v15  ;;  %vm2488_vm8 = vweird.f32 %v3817_v52 }
0x1690   :  { %vm2489_vm2 = vmor %vm2487_vm14, %vm2488_vm8 }
0x1691   :  { %v2480_v58 = vsel %vm2479_vm1, %v3815_v18, %v2476_v3  ;;  %v2483_v9 = vmul.f32 %v3817_v52, %v2482_v20 }
0x1692   :  { %v2492_v62 = vmul.f32 %v2480_v58, %v2441_v6  ;;  %v3647_v6 = vld [vmem:[%s5373_s1 + $0x100] ss:$0 sm:$0xff] }
0x1693   :  { %v2484_v36 = vmul.f32 0.5, %v2483_v9 }
0x1694   :  { %v2496_v32 = vmul.f32 %v3645_v10, %v2492_v62  ;;  %v2659_v62 = vld [vmem:[%s5373_s1 + $0x120] sm:$0xff] }
0x1695   :  { %v2485_v38 = vsub.f32 1.5, %v2484_v36 }
0x1696   :  { %v2500_v31 = vadd.f32 %v3646_v33, %v2496_v32 }
0x1697   :  { %v2486_v48 = vmul.f32 %v3817_v52, %v2485_v38  ;;  %v2667_v38 = vpack.c.bf16 %v2659_v62, %v2658_v12 }
0x1698   :  { %v2506_v45 = vpack.c.bf16 %v2500_v31, %v2499_v41 }
0x1699   :  { %v2490_v29 = vsel %vm2489_vm2, %v3817_v52, %v2486_v48  ;;  %v2668_v52 = vpack.c.bf16 %v2661_v24, %v2660_v61 }
0x169a   :  { %3566 = vmatmul.msk.bf16.vlgmr.msra.gmra.mxu1 %vm153_vm12, %v2506_v45  ;;  %v2493_v35 = vmul.f32 %v2490_v29, %v4888_v22 }
0x169b   :  { %2681 = vmatpush.bf16.msra.mxu3 %v2668_v52 }
0x169c   :  { %v2497_v39 = vmul.f32 %v3645_v10, %v2493_v35  ;;  %v2656_v35 = vld [vmem:[%s5373_s1 + $0x108] sm:$0xff] }
0x169e   :  { %v2501_v44 = vadd.f32 %v3646_v33, %v2497_v39  ;;  %v2657_v39 = vld [vmem:[%s5373_s1 + $0x110] sm:$0xff] }
0x169f   :  { %2682 = vmatpush.bf16.msra.mxu3 %v2667_v38 }
0x16a0   :  { %v2507_v5 = vpack.c.bf16 %v2501_v44, %v2501_v44 }
0x16aa   :  { %3567 = vmatmul.msk.bf16.gmra.mxu1 %vm153_vm12, %v2507_v5  ;;  %v2666_v5 = vpack.c.bf16 %v2657_v39, %v2656_v35 }
0x16ac   :  { %2683 = vmatpush.bf16.msra.mxu3 %v2666_v5 }
0x1717   :  { %v2527_v13 = vpop.f32.mrf.mxu1 }
0x1718   :  { %v4920_v63 = vadd.f32 %v3647_v6, %v2527_v13 }
0x171a   :  { %v4923_v0 = vmul.f32 0.70710677, %v4920_v63 }
0x171c   :  { %v2542_v8 = vand.u32 2147483647, %v4923_v0 }
0x171e   :  { %v2545_v60 = vmul.f32 0.3275911, %v2542_v8  ;;  %v2623_v9 = vsub.f32 0.0, %v2542_v8 }
0x171f   :  { %v2529_v21 = vpop.f32.mrf.mxu1 }
0x1720   :  { %v2548_v22 = vadd.f32 1.0, %v2545_v60  ;;  %v4926_v49 = vadd.f32 %v3647_v6, %v2529_v21  ;;  %v2626_v48 = vmul.f32 %v2623_v9, %v2542_v8 }
0x1722   :  { %3818 = vrcp.f32 %v2548_v22  ;;  %v4929_v47 = vmul.f32 0.70710677, %v4926_v49  ;;  %v2562_v42 = vand.u32 2147483648, %v2548_v22  ;;  %v2560_v15 = vand.u32 2147483647, %v2548_v22 }
0x1723   :  { %vm2556_vm4 = vweird.f32 %v2548_v22 }
0x1724   :  { %v4932_v46 = vand.u32 2147483647, %v4929_v47  ;;  %v2563_v10 = vor.u32 1.1754944e-38, %v2562_v42  ;;  %vm2561_vm7 = vcmp.eq.f32.partialorder %v2560_v15, 8.507059e+37 }
0x1726   :  { %v2546_v53 = vmul.f32 0.3275911, %v4932_v46 }
0x1727   :  { %v2532_v27 = vpop.f32.mrf.mxu1 }
0x1728   :  { %v3819_v51 = vpop.eup %3818  ;;  %v4935_v2 = vadd.f32 %v3647_v6, %v2532_v27  ;;  %v2549_v57 = vadd.f32 1.0, %v2546_v53 }
0x1729   :  { %v2552_v1 = vmul.f32 %v3819_v51, %v2548_v22  ;;  %vm2557_vm3 = vweird.f32 %v3819_v51  ;;  %v2629_v22 = vmul.f32 1.442695, %v2626_v48 }
0x172a   :  { %v4938_v59 = vmul.f32 0.70710677, %v4935_v2  ;;  %3820 = vrcp.f32 %v2549_v57  ;;  %vm2558_vm6 = vmor %vm2556_vm4, %vm2557_vm3  ;;  %v2577_v31 = vand.u32 2147483648, %v2549_v57  ;;  %v2575_v29 = vand.u32 2147483647, %v2549_v57 }
0x172b   :  { %v2553_v11 = vsub.f32 1.0, %v2552_v1  ;;  %vm2571_vm1 = vweird.f32 %v2549_v57  ;;  %v2624_v1 = vsub.f32 0.0, %v4932_v46 }
0x172c   :  { %v4947_v17 = vand.u32 2147483647, %v4938_v59  ;;  %v2578_v8 = vor.u32 1.1754944e-38, %v2577_v31  ;;  %vm2576_vm14 = vcmp.eq.f32.partialorder %v2575_v29, 8.507059e+37 }
0x172d   :  { %v2554_v18 = vmul.f32 %v3819_v51, %v2553_v11 }
0x172e   :  { %v2547_v19 = vmul.f32 0.3275911, %v4947_v17 }
0x172f   :  { %v2555_v16 = vadd.f32 %v3819_v51, %v2554_v18  ;;  %v2534_v26 = vpop.f32.mrf.mxu1 }
0x1730   :  { %v2550_v28 = vadd.f32 1.0, %v2547_v19  ;;  %v3821_v3 = vpop.eup %3820  ;;  %v2627_v19 = vmul.f32 %v2624_v1, %v4932_v46 }
0x1731   :  { %v2559_v20 = vsel %vm2558_vm6, %v3819_v51, %v2555_v16  ;;  %v2567_v33 = vmul.f32 %v3821_v3, %v2549_v57  ;;  %vm2572_vm5 = vweird.f32 %v3821_v3 }
0x1732   :  { %v2564_v58 = vsel %vm2561_vm7, %v2563_v10, %v2559_v20  ;;  %3822 = vrcp.f32 %v2550_v28  ;;  %vm2573_vm8 = vmor %vm2571_vm1, %vm2572_vm5  ;;  %v2592_v11 = vand.u32 2147483648, %v2550_v28  ;;  %v2590_v15 = vand.u32 2147483647, %v2550_v28 }
0x1733   :  { %v2596_v36 = vmul.f32 1.0614054, %v2564_v58  ;;  %v2568_v32 = vsub.f32 1.0, %v2567_v33  ;;  %3824 = vpow2.f32 %v2629_v22  ;;  %vm2586_vm3 = vweird.f32 %v2550_v28 }
0x1734   :  { %v2593_v16 = vor.u32 1.1754944e-38, %v2592_v11  ;;  %vm2591_vm6 = vcmp.eq.f32.partialorder %v2590_v15, 8.507059e+37  ;;  %v2625_v20 = vsub.f32 0.0, %v4947_v17  ;;  %v2631_v33 = vmul.f32 1.442695, %v2627_v19 }
0x1735   :  { %v2599_v41 = vadd.f32 -1.4531521, %v2596_v36  ;;  %v2569_v45 = vmul.f32 %v3821_v3, %v2568_v32  ;;  %vm2641_vm7 = vcmp.ge.f32.partialorder %v4923_v0, 0.0  ;;  %vm2642_vm5 = vcmp.ge.f32.partialorder %v4929_v47, 0.0 }
0x1736   :  { %3826 = vpow2.f32 %v2631_v33  ;;  %vm2643_vm1 = vcmp.ge.f32.partialorder %v4938_v59, 0.0 }
0x1737   :  { %v2602_v44 = vmul.f32 %v2599_v41, %v2564_v58  ;;  %v2570_v13 = vadd.f32 %v3821_v3, %v2569_v45 }
0x1738   :  { %v3823_v6 = vpop.eup %3822 }
0x1739   :  { %v2605_v60 = vadd.f32 1.4214138, %v2602_v44  ;;  %v2582_v21 = vmul.f32 %v3823_v6, %v2550_v28  ;;  %v2574_v53 = vsel %vm2573_vm8, %v3821_v3, %v2570_v13  ;;  %vm2587_vm2 = vweird.f32 %v3823_v6  ;;  %v3825_v62 = vpop.eup %3824 }
0x173a   :  { %v2579_v51 = vsel %vm2576_vm14, %v2578_v8, %v2574_v53  ;;  %vm2588_vm4 = vmor %vm2586_vm3, %vm2587_vm2  ;;  %v2628_v28 = vmul.f32 %v2625_v20, %v4947_v17 }
0x173b   :  { %v2608_v27 = vmul.f32 %v2605_v60, %v2564_v58  ;;  %v2583_v55 = vsub.f32 1.0, %v2582_v21  ;;  %v2597_v7 = vmul.f32 1.0614054, %v2579_v51 }
0x173c   :  { %v2633_v35 = vmul.f32 1.442695, %v2628_v28 }
0x173d   :  { %v2611_v42 = vadd.f32 -0.28449672, %v2608_v27  ;;  %v2584_v18 = vmul.f32 %v3823_v6, %v2583_v55  ;;  %v2600_v57 = vadd.f32 -1.4531521, %v2597_v7  ;;  %v2536_v7 = vmul.f32 0.5, %v4920_v63 }
0x173e   :  { %3828 = vpow2.f32 %v2633_v35  ;;  %v3648_v63 = vld [vmem:[%s5373_s1 + $0x148] ss:$0 sm:$0xff] }
0x173f   :  { %v2614_v43 = vmul.f32 %v2611_v42, %v2564_v58  ;;  %v2585_v61 = vadd.f32 %v3823_v6, %v2584_v18  ;;  %v2603_v24 = vmul.f32 %v2600_v57, %v2579_v51 }
0x1741   :  { %v2617_v26 = vadd.f32 0.2548296, %v2614_v43  ;;  %v2589_v52 = vsel %vm2588_vm4, %v3823_v6, %v2585_v61  ;;  %v2606_v10 = vadd.f32 1.4214138, %v2603_v24  ;;  %v2538_v61 = vmul.f32 0.5, %v4935_v2 }
0x1742   :  { %v2594_v3 = vsel %vm2591_vm6, %v2593_v16, %v2589_v52 }
0x1743   :  { %v2620_v9 = vmul.f32 %v2617_v26, %v2564_v58  ;;  %v2598_v12 = vmul.f32 1.0614054, %v2594_v3  ;;  %v2609_v36 = vmul.f32 %v2606_v10, %v2579_v51  ;;  %v3827_v58 = vpop.eup %3826 }
0x1744   :  { %v3829_v1 = vpop.eup %3828 }
0x1745   :  { %v2635_v32 = vmul.f32 %v3825_v62, %v2620_v9  ;;  %v2601_v38 = vadd.f32 -1.4531521, %v2598_v12  ;;  %v2612_v46 = vadd.f32 -0.28449672, %v2609_v36 }
0x1747   :  { %v2604_v41 = vmul.f32 %v2601_v38, %v2594_v3  ;;  %v2638_v31 = vsub.f32 1.0, %v2635_v32  ;;  %v2615_v48 = vmul.f32 %v2612_v46, %v2579_v51 }
0x1749   :  { %v2607_v45 = vadd.f32 1.4214138, %v2604_v41  ;;  %v2618_v29 = vadd.f32 0.2548296, %v2615_v48  ;;  %v2644_v44 = vsub.f32 0.0, %v2638_v31 }
0x174b   :  { %v2610_v39 = vmul.f32 %v2607_v45, %v2594_v3  ;;  %v2621_v5 = vmul.f32 %v2618_v29, %v2579_v51  ;;  %v2647_v8 = vsel %vm2641_vm7, %v2638_v31, %v2644_v44  ;;  %v2537_v51 = vmul.f32 0.5, %v4926_v49 }
0x174c   :  { %v2650_v53 = vadd.f32 1.0, %v2647_v8  ;;  %v2778_v8 = vld [vmem:[%s5373_s1 + $0x160] sm:$0xff] }
0x174d   :  { %v2613_v6 = vadd.f32 -0.28449672, %v2610_v39  ;;  %v2636_v13 = vmul.f32 %v3827_v58, %v2621_v5  ;;  %v2780_v5 = vld [vmem:[%s5373_s1 + $0x170] sm:$0xff]  ;;  %v2781_v58 = vld [vmem:[%s5373_s1 + $0x178] sm:$0xff] }
0x174e   :  { %v2653_v18 = vmul.f32 %v2650_v53, %v2536_v7 }
0x174f   :  { %v2616_v60 = vmul.f32 %v2613_v6, %v2594_v3  ;;  %v2639_v21 = vsub.f32 1.0, %v2636_v13  ;;  %v2785_v6 = vpack.c.bf16 %v2781_v58, %v2780_v5 }
0x1751   :  { %v2619_v17 = vadd.f32 0.2548296, %v2616_v60  ;;  %v2645_v22 = vsub.f32 0.0, %v2639_v21  ;;  %2798 = vmatpush.bf16.msrb.mxu0 %v2785_v6 }
0x1753   :  { %v2622_v27 = vmul.f32 %v2619_v17, %v2594_v3  ;;  %v2648_v55 = vsel %vm2642_vm5, %v2639_v21, %v2645_v22  ;;  %v2779_v21 = vld [vmem:[%s5373_s1 + $0x168] sm:$0xff] }
0x1754   :  { %v2651_v11 = vadd.f32 1.0, %v2648_v55  ;;  %v2784_v22 = vpack.c.bf16 %v2779_v21, %v2778_v8 }
0x1755   :  { %v2637_v42 = vmul.f32 %v3829_v1, %v2622_v27 }
0x1756   :  { %v2654_v15 = vmul.f32 %v2651_v11, %v2537_v51  ;;  %2799 = vmatpush.bf16.msrb.mxu0 %v2784_v22 }
0x1757   :  { %v2640_v0 = vsub.f32 1.0, %v2637_v42 }
0x1758   :  { %v2664_v57 = vpack.c.bf16 %v2654_v15, %v2653_v18 }
0x1759   :  { %v2646_v43 = vsub.f32 0.0, %v2640_v0 }
0x175a   :  { %3568 = vmatmul.msk.bf16.vlgmr.msra.gmra.mxu3 %vm39_vm0, %v2664_v57 }
0x175b   :  { %v2649_v19 = vsel %vm2643_vm1, %v2640_v0, %v2646_v43 }
0x175c   :  { %v2652_v47 = vadd.f32 1.0, %v2649_v19 }
0x175e   :  { %v2655_v24 = vmul.f32 %v2652_v47, %v2538_v61 }
0x1760   :  { %v2665_v16 = vpack.c.bf16 %v2655_v24, %v2655_v24 }
0x176a   :  { %3569 = vmatmul.msk.bf16.gmra.mxu3 %vm39_vm0, %v2665_v16 }
0x17dd   :  { %v2685_v49 = vpop.f32.mrf.mxu3 }
0x17de   :  { %v2694_v26 = vadd.f32 %v2685_v49, %v4866_v30  ;;  %v3649_v49 = vld [vmem:[%s5373_s1 + $0x150] ss:$0 sm:$0xff] }
0x17e0   :  { %v4984_v52 = vadd.f32 %v3648_v63, %v2694_v26 }
0x17e2   :  { %v2704_v59 = vsel %vm153_vm12, %v4984_v52, 0.0 }
0x17e3   :  { %2705 = vadd.xlane.f32.xlu1 %v2704_v59 }
0x17e5   :  { %v2687_v10 = vpop.f32.mrf.mxu3 }
0x17e6   :  { %v2695_v2 = vadd.f32 %v2687_v10, %v4871_v14 }
0x17e8   :  { %v4989_v3 = vadd.f32 %v3648_v63, %v2695_v2 }
0x17ea   :  { %v2707_v20 = vsel %vm153_vm12, %v4989_v3, 0.0 }
0x17eb   :  { %2708 = vadd.xlane.f32.xlu2 %v2707_v20 }
0x17ed   :  { %v2690_v9 = vpop.f32.mrf.mxu3 }
0x17ee   :  { %v2696_v33 = vadd.f32 %v2690_v9, %v4876_v34  ;;  %v3650_v9 = vld [vmem:[%s5373_s1 + $0x158] ss:$0 sm:$0xff] }
0x17f0   :  { %v4994_v12 = vadd.f32 %v3648_v63, %v2696_v33 }
0x17f2   :  { %v2710_v30 = vsel %vm160_vm13, %v4994_v12, 0.0 }
0x17f3   :  { %2711 = vadd.xlane.f32.xlu1 %v2710_v30 }
0x17f5   :  { %v2692_v62 = vpop.f32.mrf.mxu3 }
0x1856   :  { %v2706_v36 = vpop.xlane.xlu1 %2705 }
0x1857   :  { %v2713_v32 = vmul.f32 %v2706_v36, %v4001_v40 }
0x1859   :  { %v2716_v14 = vsub.f32 %v4984_v52, %v2713_v32 }
0x185b   :  { %v2719_v38 = vmul.f32 %v2716_v14, %v2716_v14 }
0x185d   :  { %v2722_v46 = vsel %vm153_vm12, %v2719_v38, 0.0 }
0x185e   :  { %2723 = vadd.xlane.f32.xlu2 %v2722_v46  ;;  %v2709_v28 = vpop.xlane.xlu2 %2708 }
0x185f   :  { %v2714_v41 = vmul.f32 %v2709_v28, %v4001_v40 }
0x1861   :  { %v2717_v34 = vsub.f32 %v4989_v3, %v2714_v41 }
0x1863   :  { %v2720_v31 = vmul.f32 %v2717_v34, %v2717_v34 }
0x1865   :  { %v2725_v48 = vsel %vm153_vm12, %v2720_v31, 0.0 }
0x1866   :  { %2726 = vadd.xlane.f32.xlu1 %v2725_v48  ;;  %v2712_v45 = vpop.xlane.xlu1 %2711 }
0x1867   :  { %v2715_v29 = vmul.f32 %v2712_v45, %v4001_v40 }
0x1869   :  { %v5006_v35 = vsub.f32 %v4994_v12, %v2715_v29 }
0x186b   :  { %v2721_v39 = vmul.f32 %v5006_v35, %v5006_v35 }
0x186d   :  { %v2728_v44 = vsel %vm160_vm13, %v2721_v39, 0.0 }
0x186e   :  { %2729 = vadd.xlane.f32.xlu0 %v2728_v44 }
0x18d1   :  { %v2724_v13 = vpop.xlane.xlu2 %2723 }
0x18d2   :  { %v2731_v60 = vmul.f32 %v2724_v13, %v4001_v40 }
0x18d4   :  { %v2734_v17 = vadd.f32 1e-05, %v2731_v60 }
0x18d6   :  { %3830 = vrsqrt.f32 %v2734_v17  ;;  %vm2743_vm14 = vweird.f32 %v2734_v17 }
0x18d9   :  { %v2727_v53 = vpop.xlane.xlu1 %2726 }
0x18da   :  { %v2732_v27 = vmul.f32 %v2727_v53, %v4001_v40 }
0x18dc   :  { %v3831_v1 = vpop.eup %3830  ;;  %v2735_v55 = vadd.f32 1e-05, %v2732_v27 }
0x18dd   :  { %v2738_v7 = vmul.f32 %v3831_v1, %v2734_v17  ;;  %vm2744_vm8 = vweird.f32 %v3831_v1 }
0x18de   :  { %3832 = vrsqrt.f32 %v2735_v55  ;;  %vm2745_vm2 = vmor %vm2743_vm14, %vm2744_vm8  ;;  %vm2753_vm4 = vweird.f32 %v2735_v55 }
0x18df   :  { %v2739_v51 = vmul.f32 %v3831_v1, %v2738_v7 }
0x18e1   :  { %v2740_v11 = vmul.f32 0.5, %v2739_v51  ;;  %v2730_v42 = vpop.xlane.xlu0 %2729 }
0x18e2   :  { %v2733_v18 = vmul.f32 %v2730_v42, %v4001_v40 }
0x18e3   :  { %v2741_v15 = vsub.f32 1.5, %v2740_v11 }
0x18e4   :  { %v3833_v0 = vpop.eup %3832  ;;  %v2736_v57 = vadd.f32 1e-05, %v2733_v18 }
0x18e5   :  { %v2742_v43 = vmul.f32 %v3831_v1, %v2741_v15  ;;  %v2748_v19 = vmul.f32 %v3833_v0, %v2735_v55  ;;  %vm2754_vm3 = vweird.f32 %v3833_v0 }
0x18e6   :  { %3834 = vrsqrt.f32 %v2736_v57  ;;  %vm2755_vm6 = vmor %vm2753_vm4, %vm2754_vm3  ;;  %vm2763_vm5 = vweird.f32 %v2736_v57 }
0x18e7   :  { %v2749_v47 = vmul.f32 %v3833_v0, %v2748_v19  ;;  %v2746_v61 = vsel %vm2745_vm2, %v3831_v1, %v2742_v43 }
0x18e8   :  { %v2767_v26 = vmul.f32 %v2746_v61, %v2716_v14 }
0x18e9   :  { %v2750_v24 = vmul.f32 0.5, %v2749_v47 }
0x18ea   :  { %v2771_v33 = vmul.f32 %v3649_v49, %v2767_v26 }
0x18eb   :  { %v2751_v16 = vsub.f32 1.5, %v2750_v24 }
0x18ec   :  { %v3835_v63 = vpop.eup %3834  ;;  %v2775_v38 = vadd.f32 %v3650_v9, %v2771_v33 }
0x18ed   :  { %v2752_v59 = vmul.f32 %v3833_v0, %v2751_v16  ;;  %v2758_v10 = vmul.f32 %v3835_v63, %v2736_v57  ;;  %vm2764_vm7 = vweird.f32 %v3835_v63 }
0x18ee   :  { %vm2765_vm1 = vmor %vm2763_vm5, %vm2764_vm7 }
0x18ef   :  { %v2756_v2 = vsel %vm2755_vm6, %v3833_v0, %v2752_v59  ;;  %v2759_v20 = vmul.f32 %v3835_v63, %v2758_v10 }
0x18f0   :  { %v2768_v30 = vmul.f32 %v2756_v2, %v2717_v34 }
0x18f1   :  { %v2760_v62 = vmul.f32 0.5, %v2759_v20 }
0x18f2   :  { %v2772_v36 = vmul.f32 %v3649_v49, %v2768_v30 }
0x18f3   :  { %v2761_v32 = vsub.f32 1.5, %v2760_v62 }
0x18f4   :  { %v2776_v46 = vadd.f32 %v3650_v9, %v2772_v36 }
0x18f5   :  { %v2762_v28 = vmul.f32 %v3835_v63, %v2761_v32 }
0x18f6   :  { %v2782_v14 = vpack.c.bf16 %v2776_v46, %v2775_v38 }
0x18f7   :  { %v2766_v41 = vsel %vm2765_vm1, %v3835_v63, %v2762_v28 }
0x18f8   :  { %3570 = vmatmul.msk.bf16.vlgmr.msrb.gmra.mxu0 %vm153_vm12, %v2782_v14  ;;  %v2769_v31 = vmul.f32 %v2766_v41, %v5006_v35 }
0x18fa   :  { %v2773_v48 = vmul.f32 %v3649_v49, %v2769_v31 }
0x18fc   :  { %v2777_v45 = vadd.f32 %v3650_v9, %v2773_v48 }
0x18fe   :  { %v2783_v29 = vpack.c.bf16 %v2777_v45, %v2777_v45 }
0x1908   :  { %3571 = vmatmul.msk.bf16.gmra.mxu0 %vm153_vm12, %v2783_v29 }
0x1975   :  { %v2801_v34 = vpop.f32.mrf.mxu0 }
0x197d   :  { %v2803_v39 = vpop.f32.mrf.mxu0 }
0x197e   :  { %v5035_v44 = vpack.c.bf16 %v2803_v39, %v2801_v34 }
0x1980   :  { %2957 = vrot.lane.b32.xlu0 %v5035_v44, %s3903_s7  ;;  %2961 = vrot.lane.b32.xlu1 %v5035_v44, %s3902_s6 }
0x1985   :  { %v2806_v5 = vpop.f32.mrf.mxu0 }
0x1986   :  { %v5041_v58 = vpack.c.bf16 %v2806_v5, %v2806_v5 }
0x1988   :  { %2814 = vrot.lane.b32.xlu0 %v5035_v44, %s3901_s5  ;;  %2959 = vrot.lane.b32.xlu1 %v5041_v58, %s3903_s7 }
0x1989   :  { %2963 = vrot.lane.b32.xlu2 %v5041_v58, %s3902_s6 }
0x198d   :  { %v2808_v35 = vpop.f32.mrf.mxu0 }
0x1991   :  { %2816 = vrot.lane.b32.xlu2 %v5041_v58, %s3901_s5 }
0x19e3   :  { %v2964_v6 = vpop.permute.xlu2 %2963 }
0x19e4   :  { %v2975_v13 = vsel %vm361_vm9, %v2964_v6, 0 }
0x19e5   :  { %2983 = vmatpush.bf16.xpose.msrb.mxu3 %v2975_v13 }
0x19eb   :  { %v2817_v60 = vpop.permute.xlu2 %2816 }
0x19ec   :  { %v2828_v8 = vsel %vm361_vm9, %v2817_v60, 0 }
0x19ed   :  { %2836 = vmatpush.bf16.xpose.msrb.mxu2 %v2828_v8 }
0x19f2   :  { %v2958_v21 = vpop.permute.xlu0 %2957  ;;  %v2962_v17 = vpop.permute.xlu1 %2961 }
0x19f3   :  { %v2972_v22 = vsel %vm361_vm9, %v2962_v17, 0 }
0x19f4   :  { %2984 = vmatpush.bf16.xpose.msrb.mxu3 %v2972_v22 }
0x19fa   :  { %v2815_v53 = vpop.permute.xlu0 %2814  ;;  %v2960_v1 = vpop.permute.xlu1 %2959 }
0x19fb   :  { %v2825_v27 = vsel %vm361_vm9, %v2815_v53, 0  ;;  %3576 = vmatmul.msk.bf16.vlgmr.msrb.gmra.mxu3 %vm361_vm9, %v2958_v21 }
0x19fc   :  { %2837 = vmatpush.bf16.xpose.msrb.mxu2 %v2825_v27 }
0x1a03   :  { %3572 = vmatmul.msk.bf16.vlgmr.msrb.gmra.mxu2 %vm361_vm9, %v5035_v44 }
0x1a0b   :  { %3577 = vmatmul.msk.bf16.gmra.mxu3 %vm361_vm9, %v2960_v1 }
0x1a13   :  { %3573 = vmatmul.msk.bf16.gmra.mxu2 %vm361_vm9, %v5041_v58 }
0x1a7e   :  { %v2986_v55 = vpop.f32.mrf.mxu3 }
0x1a7f   :  { %v2995_v7 = vmul.f32 0.35355338, %v2986_v55 }
0x1a81   :  { %v2998_v51 = vsel %vm395_vm10, %v2995_v7, -inf }
0x1a82   :  { %2999 = vmax.xlane.f32.xlu2 %v2998_v51 }
0x1a86   :  { %v2839_v11 = vpop.f32.mrf.mxu2  ;;  %v2988_v42 = vpop.f32.mrf.mxu3 }
0x1a87   :  { %v2848_v18 = vmul.f32 0.35355338, %v2839_v11  ;;  %v2996_v15 = vmul.f32 0.35355338, %v2988_v42 }
0x1a89   :  { %v2851_v0 = vsel %vm395_vm10, %v2848_v18, -inf  ;;  %v3001_v57 = vsel %vm395_vm10, %v2996_v15, -inf }
0x1a8a   :  { %2852 = vmax.xlane.f32.xlu1 %v2851_v0  ;;  %3002 = vmax.xlane.f32.xlu0 %v3001_v57 }
0x1a8e   :  { %v2841_v43 = vpop.f32.mrf.mxu2  ;;  %v2991_v19 = vpop.f32.mrf.mxu3 }
0x1a8f   :  { %v2849_v47 = vmul.f32 0.35355338, %v2841_v43  ;;  %v2997_v61 = vmul.f32 0.35355338, %v2991_v19 }
0x1a91   :  { %v2854_v24 = vsel %vm395_vm10, %v2849_v47, -inf  ;;  %v3004_v16 = vsel %vm402_vm11, %v2997_v61, -inf }
0x1a92   :  { %2855 = vmax.xlane.f32.xlu2 %v2854_v24  ;;  %3005 = vmax.xlane.f32.xlu0 %v3004_v16 }
0x1a96   :  { %v2844_v63 = vpop.f32.mrf.mxu2  ;;  %v2993_v49 = vpop.f32.mrf.mxu3 }
0x1a97   :  { %v2850_v48 = vmul.f32 0.35355338, %v2844_v63 }
0x1a99   :  { %v2857_v5 = vsel %vm402_vm11, %v2850_v48, -inf }
0x1a9e   :  { %v2846_v26 = vpop.f32.mrf.mxu2 }
0x1aa6   :  { %3074 = vrot.lane.b32.xlu0 %v5041_v58, %s3905_s9 }
0x1af5   :  { %v3000_v59 = vpop.xlane.xlu2 %2999 }
0x1af6   :  { %v3007_v10 = vsub.f32 %v2995_v7, %v3000_v59 }
0x1af8   :  { %v3010_v2 = vmul.f32 1.442695, %v3007_v10 }
0x1afa   :  { %3836 = vpow2.f32 %v3010_v2 }
0x1afd   :  { %v3003_v20 = vpop.xlane.xlu0 %3002  ;;  %v2853_v32 = vpop.xlane.xlu1 %2852 }
0x1afe   :  { %v3008_v9 = vsub.f32 %v2996_v15, %v3003_v20  ;;  %v2860_v14 = vsub.f32 %v2848_v18, %v2853_v32 }
0x1b00   :  { %v5068_v33 = vpop.eup %3836  ;;  %v3012_v30 = vmul.f32 1.442695, %v3008_v9  ;;  %v2863_v31 = vmul.f32 1.442695, %v2860_v14 }
0x1b01   :  { %v3016_v62 = vsel %vm395_vm10, %v5068_v33, 0.0 }
0x1b02   :  { %3017 = vadd.xlane.f32.xlu1 %v3016_v62  ;;  %3838 = vpow2.f32 %v3012_v30 }
0x1b05   :  { %v2856_v36 = vpop.xlane.xlu2 %2855  ;;  %v3006_v45 = vpop.xlane.xlu0 %3005 }
0x1b06   :  { %v2861_v38 = vsub.f32 %v2849_v47, %v2856_v36  ;;  %v3009_v34 = vsub.f32 %v2997_v61, %v3006_v45 }
0x1b08   :  { %v2865_v46 = vmul.f32 1.442695, %v2861_v38  ;;  %v5072_v28 = vpop.eup %3838  ;;  %v3014_v35 = vmul.f32 1.442695, %v3009_v34 }
0x1b09   :  { %v3019_v41 = vsel %vm395_vm10, %v5072_v28, 0.0 }
0x1b0a   :  { %3840 = vpow2.f32 %v2865_v46  ;;  %3020 = vadd.xlane.f32.xlu2 %v3019_v41 }
0x1b0b   :  { %3842 = vpow2.f32 %v2863_v31 }
0x1b0c   :  { %3844 = vpow2.f32 %v3014_v35 }
0x1b10   :  { %v5076_v29 = vpop.eup %3840 }
0x1b11   :  { %v2872_v39 = vsel %vm395_vm10, %v5076_v29, 0.0  ;;  %v5081_v6 = vpop.eup %3842 }
0x1b12   :  { %2873 = vadd.xlane.f32.xlu0 %v2872_v39  ;;  %2858 = vmax.xlane.f32.xlu2 %v2857_v5  ;;  %v2869_v8 = vsel %vm395_vm10, %v5081_v6, 0.0  ;;  %v5088_v21 = vpop.eup %3844 }
0x1b13   :  { %v3022_v17 = vsel %vm402_vm11, %v5088_v21, 0.0 }
0x1b18   :  { %v3075_v13 = vpop.permute.xlu0 %3074 }
0x1b19   :  { %v3084_v60 = vand.u32 %v3075_v13, %v4132_v54 }
0x1b1a   :  { %2870 = vadd.xlane.f32.xlu2 %v2869_v8 }
0x1b1b   :  { %3072 = vrot.lane.b32.xlu1 %v5035_v44, %s3905_s9  ;;  %3092 = vmatpush.bf16.msra.mxu0 %v3084_v60 }
0x1b22   :  { %3023 = vadd.xlane.f32.xlu2 %v3022_v17 }
0x1b23   :  { %2927 = vrot.lane.b32.xlu1 %v5041_v58, %s3904_s8 }
0x1b3a   :  { %2925 = vrot.lane.b32.xlu2 %v5035_v44, %s3904_s8 }
0x1b75   :  { %v3018_v22 = vpop.xlane.xlu1 %3017 }
0x1b76   :  { %3846 = vrcp.f32 %v3018_v22  ;;  %v3036_v58 = vand.u32 2147483648, %v3018_v22  ;;  %vm3030_vm14 = vweird.f32 %v3018_v22  ;;  %v3034_v44 = vand.u32 2147483647, %v3018_v22 }
0x1b78   :  { %v3037_v16 = vor.u32 1.1754944e-38, %v3036_v58  ;;  %vm3035_vm4 = vcmp.eq.f32.partialorder %v3034_v44, 8.507059e+37 }
0x1b7c   :  { %v3847_v53 = vpop.eup %3846 }
0x1b7d   :  { %v3026_v27 = vmul.f32 %v3847_v53, %v3018_v22  ;;  %v3021_v1 = vpop.xlane.xlu2 %3020  ;;  %vm3031_vm8 = vweird.f32 %v3847_v53 }
0x1b7e   :  { %3848 = vrcp.f32 %v3021_v1  ;;  %vm3032_vm2 = vmor %vm3030_vm14, %vm3031_vm8  ;;  %v3051_v43 = vand.u32 2147483648, %v3021_v1  ;;  %v3049_v24 = vand.u32 2147483647, %v3021_v1  ;;  %vm3045_vm6 = vweird.f32 %v3021_v1 }
0x1b7f   :  { %v3027_v55 = vsub.f32 1.0, %v3026_v27 }
0x1b80   :  { %v3052_v59 = vor.u32 1.1754944e-38, %v3051_v43  ;;  %vm3050_vm5 = vcmp.eq.f32.partialorder %v3049_v24, 8.507059e+37 }
0x1b81   :  { %v3028_v7 = vmul.f32 %v3847_v53, %v3027_v55 }
0x1b83   :  { %v3029_v42 = vadd.f32 %v3847_v53, %v3028_v7 }
0x1b84   :  { %v3849_v51 = vpop.eup %3848 }
0x1b85   :  { %v5096_v11 = vpop.xlane.xlu0 %2873  ;;  %v3041_v18 = vmul.f32 %v3849_v51, %v3021_v1  ;;  %v2859_v15 = vpop.xlane.xlu2 %2858  ;;  %v3033_v47 = vsel %vm3032_vm2, %v3847_v53, %v3029_v42  ;;  %vm3046_vm3 = vweird.f32 %v3849_v51 }
0x1b86   :  { %3850 = vrcp.f32 %v5096_v11  ;;  %v2862_v0 = vsub.f32 %v2850_v48, %v2859_v15  ;;  %v3038_v26 = vsel %vm3035_vm4, %v3037_v16, %v3033_v47  ;;  %vm3047_vm7 = vmor %vm3045_vm6, %vm3046_vm3  ;;  %vm2898_vm8 = vweird.f32 %v5096_v11 }
0x1b87   :  { %v3042_v57 = vsub.f32 1.0, %v3041_v18  ;;  %v3039_v36 = vmul.f32 %v5068_v33, %v3038_v26  ;;  %v2902_v5 = vand.u32 2147483647, %v5096_v11 }
0x1b88   :  { %v2867_v19 = vmul.f32 1.442695, %v2862_v0 }
0x1b89   :  { %v3043_v61 = vmul.f32 %v3849_v51, %v3042_v57  ;;  %vm2903_vm2 = vcmp.eq.f32.partialorder %v2902_v5, 8.507059e+37 }
0x1b8a   :  { %3852 = vpow2.f32 %v2867_v19 }
0x1b8b   :  { %v3044_v49 = vadd.f32 %v3849_v51, %v3043_v61 }
0x1b8c   :  { %v3851_v63 = vpop.eup %3850 }
0x1b8d   :  { %v2894_v10 = vmul.f32 %v3851_v63, %v5096_v11  ;;  %v3073_v2 = vpop.permute.xlu1 %3072  ;;  %v3048_v20 = vsel %vm3047_vm7, %v3849_v51, %v3044_v49  ;;  %v2871_v9 = vpop.xlane.xlu2 %2870  ;;  %vm2899_vm1 = vweird.f32 %v3851_v63 }
0x1b8e   :  { %3093 = vmatpush.bf16.msra.mxu0 %v3073_v2  ;;  %v3053_v30 = vsel %vm3050_vm5, %v3052_v59, %v3048_v20  ;;  %3854 = vrcp.f32 %v2871_v9  ;;  %v2889_v13 = vand.u32 2147483648, %v2871_v9  ;;  %v2887_v17 = vand.u32 2147483647, %v2871_v9  ;;  %v3120_v2 = vld [vmem:[%s5373_s1 + $0x188] sm:$0xff] }
0x1b8f   :  { %v2895_v62 = vsub.f32 1.0, %v2894_v10  ;;  %v3054_v32 = vmul.f32 %v5072_v28, %v3053_v30  ;;  %v2904_v28 = vand.u32 2147483648, %v5096_v11  ;;  %vm2883_vm3 = vweird.f32 %v2871_v9  ;;  %v3119_v10 = vld [vmem:[%s5373_s1 + $0x180] sm:$0xff] }
0x1b90   :  { %v5102_v38 = vpop.eup %3852  ;;  %v2890_v1 = vor.u32 1.1754944e-38, %v2889_v13  ;;  %vm2888_vm6 = vcmp.eq.f32.partialorder %v2887_v17, 8.507059e+37 }
0x1b91   :  { %v3070_v46 = vpack.c.bf16 %v3054_v32, %v3039_v36  ;;  %v2896_v14 = vmul.f32 %v3851_v63, %v2895_v62  ;;  %v2875_v41 = vsel %vm402_vm11, %v5102_v38, 0.0  ;;  %vm2900_vm11 = vmor %vm2898_vm8, %vm2899_vm1  ;;  %v2905_v22 = vor.u32 1.1754944e-38, %v2904_v28 }
0x1b92   :  { %2876 = vadd.xlane.f32.xlu1 %v2875_v41 }
0x1b93   :  { %3578 = vmatmul.msk.bf16.vlgmr.msra.gmra.mxu0 %vm395_vm10, %v3070_v46  ;;  %v2897_v45 = vadd.f32 %v3851_v63, %v2896_v14 }
0x1b94   :  { %v3855_v31 = vpop.eup %3854 }
0x1b95   :  { %v2928_v48 = vpop.permute.xlu1 %2927  ;;  %v2879_v34 = vmul.f32 %v3855_v31, %v2871_v9  ;;  %v3024_v33 = vpop.xlane.xlu2 %3023  ;;  %v2901_v60 = vsel %vm2900_vm11, %v3851_v63, %v2897_v45  ;;  %vm2884_vm14 = vweird.f32 %v3855_v31  ;;  %v3123_v9 = vpack.c.bf16 %v3120_v2, %v3119_v10 }
0x1b96   :  { %v2937_v39 = vand.u32 %v2928_v48, %v4132_v54  ;;  %3856 = vrcp.f32 %v3024_v33  ;;  %v2906_v27 = vsel %vm2903_vm2, %v2905_v22, %v2901_v60  ;;  %vm2885_vm4 = vmor %vm2883_vm3, %vm2884_vm14  ;;  %v3066_v58 = vand.u32 2147483648, %v3024_v33 }
0x1b97   :  { %v2880_v35 = vsub.f32 1.0, %v2879_v34  ;;  %v2907_v42 = vmul.f32 %v5076_v29, %v2906_v27  ;;  %v3064_v57 = vand.u32 2147483647, %v3024_v33  ;;  %vm3060_vm5 = vweird.f32 %v3024_v33  ;;  %3137 = vmatpush.bf16.msra.mxu2 %v3123_v9 }
0x1b98   :  { %2945 = vmatpush.bf16.msrb.mxu1 %v2937_v39  ;;  %v3067_v19 = vor.u32 1.1754944e-38, %v3066_v58 }
0x1b99   :  { %v2881_v8 = vmul.f32 %v3855_v31, %v2880_v35  ;;  %vm3065_vm8 = vcmp.eq.f32.partialorder %v3064_v57, 8.507059e+37 }
0x1b9b   :  { %v2882_v53 = vadd.f32 %v3855_v31, %v2881_v8 }
0x1b9c   :  { %v3857_v54 = vpop.eup %3856 }
0x1b9d   :  { %v2886_v55 = vsel %vm2885_vm4, %v3855_v31, %v2882_v53  ;;  %v3056_v7 = vmul.f32 %v3857_v54, %v3024_v33  ;;  %v2926_v51 = vpop.permute.xlu2 %2925  ;;  %vm3061_vm7 = vweird.f32 %v3857_v54 }
0x1b9e   :  { %v2891_v11 = vsel %vm2888_vm6, %v2890_v1, %v2886_v55  ;;  %2946 = vmatpush.bf16.msrb.mxu1 %v2926_v51  ;;  %vm3062_vm1 = vmor %vm3060_vm5, %vm3061_vm7 }
0x1b9f   :  { %v2892_v18 = vmul.f32 %v5081_v6, %v2891_v11  ;;  %v3057_v15 = vsub.f32 1.0, %v3056_v7 }
0x1ba1   :  { %v2923_v0 = vpack.c.bf16 %v2907_v42, %v2892_v18  ;;  %v3058_v44 = vmul.f32 %v3857_v54, %v3057_v15 }
0x1ba3   :  { %v3059_v43 = vadd.f32 %v3857_v54, %v3058_v44  ;;  %3574 = vmatmul.msk.bf16.vlgmr.msrb.gmra.mxu1 %vm395_vm10, %v2923_v0 }
0x1ba5   :  { %v3063_v47 = vsel %vm3062_vm1, %v3857_v54, %v3059_v43  ;;  %v3651_v54 = vld [vmem:[%s5373_s1 + $0x190] ss:$0 sm:$0xff] }
0x1ba6   :  { %v3068_v61 = vsel %vm3065_vm8, %v3067_v19, %v3063_v47 }
0x1ba7   :  { %v3069_v24 = vmul.f32 %v5088_v21, %v3068_v61 }
0x1ba9   :  { %v3071_v29 = vpack.c.bf16 %v3069_v24, %v3069_v24 }
0x1bab   :  { %3579 = vmatmul.msk.bf16.gmra.mxu0 %vm395_vm10, %v3071_v29 }
0x1c05   :  { %v2877_v6 = vpop.xlane.xlu1 %2876 }
0x1c06   :  { %3858 = vrcp.f32 %v2877_v6  ;;  %v2919_v26 = vand.u32 2147483648, %v2877_v6  ;;  %v2917_v21 = vand.u32 2147483647, %v2877_v6  ;;  %vm2913_vm14 = vweird.f32 %v2877_v6 }
0x1c08   :  { %v2920_v62 = vor.u32 1.1754944e-38, %v2919_v26  ;;  %vm2918_vm3 = vcmp.eq.f32.partialorder %v2917_v21, 8.507059e+37  ;;  %v1706_v26 = vadd.f32 %v4832_v23, %v4645_v37  ;;  %v1705_v37 = vadd.f32 %v4827_v56, %v4574_v50  ;;  %v3232_v56 = vld [vmem:[%s5373_s1 + $0x1a8] sm:$0xff] }
0x1c0c   :  { %v3859_v16 = vpop.eup %3858 }
0x1c0d   :  { %v2909_v63 = vmul.f32 %v3859_v16, %v2877_v6  ;;  %vm2914_vm11 = vweird.f32 %v3859_v16  ;;  %v1704_v6 = vadd.f32 %v4825_v4, %v4601_v25 }
0x1c0e   :  { %vm2915_vm2 = vmor %vm2913_vm14, %vm2914_vm11 }
0x1c0f   :  { %v2910_v49 = vsub.f32 1.0, %v2909_v63 }
0x1c10   :  { %v3095_v59 = vpop.f32.mrf.mxu0 }
0x1c11   :  { %v2911_v20 = vmul.f32 %v3859_v16, %v2910_v49 }
0x1c13   :  { %v2912_v30 = vadd.f32 %v3859_v16, %v2911_v20 }
0x1c15   :  { %v2916_v36 = vsel %vm2915_vm2, %v3859_v16, %v2912_v30  ;;  %v3643_v16 = vld [vmem:[%s5373_s1 + $0x210] ss:$0 sm:$0xff] }
0x1c16   :  { %v2921_v32 = vsel %vm2918_vm3, %v2920_v62, %v2916_v36  ;;  %v1709_v49 = vadd.f32 %v3643_v16, %v1704_v6  ;;  %v5171_v10 = vadd.f32 %v3643_v16, %v1706_v26  ;;  %v5184_v9 = vadd.f32 %v3643_v16, %v1705_v37  ;;  %v3234_v62 = vld [vmem:[%s5373_s1 + $0x1b8] sm:$0xff]  ;;  %v3235_v36 = vld [vmem:[%s5373_s1 + $0x1c0] sm:$0xff] }
0x1c17   :  { %v2922_v46 = vmul.f32 %v5102_v38, %v2921_v32  ;;  %v3239_v32 = vpack.c.bf16 %v3235_v36, %v3234_v62 }
0x1c18   :  { %v3097_v14 = vpop.f32.mrf.mxu0  ;;  %v1718_v2 = vsel %vm160_vm13, %v5171_v10, 0.0  ;;  %v1715_v30 = vsel %vm153_vm12, %v5184_v9, 0.0 }
0x1c19   :  { %v3617_v41 = vpack.i.bf16 %v3097_v14, %v3095_v59  ;;  %v2924_v31 = vpack.c.bf16 %v2922_v46, %v2922_v46  ;;  %v1712_v59 = vsel %vm153_vm12, %v1709_v49, 0.0  ;;  %3254 = vmatpush.bf16.msra.mxu1 %v3239_v32  ;;  %v3233_v14 = vld [vmem:[%s5373_s1 + $0x1b0] sm:$0xff] }
0x1c1b   :  { %3618 = vrot.lane.b32.xlu2 %v3617_v41, %s3907_s10  ;;  %3575 = vmatmul.msk.bf16.gmra.mxu1 %vm395_vm10, %v2924_v31  ;;  %v3238_v31 = vpack.c.bf16 %v3233_v14, %v3232_v56 }
0x1c1d   :  { %3255 = vmatpush.bf16.msra.mxu1 %v3238_v31  ;;  %v5232_v31 = vld [vmem:[%s5373_s1 + $0x220] ss:$0 sm:$0xff] }
0x1c20   :  { %v2948_v34 = vpop.f32.mrf.mxu1 }
0x1c28   :  { %v3100_v48 = vpop.f32.mrf.mxu0  ;;  %v2950_v5 = vpop.f32.mrf.mxu1 }
0x1c29   :  { %3111 = vrot.lane.b32.xlu2 %v3100_v48, %s3907_s10 }
0x1c30   :  { %v3102_v45 = vpop.f32.mrf.mxu0 }
0x1c75   :  { %v3619_v39 = vpop.permute.xlu2 %3618 }
0x1c76   :  { %v3621_v33 = vunpack.i.h.bf16 %v3619_v39  ;;  %v3620_v28 = vunpack.i.l.bf16 %v3619_v39 }
0x1c78   :  { %v3116_v35 = vsel %vm361_vm9, %v2948_v34, %v3620_v28  ;;  %v3117_v38 = vsel %vm361_vm9, %v2950_v5, %v3621_v33 }
0x1c79   :  { %v3121_v13 = vpack.c.bf16 %v3117_v38, %v3116_v35 }
0x1c7b   :  { %3580 = vmatmul.msk.bf16.vlgmr.msra.gmra.mxu2 %vm673_vm15, %v3121_v13 }
0x1c83   :  { %v3112_v60 = vpop.permute.xlu2 %3111 }
0x1c98   :  { %v2953_v8 = vpop.f32.mrf.mxu1 }
0x1c99   :  { %v3118_v17 = vsel %vm361_vm9, %v2953_v8, %v3112_v60 }
0x1c9a   :  { %v3122_v22 = vpack.c.bf16 %v3118_v17, %v3118_v17 }
0x1c9c   :  { %3581 = vmatmul.msk.bf16.gmra.mxu2 %vm673_vm15, %v3122_v22 }
0x1ca0   :  { %v2955_v53 = vpop.f32.mrf.mxu1 }
0x1cfe   :  { %v3139_v27 = vpop.f32.mrf.mxu2 }
0x1cff   :  { %v3148_v1 = vadd.f32 %v3139_v27, %v4984_v52 }
0x1d01   :  { %v5135_v55 = vadd.f32 %v3651_v54, %v3148_v1 }
0x1d03   :  { %v3158_v7 = vsel %vm153_vm12, %v5135_v55, 0.0 }
0x1d04   :  { %3159 = vadd.xlane.f32.xlu0 %v3158_v7 }
0x1d06   :  { %v3141_v51 = vpop.f32.mrf.mxu2 }
0x1d07   :  { %v3149_v11 = vadd.f32 %v3141_v51, %v4989_v3 }
0x1d09   :  { %v5140_v42 = vadd.f32 %v3651_v54, %v3149_v11  ;;  %v3652_v11 = vld [vmem:[%s5373_s1 + $0x198] ss:$0 sm:$0xff] }
0x1d0b   :  { %v3161_v18 = vsel %vm153_vm12, %v5140_v42, 0.0 }
0x1d0c   :  { %3162 = vadd.xlane.f32.xlu2 %v3161_v18 }
0x1d1f   :  { %v3144_v15 = vpop.f32.mrf.mxu2 }
0x1d20   :  { %v3150_v58 = vadd.f32 %v3144_v15, %v4994_v12 }
0x1d22   :  { %v5145_v0 = vadd.f32 %v3651_v54, %v3150_v58 }
0x1d24   :  { %v3164_v52 = vsel %vm160_vm13, %v5145_v0, 0.0 }
0x1d25   :  { %3165 = vadd.xlane.f32.xlu0 %v3164_v52  ;;  %v3653_v52 = vld [vmem:[%s5373_s1 + $0x1a0] ss:$0 sm:$0xff] }
0x1d27   :  { %v3146_v44 = vpop.f32.mrf.mxu2 }
0x1d77   :  { %v3160_v57 = vpop.xlane.xlu0 %3159 }
0x1d78   :  { %v3167_v43 = vmul.f32 %v3160_v57, %v4001_v40 }
0x1d7a   :  { %v5151_v3 = vsub.f32 %v5135_v55, %v3167_v43 }
0x1d7c   :  { %v3173_v19 = vmul.f32 %v5151_v3, %v5151_v3 }
0x1d7e   :  { %v3176_v47 = vsel %vm153_vm12, %v3173_v19, 0.0 }
0x1d7f   :  { %v3163_v61 = vpop.xlane.xlu2 %3162  ;;  %3177 = vadd.xlane.f32.xlu0 %v3176_v47 }
0x1d80   :  { %v3168_v12 = vmul.f32 %v3163_v61, %v4001_v40 }
0x1d82   :  { %v5158_v24 = vsub.f32 %v5140_v42, %v3168_v12 }
0x1d84   :  { %v3174_v29 = vmul.f32 %v5158_v24, %v5158_v24 }
0x1d86   :  { %v3179_v63 = vsel %vm153_vm12, %v3174_v29, 0.0 }
0x1d87   :  { %3180 = vadd.xlane.f32.xlu1 %v3179_v63 }
0x1d8f   :  { %1713 = vadd.xlane.f32.xlu1 %v1712_v59 }
0x1d97   :  { %1719 = vadd.xlane.f32.xlu1 %v1718_v2 }
0x1d98   :  { %v3166_v25 = vpop.xlane.xlu0 %3165 }
0x1d99   :  { %v3169_v4 = vmul.f32 %v3166_v25, %v4001_v40 }
0x1d9b   :  { %v5177_v20 = vsub.f32 %v5145_v0, %v3169_v4 }
0x1d9d   :  { %v3175_v21 = vmul.f32 %v5177_v20, %v5177_v20 }
0x1d9f   :  { %v3182_v23 = vsel %vm160_vm13, %v3175_v21, 0.0 }
0x1da0   :  { %3183 = vadd.xlane.f32.xlu0 %v3182_v23 }
0x1da8   :  { %1716 = vadd.xlane.f32.xlu0 %v1715_v30 }
0x1df2   :  { %v3178_v46 = vpop.xlane.xlu0 %3177 }
0x1df3   :  { %v3185_v50 = vmul.f32 %v3178_v46, %v4001_v40 }
0x1df5   :  { %v3188_v41 = vadd.f32 1e-05, %v3185_v50 }
0x1df7   :  { %3860 = vrsqrt.f32 %v3188_v41  ;;  %vm3197_vm10 = vweird.f32 %v3188_v41 }
0x1dfa   :  { %v3181_v48 = vpop.xlane.xlu1 %3180 }
0x1dfb   :  { %v3186_v45 = vmul.f32 %v3181_v48, %v4001_v40 }
0x1dfd   :  { %v3861_v34 = vpop.eup %3860  ;;  %v3189_v39 = vadd.f32 1e-05, %v3186_v45 }
0x1dfe   :  { %v3192_v33 = vmul.f32 %v3861_v34, %v3188_v41  ;;  %vm3198_vm9 = vweird.f32 %v3861_v34  ;;  %v3656_v41 = vld [vmem:[%s5373_s1 + $0x1c8] ss:$0 sm:$0xff] }
0x1dff   :  { %3862 = vrsqrt.f32 %v3189_v39  ;;  %vm3199_vm15 = vmor %vm3197_vm10, %vm3198_vm9  ;;  %vm3207_vm6 = vweird.f32 %v3189_v39 }
0x1e00   :  { %v3193_v28 = vmul.f32 %v3861_v34, %v3192_v33 }
0x1e02   :  { %v3194_v5 = vmul.f32 0.5, %v3193_v28  ;;  %v1714_v35 = vpop.xlane.xlu1 %1713 }
0x1e03   :  { %v1721_v38 = vmul.f32 %v1714_v35, %v4001_v40 }
0x1e04   :  { %v3195_v13 = vsub.f32 1.5, %v3194_v5 }
0x1e05   :  { %v3863_v60 = vpop.eup %3862  ;;  %v5203_v8 = vsub.f32 %v1709_v49, %v1721_v38 }
0x1e06   :  { %v3196_v17 = vmul.f32 %v3861_v34, %v3195_v13  ;;  %v3202_v22 = vmul.f32 %v3863_v60, %v3189_v39  ;;  %vm3208_vm4 = vweird.f32 %v3863_v60 }
0x1e07   :  { %v1727_v53 = vmul.f32 %v5203_v8, %v5203_v8  ;;  %vm3209_vm7 = vmor %vm3207_vm6, %vm3208_vm4 }
0x1e08   :  { %v3203_v54 = vmul.f32 %v3863_v60, %v3202_v22  ;;  %v3200_v1 = vsel %vm3199_vm15, %v3861_v34, %v3196_v17 }
0x1e09   :  { %v1730_v27 = vsel %vm153_vm12, %v1727_v53, 0.0  ;;  %v3221_v18 = vmul.f32 %v3200_v1, %v5151_v3 }
0x1e0a   :  { %v3204_v7 = vmul.f32 0.5, %v3203_v54  ;;  %1731 = vadd.xlane.f32.xlu2 %v1730_v27 }
0x1e0b   :  { %v3225_v44 = vmul.f32 %v3652_v11, %v3221_v18 }
0x1e0c   :  { %v3205_v51 = vsub.f32 1.5, %v3204_v7  ;;  %v3392_v7 = vld [vmem:[%s5373_s1 + $0x200] sm:$0xff] }
0x1e0d   :  { %v3229_v61 = vadd.f32 %v3653_v52, %v3225_v44  ;;  %v3390_v44 = vld [vmem:[%s5373_s1 + $0x1f0] sm:$0xff] }
0x1e0e   :  { %v3206_v15 = vmul.f32 %v3863_v60, %v3205_v51  ;;  %v3393_v51 = vld [vmem:[%s5373_s1 + $0x208] sm:$0xff] }
0x1e10   :  { %v3210_v58 = vsel %vm3209_vm7, %v3863_v60, %v3206_v15  ;;  %v3399_v15 = vpack.c.bf16 %v3393_v51, %v3392_v7 }
0x1e11   :  { %v3222_v57 = vmul.f32 %v3210_v58, %v5158_v24 }
0x1e12   :  { %3410 = vmatpush.bf16.msra.mxu3 %v3399_v15 }
0x1e13   :  { %v3226_v43 = vmul.f32 %v3652_v11, %v3222_v57  ;;  %v3184_v19 = vpop.xlane.xlu0 %3183  ;;  %v3391_v57 = vld [vmem:[%s5373_s1 + $0x1f8] sm:$0xff] }
0x1e14   :  { %v3187_v47 = vmul.f32 %v3184_v19, %v4001_v40  ;;  %v3398_v19 = vpack.c.bf16 %v3391_v57, %v3390_v44 }
0x1e15   :  { %v3230_v12 = vadd.f32 %v3653_v52, %v3226_v43 }
0x1e16   :  { %v3190_v29 = vadd.f32 1e-05, %v3187_v47  ;;  %3411 = vmatpush.bf16.msra.mxu3 %v3398_v19 }
0x1e17   :  { %v3236_v6 = vpack.c.bf16 %v3230_v12, %v3229_v61 }
0x1e18   :  { %3864 = vrsqrt.f32 %v3190_v29  ;;  %vm3217_vm1 = vweird.f32 %v3190_v29 }
0x1e19   :  { %3582 = vmatmul.msk.bf16.vlgmr.msra.gmra.mxu1 %vm153_vm12, %v3236_v6 }
0x1e1e   :  { %v3865_v3 = vpop.eup %3864 }
0x1e1f   :  { %v3212_v16 = vmul.f32 %v3865_v3, %v3190_v29  ;;  %vm3218_vm5 = vweird.f32 %v3865_v3 }
0x1e20   :  { %vm3219_vm8 = vmor %vm3217_vm1, %vm3218_vm5 }
0x1e21   :  { %v3213_v63 = vmul.f32 %v3865_v3, %v3212_v16 }
0x1e23   :  { %v3214_v49 = vmul.f32 0.5, %v3213_v63 }
0x1e25   :  { %v3215_v26 = vsub.f32 1.5, %v3214_v49  ;;  %v3388_v49 = vld [vmem:[%s5373_s1 + $0x1e0] sm:$0xff] }
0x1e27   :  { %v3216_v59 = vmul.f32 %v3865_v3, %v3215_v26  ;;  %v3389_v26 = vld [vmem:[%s5373_s1 + $0x1e8] sm:$0xff] }
0x1e29   :  { %v3220_v24 = vsel %vm3219_vm8, %v3865_v3, %v3216_v59 }
0x1e2a   :  { %v3223_v2 = vmul.f32 %v3220_v24, %v5177_v20  ;;  %v5224_v20 = vld [vmem:[%s5373_s1 + $0x218] ss:$0 sm:$0xff] }
0x1e2c   :  { %v3227_v25 = vmul.f32 %v3652_v11, %v3223_v2  ;;  %v3397_v2 = vpack.c.bf16 %v3389_v26, %v3388_v49 }
0x1e2e   :  { %v3231_v4 = vadd.f32 %v3653_v52, %v3227_v25  ;;  %3412 = vmatpush.bf16.msra.mxu3 %v3397_v2 }
0x1e30   :  { %v3237_v21 = vpack.c.bf16 %v3231_v4, %v3231_v4 }
0x1e32   :  { %3583 = vmatmul.msk.bf16.gmra.mxu1 %vm153_vm12, %v3237_v21 }
0x1e7d   :  { %v1732_v37 = vpop.xlane.xlu2 %1731 }
0x1e7e   :  { %v1739_v23 = vmul.f32 %v1732_v37, %v4001_v40 }
0x1e80   :  { %v1742_v30 = vadd.f32 1e-05, %v1739_v23 }
0x1e82   :  { %3866 = vrsqrt.f32 %v1742_v30  ;;  %vm1751_vm14 = vweird.f32 %v1742_v30 }
0x1e88   :  { %v3867_v62 = vpop.eup %3866 }
0x1e89   :  { %v1746_v36 = vmul.f32 %v3867_v62, %v1742_v30  ;;  %vm1752_vm11 = vweird.f32 %v3867_v62 }
0x1e8a   :  { %vm1753_vm2 = vmor %vm1751_vm14, %vm1752_vm11 }
0x1e8b   :  { %v1747_v32 = vmul.f32 %v3867_v62, %v1746_v36  ;;  %v3386_v36 = vld [vmem:[%s5373_s1 + $0x1d0] sm:$0xff] }
0x1e8d   :  { %v1748_v46 = vmul.f32 0.5, %v1747_v32  ;;  %v3387_v32 = vld [vmem:[%s5373_s1 + $0x1d8] sm:$0xff] }
0x1e8f   :  { %v1749_v50 = vsub.f32 1.5, %v1748_v46 }
0x1e91   :  { %v1750_v56 = vmul.f32 %v3867_v62, %v1749_v50 }
0x1e93   :  { %v1754_v14 = vsel %vm1753_vm2, %v3867_v62, %v1750_v56  ;;  %v3396_v56 = vpack.c.bf16 %v3387_v32, %v3386_v36 }
0x1e94   :  { %v1775_v48 = vmul.f32 %v1754_v14, %v5203_v8 }
0x1e95   :  { %3413 = vmatpush.bf16.msra.mxu3 %v3396_v56 }
0x1e96   :  { %v1779_v45 = vmul.f32 %v5224_v20, %v1775_v48  ;;  %v3257_v34 = vpop.f32.mrf.mxu1 }
0x1e97   :  { %v5236_v39 = vadd.f32 %v3656_v41, %v3257_v34 }
0x1e98   :  { %v1783_v33 = vadd.f32 %v5232_v31, %v1779_v45 }
0x1e99   :  { %v5240_v28 = vmul.f32 0.70710677, %v5236_v39 }
0x1e9a   :  { %v1786_v5 = vsel %vm153_vm12, %v1783_v33, 0.0 }
0x1e9b   :  { %1789 = vst [vmem:[%s5374_s2] sm:$0xff] %v1786_v5  ;;  %v3272_v35 = vand.u32 2147483647, %v5240_v28  ;;  %vm3371_vm2 = vcmp.ge.f32.partialorder %v5240_v28, 0.0 }
0x1e9d   :  { %v3275_v38 = vmul.f32 0.3275911, %v3272_v35  ;;  %v3353_v16 = vsub.f32 0.0, %v3272_v35 }
0x1e9e   :  { %v3259_v13 = vpop.f32.mrf.mxu1 }
0x1e9f   :  { %v3278_v60 = vadd.f32 1.0, %v3275_v38  ;;  %v5247_v8 = vadd.f32 %v3656_v41, %v3259_v13  ;;  %v3356_v23 = vmul.f32 %v3353_v16, %v3272_v35 }
0x1ea1   :  { %3868 = vrcp.f32 %v3278_v60  ;;  %v5250_v17 = vmul.f32 0.70710677, %v5247_v8  ;;  %v3292_v18 = vand.u32 2147483648, %v3278_v60  ;;  %v3290_v52 = vand.u32 2147483647, %v3278_v60 }
0x1ea2   :  { %vm3286_vm9 = vweird.f32 %v3278_v60  ;;  %v3359_v33 = vmul.f32 1.442695, %v3356_v23 }
0x1ea3   :  { %v5253_v22 = vand.u32 2147483647, %v5250_v17  ;;  %v3293_v47 = vor.u32 1.1754944e-38, %v3292_v18  ;;  %vm3291_vm15 = vcmp.eq.f32.partialorder %v3290_v52, 8.507059e+37 }
0x1ea5   :  { %v3276_v53 = vmul.f32 0.3275911, %v5253_v22  ;;  %v3354_v13 = vsub.f32 0.0, %v5253_v22 }
0x1ea7   :  { %v3869_v54 = vpop.eup %3868  ;;  %v3279_v1 = vadd.f32 1.0, %v3276_v53 }
0x1ea8   :  { %v3282_v27 = vmul.f32 %v3869_v54, %v3278_v60  ;;  %vm3287_vm3 = vweird.f32 %v3869_v54 }
0x1ea9   :  { %3870 = vrcp.f32 %v3279_v1  ;;  %vm3288_vm10 = vmor %vm3286_vm9, %vm3287_vm3  ;;  %v3307_v21 = vand.u32 2147483648, %v3279_v1  ;;  %v3305_v62 = vand.u32 2147483647, %v3279_v1  ;;  %vm3301_vm6 = vweird.f32 %v3279_v1 }
0x1eaa   :  { %v3283_v11 = vsub.f32 1.0, %v3282_v27  ;;  %vm3372_vm3 = vcmp.ge.f32.partialorder %v5250_v17, 0.0 }
0x1eab   :  { %v3308_v45 = vor.u32 1.1754944e-38, %v3307_v21  ;;  %vm3306_vm5 = vcmp.eq.f32.partialorder %v3305_v62, 8.507059e+37 }
0x1eac   :  { %v3284_v58 = vmul.f32 %v3869_v54, %v3283_v11 }
0x1eae   :  { %v3285_v43 = vadd.f32 %v3869_v54, %v3284_v58 }
0x1eaf   :  { %v3262_v61 = vpop.f32.mrf.mxu1  ;;  %v3871_v12 = vpop.eup %3870 }
0x1eb0   :  { %v3289_v29 = vsel %vm3288_vm10, %v3869_v54, %v3285_v43  ;;  %v5268_v6 = vadd.f32 %v3656_v41, %v3262_v61  ;;  %v3297_v63 = vmul.f32 %v3871_v12, %v3279_v1  ;;  %vm3302_vm4 = vweird.f32 %v3871_v12 }
0x1eb1   :  { %v3294_v3 = vsel %vm3291_vm15, %v3293_v47, %v3289_v29  ;;  %vm3303_vm7 = vmor %vm3301_vm6, %vm3302_vm4  ;;  %v3357_v1 = vmul.f32 %v3354_v13, %v5253_v22 }
0x1eb2   :  { %v3326_v59 = vmul.f32 1.0614054, %v3294_v3  ;;  %v5277_v24 = vmul.f32 0.70710677, %v5268_v6  ;;  %v3298_v25 = vsub.f32 1.0, %v3297_v63 }
0x1eb3   :  { %v3361_v52 = vmul.f32 1.442695, %v3357_v1 }
0x1eb4   :  { %v3329_v4 = vadd.f32 -1.4531521, %v3326_v59  ;;  %v5280_v37 = vand.u32 2147483647, %v5277_v24  ;;  %v3299_v30 = vmul.f32 %v3871_v12, %v3298_v25  ;;  %vm3373_vm9 = vcmp.ge.f32.partialorder %v5277_v24, 0.0 }
0x1eb6   :  { %v3332_v46 = vmul.f32 %v3329_v4, %v3294_v3  ;;  %v3277_v50 = vmul.f32 0.3275911, %v5280_v37  ;;  %v3300_v14 = vadd.f32 %v3871_v12, %v3299_v30  ;;  %v3355_v2 = vsub.f32 0.0, %v5280_v37 }
0x1eb7   :  { %v3264_v41 = vpop.f32.mrf.mxu1 }
0x1eb8   :  { %v3335_v48 = vadd.f32 1.4214138, %v3332_v46  ;;  %v3280_v34 = vadd.f32 1.0, %v3277_v50  ;;  %v3304_v5 = vsel %vm3303_vm7, %v3871_v12, %v3300_v14  ;;  %v3358_v36 = vmul.f32 %v3355_v2, %v5280_v37 }
0x1eb9   :  { %v3309_v38 = vsel %vm3306_vm5, %v3308_v45, %v3304_v5  ;;  %v3267_v5 = vmul.f32 0.5, %v5247_v8  ;;  %v3268_v8 = vmul.f32 0.5, %v5268_v6 }
0x1eba   :  { %v3338_v35 = vmul.f32 %v3335_v48, %v3294_v3  ;;  %3872 = vrcp.f32 %v3280_v34  ;;  %v3327_v60 = vmul.f32 1.0614054, %v3309_v38  ;;  %v3322_v47 = vand.u32 2147483648, %v3280_v34 }
0x1ebb   :  { %3874 = vpow2.f32 %v3359_v33  ;;  %v3320_v29 = vand.u32 2147483647, %v3280_v34  ;;  %vm3316_vm8 = vweird.f32 %v3280_v34  ;;  %v3363_v48 = vmul.f32 1.442695, %v3358_v36 }
0x1ebc   :  { %v3341_v53 = vadd.f32 -0.28449672, %v3338_v35  ;;  %v3330_v54 = vadd.f32 -1.4531521, %v3327_v60  ;;  %3876 = vpow2.f32 %v3361_v52  ;;  %v3323_v49 = vor.u32 1.1754944e-38, %v3322_v47 }
0x1ebd   :  { %vm3321_vm14 = vcmp.eq.f32.partialorder %v3320_v29, 8.507059e+37  ;;  %v3266_v33 = vmul.f32 0.5, %v5236_v39  ;;  %3878 = vpow2.f32 %v3363_v48  ;;  %v1720_v29 = vpop.xlane.xlu1 %1719 }
0x1ebe   :  { %v3344_v27 = vmul.f32 %v3341_v53, %v3294_v3  ;;  %v3333_v7 = vmul.f32 %v3330_v54, %v3309_v38 }
0x1ec0   :  { %v3873_v51 = vpop.eup %3872  ;;  %v3347_v11 = vadd.f32 0.2548296, %v3344_v27  ;;  %v3336_v18 = vadd.f32 1.4214138, %v3333_v7 }
0x1ec1   :  { %v3312_v15 = vmul.f32 %v3873_v51, %v3280_v34  ;;  %v3875_v44 = vpop.eup %3874  ;;  %vm3317_vm1 = vweird.f32 %v3873_v51 }
0x1ec2   :  { %v3350_v58 = vmul.f32 %v3347_v11, %v3294_v3  ;;  %v3339_v57 = vmul.f32 %v3336_v18, %v3309_v38  ;;  %vm3318_vm11 = vmor %vm3316_vm8, %vm3317_vm1  ;;  %v3877_v23 = vpop.eup %3876 }
0x1ec3   :  { %v3313_v43 = vsub.f32 1.0, %v3312_v15  ;;  %v3879_v27 = vpop.eup %3878  ;;  %v3657_v15 = vld [vmem:[%s5373_s1 + $0x210] ss:$0 sm:$0xff] }
0x1ec4   :  { %v3365_v19 = vmul.f32 %v3875_v44, %v3350_v58  ;;  %v3342_v61 = vadd.f32 -0.28449672, %v3339_v57 }
0x1ec5   :  { %v3314_v12 = vmul.f32 %v3873_v51, %v3313_v43  ;;  %v1717_v43 = vpop.xlane.xlu0 %1716 }
0x1ec6   :  { %v3368_v16 = vsub.f32 1.0, %v3365_v19  ;;  %v3345_v63 = vmul.f32 %v3342_v61, %v3309_v38  ;;  %v1722_v6 = vmul.f32 %v1717_v43, %v4001_v40 }
0x1ec7   :  { %v3315_v22 = vadd.f32 %v3873_v51, %v3314_v12 }
0x1ec8   :  { %v3348_v26 = vadd.f32 0.2548296, %v3345_v63  ;;  %v3374_v25 = vsub.f32 0.0, %v3368_v16  ;;  %v1725_v61 = vsub.f32 %v5184_v9, %v1722_v6 }
0x1ec9   :  { %v3319_v59 = vsel %vm3318_vm11, %v3873_v51, %v3315_v22 }
0x1eca   :  { %v3324_v3 = vsel %vm3321_vm14, %v3323_v49, %v3319_v59  ;;  %v3351_v4 = vmul.f32 %v3348_v26, %v3309_v38  ;;  %v3377_v32 = vsel %vm3371_vm2, %v3368_v16, %v3374_v25  ;;  %v1728_v22 = vmul.f32 %v1725_v61, %v1725_v61 }
0x1ecb   :  { %v3328_v21 = vmul.f32 1.0614054, %v3324_v3  ;;  %v3380_v41 = vadd.f32 1.0, %v3377_v32 }
0x1ecc   :  { %v3366_v30 = vmul.f32 %v3877_v23, %v3351_v4  ;;  %v1733_v59 = vsel %vm153_vm12, %v1728_v22, 0.0 }
0x1ecd   :  { %v3331_v62 = vadd.f32 -1.4531521, %v3328_v21  ;;  %v3383_v28 = vmul.f32 %v3380_v41, %v3266_v33 }
0x1ece   :  { %v3369_v46 = vsub.f32 1.0, %v3366_v30 }
0x1ecf   :  { %v3334_v50 = vmul.f32 %v3331_v62, %v3324_v3 }
0x1ed0   :  { %v3375_v56 = vsub.f32 0.0, %v3369_v46 }
0x1ed1   :  { %v3337_v14 = vadd.f32 1.4214138, %v3334_v50 }
0x1ed2   :  { %v3378_v45 = vsel %vm3372_vm3, %v3369_v46, %v3375_v56 }
0x1ed3   :  { %v3340_v34 = vmul.f32 %v3337_v14, %v3324_v3  ;;  %v3381_v35 = vadd.f32 1.0, %v3378_v45 }
0x1ed5   :  { %v3343_v38 = vadd.f32 -0.28449672, %v3340_v34  ;;  %v3384_v13 = vmul.f32 %v3381_v35, %v3267_v5 }
0x1ed7   :  { %v3346_v37 = vmul.f32 %v3343_v38, %v3324_v3  ;;  %v3394_v60 = vpack.c.bf16 %v3384_v13, %v3383_v28 }
0x1ed9   :  { %v3349_v53 = vadd.f32 0.2548296, %v3346_v37  ;;  %3584 = vmatmul.msk.bf16.vlgmr.msra.gmra.mxu3 %vm39_vm0, %v3394_v60 }
0x1edb   :  { %v3352_v54 = vmul.f32 %v3349_v53, %v3324_v3 }
0x1edd   :  { %v3367_v17 = vmul.f32 %v3879_v27, %v3352_v54 }
0x1edf   :  { %v3370_v1 = vsub.f32 1.0, %v3367_v17 }
0x1ee1   :  { %v3376_v7 = vsub.f32 0.0, %v3370_v1 }
0x1ee3   :  { %v3379_v39 = vsel %vm3373_vm9, %v3370_v1, %v3376_v7 }
0x1ee4   :  { %v3382_v51 = vadd.f32 1.0, %v3379_v39 }
0x1ee6   :  { %v3385_v11 = vmul.f32 %v3382_v51, %v3268_v8 }
0x1ee8   :  { %v3395_v18 = vpack.c.bf16 %v3385_v11, %v3385_v11 }
0x1eea   :  { %3585 = vmatmul.msk.bf16.gmra.mxu3 %vm39_vm0, %v3395_v18 }
0x1f5c   :  { %v3415_v58 = vpop.f32.mrf.mxu3 }
0x1f5d   :  { %v3424_v52 = vadd.f32 %v3415_v58, %v5135_v55  ;;  %v1723_v55 = vmul.f32 %v1720_v29, %v4001_v40 }
0x1f5f   :  { %v3429_v44 = vadd.f32 %v3657_v15, %v3424_v52  ;;  %v1726_v26 = vsub.f32 %v5171_v10, %v1723_v55 }
0x1f61   :  { %v3432_v57 = vsel %vm153_vm12, %v3429_v44, 0.0  ;;  %v1729_v3 = vmul.f32 %v1726_v26, %v1726_v26 }
0x1f62   :  { %3433 = vadd.xlane.f32.xlu0 %v3432_v57 }
0x1f63   :  { %v1736_v2 = vsel %vm160_vm13, %v1729_v3, 0.0 }
0x1f64   :  { %v3417_v24 = vpop.f32.mrf.mxu3 }
0x1f65   :  { %v3425_v19 = vadd.f32 %v3417_v24, %v5140_v42 }
0x1f67   :  { %v3430_v47 = vadd.f32 %v3657_v15, %v3425_v19 }
0x1f69   :  { %v3435_v12 = vsel %vm153_vm12, %v3430_v47, 0.0 }
0x1f6a   :  { %3436 = vadd.xlane.f32.xlu1 %v3435_v12 }
0x1f6d   :  { %v3420_v16 = vpop.f32.mrf.mxu3 }
0x1f6e   :  { %v3426_v63 = vadd.f32 %v3420_v16, %v5145_v0 }
0x1f70   :  { %v3431_v49 = vadd.f32 %v3657_v15, %v3426_v63 }
0x1f72   :  { %v3438_v42 = vsel %vm160_vm13, %v3431_v49, 0.0  ;;  %1734 = vadd.xlane.f32.xlu1 %v1733_v59 }
0x1f73   :  { %3439 = vadd.xlane.f32.xlu0 %v3438_v42 }
0x1f75   :  { %v3422_v9 = vpop.f32.mrf.mxu3 }
0x1f7b   :  { %1737 = vadd.xlane.f32.xlu0 %v1736_v2 }
0x1fd5   :  { %v3434_v25 = vpop.xlane.xlu0 %3433 }
0x1fd6   :  { %v3441_v4 = vmul.f32 %v3434_v25, %v4001_v40 }
0x1fd8   :  { %v5317_v21 = vsub.f32 %v3429_v44, %v3441_v4 }
0x1fda   :  { %v3447_v0 = vmul.f32 %v5317_v21, %v5317_v21 }
0x1fdc   :  { %v3450_v10 = vsel %vm153_vm12, %v3447_v0, 0.0 }
0x1fdd   :  { %3451 = vadd.xlane.f32.xlu2 %v3450_v10  ;;  %v3437_v23 = vpop.xlane.xlu1 %3436 }
0x1fde   :  { %v3442_v30 = vmul.f32 %v3437_v23, %v4001_v40 }
0x1fe0   :  { %v5323_v62 = vsub.f32 %v3430_v47, %v3442_v30 }
0x1fe2   :  { %v3448_v36 = vmul.f32 %v5323_v62, %v5323_v62 }
0x1fe4   :  { %v3453_v32 = vsel %vm153_vm12, %v3448_v36, 0.0 }
0x1fe5   :  { %3454 = vadd.xlane.f32.xlu1 %v3453_v32  ;;  %v1735_v46 = vpop.xlane.xlu1 %1734 }
0x1fe6   :  { %v3440_v50 = vpop.xlane.xlu0 %3439  ;;  %v1740_v56 = vmul.f32 %v1735_v46, %v4001_v40 }
0x1fe7   :  { %v3443_v14 = vmul.f32 %v3440_v50, %v4001_v40 }
0x1fe8   :  { %v1743_v41 = vadd.f32 1e-05, %v1740_v56 }
0x1fe9   :  { %v5330_v48 = vsub.f32 %v3431_v49, %v3443_v14 }
0x1fea   :  { %3880 = vrsqrt.f32 %v1743_v41  ;;  %vm1761_vm10 = vweird.f32 %v1743_v41 }
0x1feb   :  { %v3449_v45 = vmul.f32 %v5330_v48, %v5330_v48 }
0x1fed   :  { %v3456_v34 = vsel %vm160_vm13, %v3449_v45, 0.0 }
0x1fee   :  { %3457 = vadd.xlane.f32.xlu0 %v3456_v34  ;;  %v1738_v33 = vpop.xlane.xlu0 %1737 }
0x1fef   :  { %v1741_v5 = vmul.f32 %v1738_v33, %v4001_v40 }
0x1ff0   :  { %v3881_v35 = vpop.eup %3880 }
0x1ff1   :  { %v1744_v38 = vadd.f32 1e-05, %v1741_v5  ;;  %v1756_v28 = vmul.f32 %v3881_v35, %v1743_v41  ;;  %vm1762_vm0 = vweird.f32 %v3881_v35 }
0x1ff2   :  { %vm1763_vm15 = vmor %vm1761_vm10, %vm1762_vm0 }
0x1ff3   :  { %3882 = vrsqrt.f32 %v1744_v38  ;;  %v1757_v13 = vmul.f32 %v3881_v35, %v1756_v28  ;;  %vm1771_vm4 = vweird.f32 %v1744_v38 }
0x1ff5   :  { %v1758_v37 = vmul.f32 0.5, %v1757_v13 }
0x1ff7   :  { %v1759_v60 = vsub.f32 1.5, %v1758_v37 }
0x1ff9   :  { %v3883_v53 = vpop.eup %3882  ;;  %v1760_v54 = vmul.f32 %v3881_v35, %v1759_v60 }
0x1ffa   :  { %v1766_v27 = vmul.f32 %v3883_v53, %v1744_v38  ;;  %vm1772_vm13 = vweird.f32 %v3883_v53 }
0x1ffb   :  { %v1764_v17 = vsel %vm1763_vm15, %v3881_v35, %v1760_v54  ;;  %vm1773_vm6 = vmor %vm1771_vm4, %vm1772_vm13 }
0x1ffc   :  { %v1767_v1 = vmul.f32 %v3883_v53, %v1766_v27  ;;  %v1776_v7 = vmul.f32 %v1764_v17, %v1725_v61 }
0x1ffe   :  { %v1768_v39 = vmul.f32 0.5, %v1767_v1  ;;  %v1780_v8 = vmul.f32 %v5224_v20, %v1776_v7 }
0x2000   :  { %v1769_v51 = vsub.f32 1.5, %v1768_v39  ;;  %v1784_v11 = vadd.f32 %v5232_v31, %v1780_v8 }
0x2002   :  { %v1770_v18 = vmul.f32 %v3883_v53, %v1769_v51  ;;  %v1787_v15 = vsel %vm153_vm12, %v1784_v11, 0.0 }
0x2003   :  { %1790 = vst [vmem:[%s5374_s2 + $0x8] sm:$0xff] %v1787_v15 }
0x2004   :  { %v1774_v58 = vsel %vm1773_vm6, %v3883_v53, %v1770_v18 }
0x2005   :  { %v1777_v52 = vmul.f32 %v1774_v58, %v1726_v26 }
0x2007   :  { %v1781_v44 = vmul.f32 %v5224_v20, %v1777_v52 }
0x2009   :  { %v1785_v57 = vadd.f32 %v5232_v31, %v1781_v44 }
0x200b   :  { %v1788_v43 = vsel %vm153_vm12, %v1785_v57, 0.0 }
0x200c   :  { %1791 = vst [vmem:[%s5374_s2 + $0x10] sm:$0x1] %v1788_v43 }
0x2050   :  { %v3452_v24 = vpop.xlane.xlu2 %3451 }
0x2051   :  { %v3459_v6 = vmul.f32 %v3452_v24, %v4001_v40 }
0x2053   :  { %v3462_v19 = vadd.f32 1e-05, %v3459_v6 }
0x2055   :  { %3884 = vrsqrt.f32 %v3462_v19  ;;  %vm3471_vm5 = vweird.f32 %v3462_v19 }
0x2058   :  { %v3455_v47 = vpop.xlane.xlu1 %3454 }
0x2059   :  { %v3460_v61 = vmul.f32 %v3455_v47, %v4001_v40 }
0x205b   :  { %v3885_v12 = vpop.eup %3884  ;;  %v3463_v29 = vadd.f32 1e-05, %v3460_v61 }
0x205c   :  { %v3466_v16 = vmul.f32 %v3885_v12, %v3462_v19  ;;  %vm3472_vm7 = vweird.f32 %v3885_v12 }
0x205d   :  { %3886 = vrsqrt.f32 %v3463_v29  ;;  %vm3473_vm1 = vmor %vm3471_vm5, %vm3472_vm7  ;;  %vm3481_vm11 = vweird.f32 %v3463_v29 }
0x205e   :  { %v3467_v55 = vmul.f32 %v3885_v12, %v3466_v16 }
0x2060   :  { %v3468_v63 = vmul.f32 0.5, %v3467_v55 }
0x2061   :  { %v3458_v22 = vpop.xlane.xlu0 %3457 }
0x2062   :  { %v3461_v49 = vmul.f32 %v3458_v22, %v4001_v40  ;;  %v3469_v26 = vsub.f32 1.5, %v3468_v63 }
0x2063   :  { %v3887_v59 = vpop.eup %3886 }
0x2064   :  { %v3464_v42 = vadd.f32 1e-05, %v3461_v49  ;;  %v3470_v9 = vmul.f32 %v3885_v12, %v3469_v26  ;;  %v3476_v3 = vmul.f32 %v3887_v59, %v3463_v29  ;;  %vm3482_vm8 = vweird.f32 %v3887_v59 }
0x2065   :  { %vm3483_vm14 = vmor %vm3481_vm11, %vm3482_vm8 }
0x2066   :  { %3888 = vrsqrt.f32 %v3464_v42  ;;  %v3474_v2 = vsel %vm3473_vm1, %v3885_v12, %v3470_v9  ;;  %v3477_v25 = vmul.f32 %v3887_v59, %v3476_v3  ;;  %vm3491_vm3 = vweird.f32 %v3464_v42 }
0x2067   :  { %v3495_v4 = vmul.f32 %v3474_v2, %v5317_v21 }
0x2068   :  { %v3478_v0 = vmul.f32 0.5, %v3477_v25 }
0x2069   :  { %v3498_v10 = vmul.f32 %v5224_v20, %v3495_v4 }
0x206a   :  { %v3479_v23 = vsub.f32 1.5, %v3478_v0 }
0x206b   :  { %v3501_v40 = vadd.f32 %v5232_v31, %v3498_v10 }
0x206c   :  { %v3889_v30 = vpop.eup %3888  ;;  %v3480_v36 = vmul.f32 %v3887_v59, %v3479_v23 }
0x206d   :  { %v3486_v32 = vmul.f32 %v3889_v30, %v3464_v42  ;;  %v3504_v46 = vsel %vm153_vm12, %v3501_v40, 0.0  ;;  %vm3492_vm2 = vweird.f32 %v3889_v30 }
0x206e   :  { %3586 = vst [vmem:[%s5374_s2 + $0x18] sm:$0xff] %v3504_v46  ;;  %v3484_v50 = vsel %vm3483_vm14, %v3887_v59, %v3480_v36  ;;  %vm3493_vm9 = vmor %vm3491_vm3, %vm3492_vm2 }
0x206f   :  { %v3487_v21 = vmul.f32 %v3889_v30, %v3486_v32  ;;  %v3496_v56 = vmul.f32 %v3484_v50, %v5323_v62 }
0x2071   :  { %v3488_v14 = vmul.f32 0.5, %v3487_v21  ;;  %v3499_v41 = vmul.f32 %v5224_v20, %v3496_v56 }
0x2073   :  { %v3489_v45 = vsub.f32 1.5, %v3488_v14  ;;  %v3502_v34 = vadd.f32 %v5232_v31, %v3499_v41 }
0x2075   :  { %v3490_v33 = vmul.f32 %v3889_v30, %v3489_v45  ;;  %v3505_v5 = vsel %vm153_vm12, %v3502_v34, 0.0 }
0x2076   :  { %3587 = vst [vmem:[%s5374_s2 + $0x20] sm:$0xff] %v3505_v5 }
0x2077   :  { %v3494_v35 = vsel %vm3493_vm9, %v3889_v30, %v3490_v33 }
0x2078   :  { %v3497_v38 = vmul.f32 %v3494_v35, %v5330_v48 }
0x207a   :  { %v3500_v62 = vmul.f32 %v5224_v20, %v3497_v38 }
0x207c   :  { %v3503_v28 = vadd.f32 %v5232_v31, %v3500_v62 }
0x207e   :  { %v3506_v13 = vsel %vm153_vm12, %v3503_v28, 0.0 }
0x207f   :  { %3588 = vst [vmem:[%s5374_s2 + $0x28] sm:$0x1] %v3506_v13 }

</bundles_post_ra>
